<compile_context>
chip_gen: v6e
topology: v6e:2x2x1
jax: 0.10.0
libtpu: 0.0.40
codegen_flags: <defaults>
</compile_context>

<pallas_src>
import jax
import jax.numpy as jnp
from jax.experimental import pallas as pl
from jax.experimental.pallas import tpu as pltpu


def _sigmoid(x):
    return 1.0 / (1.0 + jnp.exp(-x))


def _decoder_loop_kernel(
        # inputs
        emb_ref, h0_ref, c0_ref, enc_ref, mask_ref,
        # attention params
        wh_ref, we_ref, b_attn_ref, v_ref,
        # lstm params
        w_ih_ref, w_hh_ref, b_lstm_ref,
        # fc_out params
        w_out_ref, b_out_ref,
        # outputs
        pred_ref, attn_ref, h_out_ref, c_out_ref,
        # scratch: recurrent state carried in VMEM across the step grid
        h_sc, c_sc):
    t = pl.program_id(0)
    T = pl.num_programs(0)
    B, S, E = enc_ref.shape
    D = h_sc.shape[1]

    # ---- recurrent state: init from HBM inputs only at the first step ----
    @pl.when(t == 0)
    def _():
        h_sc[...] = h0_ref[...]
        c_sc[...] = c0_ref[...]

    emb = emb_ref[0]                        # [B, M]    f32 (this step's block)
    h = h_sc[...]                           # [B, D]    f32
    c = c_sc[...]                           # [B, D]    f32
    enc = enc_ref[...]                      # [B, S, E] bf16 (VMEM-resident)

    emb_bf = emb.astype(jnp.bfloat16)
    h_bf = h.astype(jnp.bfloat16)

    # ----------------------------- attention -----------------------------
    # energy = tanh(cat([hidden, enc]) @ W_attn^T + b)
    #        = tanh(hidden @ Wh + enc @ We + b)   (concat split: enc is [B,S,E])
    h_proj = (jnp.dot(h_bf, wh_ref[...], preferred_element_type=jnp.float32)
              + b_attn_ref[...])                                         # [B, D]
    e_proj = jnp.dot(enc.reshape(B * S, E), we_ref[...],
                     preferred_element_type=jnp.float32)                 # [B*S, D]
    energy = jnp.tanh(e_proj.reshape(B, S, D) + h_proj[:, None, :])      # [B, S, D]

    # scores = energy @ v on the MXU (batched [1,D] x [S,D] -> [1,S]); bf16
    # operands, f32 accumulation (explicit precision per review).
    v_b = jnp.broadcast_to(v_ref[...].reshape(1, 1, D), (B, 1, D))       # [B,1,D] bf16
    scores = jnp.einsum('bud,bsd->bus', v_b, energy.astype(jnp.bfloat16),
                        preferred_element_type=jnp.float32)[:, 0, :]     # [B, S]

    # masked_fill(mask == 0, -1e10) + softmax over src_len (lane axis), f32.
    scores = jnp.where(mask_ref[...] == 0, jnp.float32(-1e10), scores)
    m = jnp.max(scores, axis=1, keepdims=True)
    e = jnp.exp(scores - m)
    a = e * pl.reciprocal(jnp.sum(e, axis=1, keepdims=True), approx=True)
    attn_ref[0] = a

    # ---- context vector: weighted = a @ enc (enc tile reused in VMEM) ----
    weighted = jnp.einsum('bus,bse->bue',
                          a.astype(jnp.bfloat16)[:, None, :], enc,
                          preferred_element_type=jnp.float32)[:, 0, :]   # [B, E]
    w_bf = weighted.astype(jnp.bfloat16)

    # ------------------------- LSTM cell (1 step) -------------------------
    # rnn_input = cat([embedded, weighted]) -> single matmul vs W_ih_cat.
    rnn_in = jnp.concatenate([emb_bf, w_bf], axis=1)                     # [B, M+E]
    gates = (jnp.dot(rnn_in, w_ih_ref[...], preferred_element_type=jnp.float32)
             + jnp.dot(h_bf, w_hh_ref[...], preferred_element_type=jnp.float32)
             + b_lstm_ref[...])                                          # [B, 4D]

    i_g = _sigmoid(gates[:, 0 * D:1 * D])
    f_g = _sigmoid(gates[:, 1 * D:2 * D])
    g_g = jnp.tanh(gates[:, 2 * D:3 * D])
    o_g = _sigmoid(gates[:, 3 * D:4 * D])

    c_new = f_g * c + i_g * g_g
    h_new = o_g * jnp.tanh(c_new)
    h_sc[...] = h_new
    c_sc[...] = c_new

    # ------------------------------ fc_out ------------------------------
    # prediction = cat([output, weighted, embedded]) @ W_out_cat + b.
    fc_in = jnp.concatenate([h_new.astype(jnp.bfloat16), w_bf, emb_bf], axis=1)
    pred_ref[0] = (jnp.dot(fc_in, w_out_ref[...],
                           preferred_element_type=jnp.float32)
                   + b_out_ref[...])

    # ---- write recurrent state to HBM only once, at the last step ----
    @pl.when(t == T - 1)
    def _():
        h_out_ref[...] = h_new
        c_out_ref[...] = c_new


def prepare_decoder_params(torch_params, enc_hid_dim, dec_hid_dim, emb_dim):
    """Hoisted weight preprocessing — call ONCE, reuse for the whole decode.
    Splits the attention concat-Linear (hidden/enc parts), re-concatenates the
    LSTM input / fc_out weights into single [in, out] matrices, transposes to
    MXU-friendly layout and casts matmul operands to bf16 (biases stay f32)."""
    D, E, M = dec_hid_dim, enc_hid_dim, emb_dim
    p = torch_params
    bf = jnp.bfloat16
    return dict(
        wh=p['attn_w'][:, :D].T.astype(bf),          # [D, D]  hidden part
        we=p['attn_w'][:, D:].T.astype(bf),          # [E, D]  encoder part
        b_attn=p['attn_b'].reshape(1, D),            # [1, D]  f32
        v=p['v_w'].astype(bf),                       # [1, D]  bf16
        w_ih=p['w_ih'].T.astype(bf),                 # [M+E, 4D] (cat order: emb, ctx)
        w_hh=p['w_hh'].T.astype(bf),                 # [D, 4D]
        b_lstm=(p['b_ih'] + p['b_hh']).reshape(1, 4 * D),
        w_out=p['fc_w'].T.astype(bf),                # [D+E+M, V] (cat: h, ctx, emb)
        b_out=p['fc_b'].reshape(1, -1),              # [1, V]
        embedding=p['embedding'],                    # [V, M] f32
    )


def prepare_encoder_outputs(encoder_outputs):
    """[S, B, E] -> [B, S, E] bf16.  Call ONCE per source sequence."""
    return jnp.transpose(encoder_outputs, (1, 0, 2)).astype(jnp.bfloat16)


def decoder_decode(token_ids_tb, h0, c0, enc_bse, mask, params):
    """Run T fused decode steps (teacher forcing).
    token_ids_tb [T,B] int32, h0/c0 [B,D] f32, enc_bse [B,S,E] bf16
    (from prepare_encoder_outputs), mask [B,S] int32.
    Returns (predictions [T,B,V], attn [T,B,S], h_final [B,D], c_final [B,D])."""
    T, B = token_ids_tb.shape
    _, S, E = enc_bse.shape
    D = h0.shape[1]
    V, M = params['embedding'].shape

    # One XLA gather for ALL steps (hoisted out of the per-step path); the
    # kernel streams (1, B, M) blocks per grid step.
    emb_all = jnp.take(params['embedding'], token_ids_tb.reshape(-1),
                       axis=0).reshape(T, B, M)

    const2 = lambda t: (0, 0)          # same block every step => VMEM-resident
    const3 = lambda t: (0, 0, 0)
    step3 = lambda t: (t, 0, 0)        # per-step block

    grid_spec = pltpu.PrefetchScalarGridSpec(
        num_scalar_prefetch=0,
        grid=(T,),
        in_specs=[
            pl.BlockSpec((1, B, M), step3),         # per-step embeddings
            pl.BlockSpec((B, D), const2),           # h0
            pl.BlockSpec((B, D), const2),           # c0
            pl.BlockSpec((B, S, E), const3),        # encoder outputs (resident)
            pl.BlockSpec((B, S), const2),           # mask (resident)
            pl.BlockSpec((D, D), const2),           # wh
            pl.BlockSpec((E, D), const2),           # we
            pl.BlockSpec((1, D), const2),           # b_attn
            pl.BlockSpec((1, D), const2),           # v
            pl.BlockSpec((M + E, 4 * D), const2),   # w_ih (concat)
            pl.BlockSpec((D, 4 * D), const2),       # w_hh
            pl.BlockSpec((1, 4 * D), const2),       # b_lstm
            pl.BlockSpec((D + E + M, V), const2),   # w_out (concat)
            pl.BlockSpec((1, V), const2),           # b_out
        ],
        out_specs=[
            pl.BlockSpec((1, B, V), step3),         # per-step predictions
            pl.BlockSpec((1, B, S), step3),         # per-step attention
            pl.BlockSpec((B, D), const2),           # final h
            pl.BlockSpec((B, D), const2),           # final c
        ],
        scratch_shapes=[pltpu.VMEM((B, D), jnp.float32),   # h carry
                        pltpu.VMEM((B, D), jnp.float32)],  # c carry
    )
    out_shapes = (
        jax.ShapeDtypeStruct((T, B, V), jnp.float32),
        jax.ShapeDtypeStruct((T, B, S), jnp.float32),
        jax.ShapeDtypeStruct((B, D), jnp.float32),
        jax.ShapeDtypeStruct((B, D), jnp.float32),
    )
    return pl.pallas_call(
        _decoder_loop_kernel,
        grid_spec=grid_spec,
        out_shape=out_shapes,
        compiler_params=pltpu.CompilerParams(
            dimension_semantics=("arbitrary",)),   # steps are sequential
    )(emb_all, h0, c0, enc_bse, mask,
      params['wh'], params['we'], params['b_attn'], params['v'],
      params['w_ih'], params['w_hh'], params['b_lstm'],
      params['w_out'], params['b_out'])


def _reference_step(token_ids, h, c, encoder_outputs, mask, tp):
    """Pure-JAX f32 reference mirroring PyTorch Decoder.forward (eval mode)."""
    embedded = tp['embedding'][token_ids]                            # [B, M]
    S = encoder_outputs.shape[0]
    D = h.shape[1]
    enc_bse = jnp.transpose(encoder_outputs, (1, 0, 2))              # [B, S, E]
    h_rep = jnp.repeat(h[:, None, :], S, axis=1)                     # [B, S, D]
    energy = jnp.tanh(jnp.concatenate([h_rep, enc_bse], axis=2) @ tp['attn_w'].T
                      + tp['attn_b'])                                # [B, S, D]
    scores = (energy @ tp['v_w'].T)[..., 0]                          # [B, S]
    scores = jnp.where(mask == 0, -1e10, scores)
    a = jax.nn.softmax(scores, axis=1)
    weighted = jnp.einsum('bs,bse->be', a, enc_bse)                  # [B, E]
    rnn_in = jnp.concatenate([embedded, weighted], axis=1)
    gates = rnn_in @ tp['w_ih'].T + tp['b_ih'] + h @ tp['w_hh'].T + tp['b_hh']
    i = jax.nn.sigmoid(gates[:, :D])
    f = jax.nn.sigmoid(gates[:, D:2 * D])
    g = jnp.tanh(gates[:, 2 * D:3 * D])
    o = jax.nn.sigmoid(gates[:, 3 * D:4 * D])
    c_new = f * c + i * g
    h_new = o * jnp.tanh(c_new)
    pred = (jnp.concatenate([h_new, weighted, embedded], axis=1) @ tp['fc_w'].T
            + tp['fc_b'])
    return pred, h_new, c_new, a


if __name__ == "__main__":
    # (8,128)-aligned small demo: batch=8, src_len=128, T=4 decode steps,
    # enc_hid=dec_hid=emb=128, vocab(output_dim)=256.
    B, S, T = 8, 128, 4
    E, D, M, V = 128, 128, 128, 256

    key = jax.random.PRNGKey(0)
    ks = jax.random.split(key, 16)

    h0 = jax.random.normal(ks[0], (B, D), jnp.float32)
    c0 = jax.random.normal(ks[1], (B, D), jnp.float32)
    encoder_outputs = jax.random.normal(ks[2], (S, B, E), jnp.float32)
    token_ids_tb = jax.random.randint(ks[3], (T, B), 0, V, jnp.int32)
    mask = (jax.random.uniform(ks[4], (B, S)) > 0.3).astype(jnp.int32)
    mask = mask.at[:, 0].set(1)          # keep >=1 valid position per row

    def u(k, shape, fan_in):
        b = 1.0 / jnp.sqrt(jnp.float32(fan_in))
        return jax.random.uniform(k, shape, jnp.float32, -b, b)

    # Parameters in PyTorch layout (nn.Linear / nn.LSTM / nn.Embedding).
    torch_params = dict(
        attn_w=u(ks[5], (D, D + E), D + E),
        attn_b=u(ks[6], (D,), D + E),
        v_w=u(ks[7], (1, D), D),
        w_ih=u(ks[8], (4 * D, M + E), D),
        w_hh=u(ks[9], (4 * D, D), D),
        b_ih=u(ks[10], (4 * D,), D),
        b_hh=u(ks[11], (4 * D,), D),
        fc_w=u(ks[12], (V, D + E + M), D + E + M),
        fc_b=u(ks[13], (V,), D + E + M),
        embedding=jax.random.normal(ks[14], (V, M), jnp.float32),
    )

    params = prepare_decoder_params(torch_params, E, D, M)   # hoisted: once
    enc_bse = prepare_encoder_outputs(encoder_outputs)       # hoisted: once / seq

    decode = jax.jit(decoder_decode)
    preds, attns, h_fin, c_fin = jax.block_until_ready(
        decode(token_ids_tb, h0, c0, enc_bse, mask, params))

    assert preds.shape == (T, B, V) and attns.shape == (T, B, S)
    assert h_fin.shape == (B, D) and c_fin.shape == (B, D)

    # Step-by-step pure-JAX reference (teacher forcing).  bf16 MXU operands +
    # approx reciprocal + T-step compounding -> loosened tolerances.
    h_ref, c_ref = h0, c0
    for t in range(T):
        rp, rh, rc, ra = _reference_step(
            token_ids_tb[t], h_ref, c_ref, encoder_outputs, mask, torch_params)
        assert jnp.allclose(attns[t], ra, atol=3e-2, rtol=3e-2), f"attn step {t}"
        assert jnp.allclose(preds[t], rp, atol=4e-2, rtol=4e-2), f"pred step {t}"
        h_ref, c_ref = rh, rc
    assert jnp.allclose(h_fin, h_ref, atol=4e-2, rtol=4e-2)
    assert jnp.allclose(c_fin, c_ref, atol=4e-2, rtol=4e-2)
    print("KERNEL_OK")
</pallas_src>

<mosaic_0001>
module attributes {stable_mosaic.version = 11 : i64} {
  func.func @_decoder_loop_kernel(%arg0: i32, %arg1: memref<1x8x128xf32, #tpu.memory_space<vmem>>, %arg2: memref<8x128xf32, #tpu.memory_space<vmem>>, %arg3: memref<8x128xf32, #tpu.memory_space<vmem>>, %arg4: memref<8x128x128xbf16, #tpu.memory_space<vmem>>, %arg5: memref<8x128xi32, #tpu.memory_space<vmem>>, %arg6: memref<128x128xbf16, #tpu.memory_space<vmem>>, %arg7: memref<128x128xbf16, #tpu.memory_space<vmem>>, %arg8: memref<1x128xf32, #tpu.memory_space<vmem>>, %arg9: memref<1x128xbf16, #tpu.memory_space<vmem>>, %arg10: memref<256x512xbf16, #tpu.memory_space<vmem>>, %arg11: memref<128x512xbf16, #tpu.memory_space<vmem>>, %arg12: memref<1x512xf32, #tpu.memory_space<vmem>>, %arg13: memref<384x256xbf16, #tpu.memory_space<vmem>>, %arg14: memref<1x256xf32, #tpu.memory_space<vmem>>, %arg15: memref<1x8x256xf32, #tpu.memory_space<vmem>>, %arg16: memref<1x8x128xf32, #tpu.memory_space<vmem>>, %arg17: memref<8x128xf32, #tpu.memory_space<vmem>>, %arg18: memref<8x128xf32, #tpu.memory_space<vmem>>, %arg19: memref<8x128xf32, #tpu.memory_space<vmem>>, %arg20: memref<8x128xf32, #tpu.memory_space<vmem>>) attributes {dimension_semantics = [#tpu.dimension_semantics<arbitrary>], iteration_bounds = array<i64: 4>, scalar_prefetch = 0 : i64, scratch_operands = 2 : i64, tpu.core_type = #tpu.core_type<tc>, window_params = [{transform_indices = @transform_0, window_bounds = array<i64: 1, 8, 128>}, {pipeline_mode = #tpu.pipeline_mode<synchronous>, transform_indices = @transform_1, window_bounds = array<i64: 8, 128>}, {pipeline_mode = #tpu.pipeline_mode<synchronous>, transform_indices = @transform_2, window_bounds = array<i64: 8, 128>}, {pipeline_mode = #tpu.pipeline_mode<synchronous>, transform_indices = @transform_3, window_bounds = array<i64: 8, 128, 128>}, {pipeline_mode = #tpu.pipeline_mode<synchronous>, transform_indices = @transform_4, window_bounds = array<i64: 8, 128>}, {pipeline_mode = #tpu.pipeline_mode<synchronous>, transform_indices = @transform_5, window_bounds = array<i64: 128, 128>}, {pipeline_mode = #tpu.pipeline_mode<synchronous>, transform_indices = @transform_6, window_bounds = array<i64: 128, 128>}, {pipeline_mode = #tpu.pipeline_mode<synchronous>, transform_indices = @transform_7, window_bounds = array<i64: 1, 128>}, {pipeline_mode = #tpu.pipeline_mode<synchronous>, transform_indices = @transform_8, window_bounds = array<i64: 1, 128>}, {pipeline_mode = #tpu.pipeline_mode<synchronous>, transform_indices = @transform_9, window_bounds = array<i64: 256, 512>}, {pipeline_mode = #tpu.pipeline_mode<synchronous>, transform_indices = @transform_10, window_bounds = array<i64: 128, 512>}, {pipeline_mode = #tpu.pipeline_mode<synchronous>, transform_indices = @transform_11, window_bounds = array<i64: 1, 512>}, {pipeline_mode = #tpu.pipeline_mode<synchronous>, transform_indices = @transform_12, window_bounds = array<i64: 384, 256>}, {pipeline_mode = #tpu.pipeline_mode<synchronous>, transform_indices = @transform_13, window_bounds = array<i64: 1, 256>}, {transform_indices = @transform_14, window_bounds = array<i64: 1, 8, 256>}, {transform_indices = @transform_15, window_bounds = array<i64: 1, 8, 128>}, {pipeline_mode = #tpu.pipeline_mode<synchronous>, transform_indices = @transform_16, window_bounds = array<i64: 8, 128>}, {pipeline_mode = #tpu.pipeline_mode<synchronous>, transform_indices = @transform_17, window_bounds = array<i64: 8, 128>}]} {
    %c0_i32 = arith.constant 0 : i32
    %0 = arith.cmpi eq, %arg0, %c0_i32 : i32
    %1 = arith.extui %0 : i1 to i32
    %c0_i32_0 = arith.constant 0 : i32
    %2 = arith.cmpi ne, %1, %c0_i32_0 : i32
    scf.if %2 {
      %c0_60 = arith.constant 0 : index
      %c0_61 = arith.constant 0 : index
      %108 = vector.load %arg2[%c0_60, %c0_61] : memref<8x128xf32, #tpu.memory_space<vmem>>, vector<8x128xf32>
      %c0_62 = arith.constant 0 : index
      %c0_63 = arith.constant 0 : index
      %109 = vector.load %arg19[%c0_62, %c0_63] : memref<8x128xf32, #tpu.memory_space<vmem>>, vector<8x128xf32>
      tpu.vector_store %arg19[%c0_62, %c0_63], %108 {strides = array<i32>} : memref<8x128xf32, #tpu.memory_space<vmem>>, vector<8x128xf32>,
      %c0_64 = arith.constant 0 : index
      %c0_65 = arith.constant 0 : index
      %110 = vector.load %arg3[%c0_64, %c0_65] : memref<8x128xf32, #tpu.memory_space<vmem>>, vector<8x128xf32>
      %c0_66 = arith.constant 0 : index
      %c0_67 = arith.constant 0 : index
      %111 = vector.load %arg20[%c0_66, %c0_67] : memref<8x128xf32, #tpu.memory_space<vmem>>, vector<8x128xf32>
      tpu.vector_store %arg20[%c0_66, %c0_67], %110 {strides = array<i32>} : memref<8x128xf32, #tpu.memory_space<vmem>>, vector<8x128xf32>,
    } else {
    }
    %c0 = arith.constant 0 : index
    %c0_1 = arith.constant 0 : index
    %c0_2 = arith.constant 0 : index
    %3 = vector.load %arg1[%c0, %c0_1, %c0_2] : memref<1x8x128xf32, #tpu.memory_space<vmem>>, vector<1x8x128xf32>
    %4 = vector.shape_cast %3 : vector<1x8x128xf32> to vector<8x128xf32>
    %c0_3 = arith.constant 0 : index
    %c0_4 = arith.constant 0 : index
    %5 = vector.load %arg19[%c0_3, %c0_4] : memref<8x128xf32, #tpu.memory_space<vmem>>, vector<8x128xf32>
    %c0_5 = arith.constant 0 : index
    %c0_6 = arith.constant 0 : index
    %6 = vector.load %arg20[%c0_5, %c0_6] : memref<8x128xf32, #tpu.memory_space<vmem>>, vector<8x128xf32>
    %c0_7 = arith.constant 0 : index
    %c0_8 = arith.constant 0 : index
    %c0_9 = arith.constant 0 : index
    %7 = vector.load %arg4[%c0_7, %c0_8, %c0_9] : memref<8x128x128xbf16, #tpu.memory_space<vmem>>, vector<8x128x128xbf16>
    %8 = arith.truncf %4 : vector<8x128xf32> to vector<8x128xbf16>
    %9 = arith.truncf %5 : vector<8x128xf32> to vector<8x128xbf16>
    %c0_10 = arith.constant 0 : index
    %c0_11 = arith.constant 0 : index
    %10 = vector.load %arg6[%c0_10, %c0_11] : memref<128x128xbf16, #tpu.memory_space<vmem>>, vector<128x128xbf16>
    %cst = arith.constant dense<0.000000e+00> : vector<8x128xf32>
    %11 = tpu.matmul %9, %10, %cst {dimension_numbers = #tpu.dot_dimension_numbers<[1], [0], [0], [1], [0, 0, 1, 1], [], []>} : vector<8x128xbf16>, vector<128x128xbf16>, vector<8x128xf32> -> vector<8x128xf32>
    %c0_12 = arith.constant 0 : index
    %c0_13 = arith.constant 0 : index
    %12 = vector.load %arg8[%c0_12, %c0_13] : memref<1x128xf32, #tpu.memory_space<vmem>>, vector<1x128xf32>
    %13 = vector.broadcast %12 : vector<1x128xf32> to vector<8x128xf32>
    %14 = arith.addf %11, %13 : vector<8x128xf32>
    %15 = vector.shape_cast %7 : vector<8x128x128xbf16> to vector<1024x128xbf16>
    %c0_14 = arith.constant 0 : index
    %c0_15 = arith.constant 0 : index
    %16 = vector.load %arg7[%c0_14, %c0_15] : memref<128x128xbf16, #tpu.memory_space<vmem>>, vector<128x128xbf16>
    %cst_16 = arith.constant dense<0.000000e+00> : vector<1024x128xf32>
    %17 = tpu.matmul %15, %16, %cst_16 {dimension_numbers = #tpu.dot_dimension_numbers<[1], [0], [0], [1], [0, 0, 1, 1], [], []>} : vector<1024x128xbf16>, vector<128x128xbf16>, vector<1024x128xf32> -> vector<1024x128xf32>
    %18 = vector.shape_cast %17 : vector<1024x128xf32> to vector<8x128x128xf32>
    %19 = vector.shape_cast %14 : vector<8x128xf32> to vector<8x1x128xf32>
    %20 = vector.broadcast %19 : vector<8x1x128xf32> to vector<8x128x128xf32>
    %21 = arith.addf %18, %20 : vector<8x128x128xf32>
    %22 = math.tanh %21 : vector<8x128x128xf32>
    %c0_17 = arith.constant 0 : index
    %c0_18 = arith.constant 0 : index
    %23 = vector.load %arg9[%c0_17, %c0_18] : memref<1x128xbf16, #tpu.memory_space<vmem>>, vector<1x128xbf16>
    %24 = vector.shape_cast %23 : vector<1x128xbf16> to vector<1x1x128xbf16>
    %25 = vector.shape_cast %24 : vector<1x1x128xbf16> to vector<1x1x128xbf16>
    %26 = vector.broadcast %25 : vector<1x1x128xbf16> to vector<8x1x128xbf16>
    %27 = arith.truncf %22 : vector<8x128x128xf32> to vector<8x128x128xbf16>
    "tpu.trace_start"() <{level = 10 : i32, message = "bud,bsd->bus"}> : () -> ()
    %cst_19 = arith.constant dense<0.000000e+00> : vector<8x1x128xf32>
    %28 = tpu.matmul %26, %27, %cst_19 {dimension_numbers = #tpu.dot_dimension_numbers<[2], [2], [1], [1], [0, 0, 0, 1, 1, 1], [0], [0]>} : vector<8x1x128xbf16>, vector<8x128x128xbf16>, vector<8x1x128xf32> -> vector<8x1x128xf32>
    "tpu.trace_stop"() : () -> ()
    %29 = vector.shape_cast %28 : vector<8x1x128xf32> to vector<8x128xf32>
    %c0_20 = arith.constant 0 : index
    %c0_21 = arith.constant 0 : index
    %30 = vector.load %arg5[%c0_20, %c0_21] : memref<8x128xi32, #tpu.memory_space<vmem>>, vector<8x128xi32>
    %c0_i32_22 = arith.constant 0 : i32
    %31 = vector.broadcast %c0_i32_22 : i32 to vector<8x128xi32>
    %32 = arith.cmpi eq, %30, %31 : vector<8x128xi32>
    %cst_23 = arith.constant -1.000000e+10 : f32
    %33 = vector.broadcast %cst_23 : f32 to vector<8x128xf32>
    %34 = arith.select %32, %33, %29 : vector<8x128xi1>, vector<8x128xf32>
    %cst_24 = arith.constant dense<0xFF800000> : vector<8xf32>
    %35 = vector.multi_reduction <maximumf>, %34, %cst_24 [1] : vector<8x128xf32> to vector<8xf32>
    %36 = vector.shape_cast %35 : vector<8xf32> to vector<8x1xf32>
    %37 = vector.broadcast %36 : vector<8x1xf32> to vector<8x128xf32>
    %38 = arith.subf %34, %37 : vector<8x128xf32>
    %39 = math.exp %38 : vector<8x128xf32>
    %cst_25 = arith.constant dense<0.000000e+00> : vector<8xf32>
    %40 = vector.multi_reduction <add>, %39, %cst_25 [1] : vector<8x128xf32> to vector<8xf32>
    %41 = vector.shape_cast %40 : vector<8xf32> to vector<8x1xf32>
    %42 = tpu.reciprocal %41 {approx = true} : vector<8x1xf32> -> vector<8x1xf32>
    %43 = vector.broadcast %42 : vector<8x1xf32> to vector<8x128xf32>
    %44 = arith.mulf %39, %43 : vector<8x128xf32>
    %c0_26 = arith.constant 0 : index
    %c0_27 = arith.constant 0 : index
    %c0_28 = arith.constant 0 : index
    %45 = vector.load %arg16[%c0_26, %c0_27, %c0_28] : memref<1x8x128xf32, #tpu.memory_space<vmem>>, vector<1x8x128xf32>
    %46 = vector.shape_cast %45 : vector<1x8x128xf32> to vector<8x128xf32>
    %47 = vector.shape_cast %44 : vector<8x128xf32> to vector<1x8x128xf32>
    tpu.vector_store %arg16[%c0_26, %c0_27, %c0_28], %47 {strides = array<i32>} : memref<1x8x128xf32, #tpu.memory_space<vmem>>, vector<1x8x128xf32>,
    %48 = arith.truncf %44 : vector<8x128xf32> to vector<8x128xbf16>
    %49 = vector.shape_cast %48 : vector<8x128xbf16> to vector<8x1x128xbf16>
    "tpu.trace_start"() <{level = 10 : i32, message = "bus,bse->bue"}> : () -> ()
    %cst_29 = arith.constant dense<0.000000e+00> : vector<8x1x128xf32>
    %50 = tpu.matmul %49, %7, %cst_29 {dimension_numbers = #tpu.dot_dimension_numbers<[2], [1], [1], [2], [0, 0, 0, 1, 1, 2], [0], [0]>} : vector<8x1x128xbf16>, vector<8x128x128xbf16>, vector<8x1x128xf32> -> vector<8x1x128xf32>
    "tpu.trace_stop"() : () -> ()
    %51 = vector.shape_cast %50 : vector<8x1x128xf32> to vector<8x128xf32>
    %52 = arith.truncf %51 : vector<8x128xf32> to vector<8x128xbf16>
    %53 = tpu.concatenate %8, %52 in 1 : vector<8x128xbf16>, vector<8x128xbf16> -> vector<8x256xbf16>
    %c0_30 = arith.constant 0 : index
    %c0_31 = arith.constant 0 : index
    %54 = vector.load %arg10[%c0_30, %c0_31] : memref<256x512xbf16, #tpu.memory_space<vmem>>, vector<256x512xbf16>
    %cst_32 = arith.constant dense<0.000000e+00> : vector<8x512xf32>
    %55 = tpu.matmul %53, %54, %cst_32 {dimension_numbers = #tpu.dot_dimension_numbers<[1], [0], [0], [1], [0, 0, 1, 1], [], []>} : vector<8x256xbf16>, vector<256x512xbf16>, vector<8x512xf32> -> vector<8x512xf32>
    %c0_33 = arith.constant 0 : index
    %c0_34 = arith.constant 0 : index
    %56 = vector.load %arg11[%c0_33, %c0_34] : memref<128x512xbf16, #tpu.memory_space<vmem>>, vector<128x512xbf16>
    %cst_35 = arith.constant dense<0.000000e+00> : vector<8x512xf32>
    %57 = tpu.matmul %9, %56, %cst_35 {dimension_numbers = #tpu.dot_dimension_numbers<[1], [0], [0], [1], [0, 0, 1, 1], [], []>} : vector<8x128xbf16>, vector<128x512xbf16>, vector<8x512xf32> -> vector<8x512xf32>
    %58 = arith.addf %55, %57 : vector<8x512xf32>
    %c0_36 = arith.constant 0 : index
    %c0_37 = arith.constant 0 : index
    %59 = vector.load %arg12[%c0_36, %c0_37] : memref<1x512xf32, #tpu.memory_space<vmem>>, vector<1x512xf32>
    %60 = vector.broadcast %59 : vector<1x512xf32> to vector<8x512xf32>
    %61 = arith.addf %58, %60 : vector<8x512xf32>
    %62 = vector.extract_strided_slice %61 {offsets = [0, 0], sizes = [8, 128], strides = [1, 1]} : vector<8x512xf32> to vector<8x128xf32>
    %cst_38 = arith.constant 0.000000e+00 : f32
    %63 = vector.broadcast %cst_38 : f32 to vector<8x128xf32>
    %64 = arith.subf %63, %62 : vector<8x128xf32>
    %65 = math.exp %64 : vector<8x128xf32>
    %cst_39 = arith.constant 1.000000e+00 : f32
    %66 = vector.broadcast %cst_39 : f32 to vector<8x128xf32>
    %67 = arith.addf %66, %65 : vector<8x128xf32>
    %cst_40 = arith.constant 1.000000e+00 : f32
    %68 = vector.broadcast %cst_40 : f32 to vector<8x128xf32>
    %69 = arith.divf %68, %67 : vector<8x128xf32>
    %70 = vector.extract_strided_slice %61 {offsets = [0, 128], sizes = [8, 128], strides = [1, 1]} : vector<8x512xf32> to vector<8x128xf32>
    %cst_41 = arith.constant 0.000000e+00 : f32
    %71 = vector.broadcast %cst_41 : f32 to vector<8x128xf32>
    %72 = arith.subf %71, %70 : vector<8x128xf32>
    %73 = math.exp %72 : vector<8x128xf32>
    %cst_42 = arith.constant 1.000000e+00 : f32
    %74 = vector.broadcast %cst_42 : f32 to vector<8x128xf32>
    %75 = arith.addf %74, %73 : vector<8x128xf32>
    %cst_43 = arith.constant 1.000000e+00 : f32
    %76 = vector.broadcast %cst_43 : f32 to vector<8x128xf32>
    %77 = arith.divf %76, %75 : vector<8x128xf32>
    %78 = vector.extract_strided_slice %61 {offsets = [0, 256], sizes = [8, 128], strides = [1, 1]} : vector<8x512xf32> to vector<8x128xf32>
    %79 = math.tanh %78 : vector<8x128xf32>
    %80 = vector.extract_strided_slice %61 {offsets = [0, 384], sizes = [8, 128], strides = [1, 1]} : vector<8x512xf32> to vector<8x128xf32>
    %cst_44 = arith.constant 0.000000e+00 : f32
    %81 = vector.broadcast %cst_44 : f32 to vector<8x128xf32>
    %82 = arith.subf %81, %80 : vector<8x128xf32>
    %83 = math.exp %82 : vector<8x128xf32>
    %cst_45 = arith.constant 1.000000e+00 : f32
    %84 = vector.broadcast %cst_45 : f32 to vector<8x128xf32>
    %85 = arith.addf %84, %83 : vector<8x128xf32>
    %cst_46 = arith.constant 1.000000e+00 : f32
    %86 = vector.broadcast %cst_46 : f32 to vector<8x128xf32>
    %87 = arith.divf %86, %85 : vector<8x128xf32>
    %88 = arith.mulf %77, %6 : vector<8x128xf32>
    %89 = arith.mulf %69, %79 : vector<8x128xf32>
    %90 = arith.addf %88, %89 : vector<8x128xf32>
    %91 = math.tanh %90 : vector<8x128xf32>
    %92 = arith.mulf %87, %91 : vector<8x128xf32>
    %c0_47 = arith.constant 0 : index
    %c0_48 = arith.constant 0 : index
    %93 = vector.load %arg19[%c0_47, %c0_48] : memref<8x128xf32, #tpu.memory_space<vmem>>, vector<8x128xf32>
    tpu.vector_store %arg19[%c0_47, %c0_48], %92 {strides = array<i32>} : memref<8x128xf32, #tpu.memory_space<vmem>>, vector<8x128xf32>,
    %c0_49 = arith.constant 0 : index
    %c0_50 = arith.constant 0 : index
    %94 = vector.load %arg20[%c0_49, %c0_50] : memref<8x128xf32, #tpu.memory_space<vmem>>, vector<8x128xf32>
    tpu.vector_store %arg20[%c0_49, %c0_50], %90 {strides = array<i32>} : memref<8x128xf32, #tpu.memory_space<vmem>>, vector<8x128xf32>,
    %95 = arith.truncf %92 : vector<8x128xf32> to vector<8x128xbf16>
    %96 = tpu.concatenate %95, %52, %8 in 1 : vector<8x128xbf16>, vector<8x128xbf16>, vector<8x128xbf16> -> vector<8x384xbf16>
    %c0_51 = arith.constant 0 : index
    %c0_52 = arith.constant 0 : index
    %97 = vector.load %arg13[%c0_51, %c0_52] : memref<384x256xbf16, #tpu.memory_space<vmem>>, vector<384x256xbf16>
    %cst_53 = arith.constant dense<0.000000e+00> : vector<8x256xf32>
    %98 = tpu.matmul %96, %97, %cst_53 {dimension_numbers = #tpu.dot_dimension_numbers<[1], [0], [0], [1], [0, 0, 1, 1], [], []>} : vector<8x384xbf16>, vector<384x256xbf16>, vector<8x256xf32> -> vector<8x256xf32>
    %c0_54 = arith.constant 0 : index
    %c0_55 = arith.constant 0 : index
    %99 = vector.load %arg14[%c0_54, %c0_55] : memref<1x256xf32, #tpu.memory_space<vmem>>, vector<1x256xf32>
    %100 = vector.broadcast %99 : vector<1x256xf32> to vector<8x256xf32>
    %101 = arith.addf %98, %100 : vector<8x256xf32>
    %c0_56 = arith.constant 0 : index
    %c0_57 = arith.constant 0 : index
    %c0_58 = arith.constant 0 : index
    %102 = vector.load %arg15[%c0_56, %c0_57, %c0_58] : memref<1x8x256xf32, #tpu.memory_space<vmem>>, vector<1x8x256xf32>
    %103 = vector.shape_cast %102 : vector<1x8x256xf32> to vector<8x256xf32>
    %104 = vector.shape_cast %101 : vector<8x256xf32> to vector<1x8x256xf32>
    tpu.vector_store %arg15[%c0_56, %c0_57, %c0_58], %104 {strides = array<i32>} : memref<1x8x256xf32, #tpu.memory_space<vmem>>, vector<1x8x256xf32>,
    %c3_i32 = arith.constant 3 : i32
    %105 = arith.cmpi eq, %arg0, %c3_i32 : i32
    %106 = arith.extui %105 : i1 to i32
    %c0_i32_59 = arith.constant 0 : i32
    %107 = arith.cmpi ne, %106, %c0_i32_59 : i32
    scf.if %107 {
      %c0_60 = arith.constant 0 : index
      %c0_61 = arith.constant 0 : index
      %108 = vector.load %arg17[%c0_60, %c0_61] : memref<8x128xf32, #tpu.memory_space<vmem>>, vector<8x128xf32>
      tpu.vector_store %arg17[%c0_60, %c0_61], %92 {strides = array<i32>} : memref<8x128xf32, #tpu.memory_space<vmem>>, vector<8x128xf32>,
      %c0_62 = arith.constant 0 : index
      %c0_63 = arith.constant 0 : index
      %109 = vector.load %arg18[%c0_62, %c0_63] : memref<8x128xf32, #tpu.memory_space<vmem>>, vector<8x128xf32>
      tpu.vector_store %arg18[%c0_62, %c0_63], %90 {strides = array<i32>} : memref<8x128xf32, #tpu.memory_space<vmem>>, vector<8x128xf32>,
    } else {
    }
    return
  }
  func.func @transform_0(%arg0: i32) -> (i32, i32, i32) {
    %c0_i32 = arith.constant 0 : i32
    %c0_i32_0 = arith.constant 0 : i32
    %c0_i32_1 = arith.constant 0 : i32
    return %arg0, %c0_i32, %c0_i32_0 : i32, i32, i32
  }
  func.func @transform_1(%arg0: i32) -> (i32, i32) {
    %c0_i32 = arith.constant 0 : i32
    %c0_i32_0 = arith.constant 0 : i32
    %c0_i32_1 = arith.constant 0 : i32
    return %c0_i32, %c0_i32_0 : i32, i32
  }
  func.func @transform_2(%arg0: i32) -> (i32, i32) {
    %c0_i32 = arith.constant 0 : i32
    %c0_i32_0 = arith.constant 0 : i32
    %c0_i32_1 = arith.constant 0 : i32
    return %c0_i32, %c0_i32_0 : i32, i32
  }
  func.func @transform_3(%arg0: i32) -> (i32, i32, i32) {
    %c0_i32 = arith.constant 0 : i32
    %c0_i32_0 = arith.constant 0 : i32
    %c0_i32_1 = arith.constant 0 : i32
    %c0_i32_2 = arith.constant 0 : i32
    return %c0_i32, %c0_i32_0, %c0_i32_1 : i32, i32, i32
  }
  func.func @transform_4(%arg0: i32) -> (i32, i32) {
    %c0_i32 = arith.constant 0 : i32
    %c0_i32_0 = arith.constant 0 : i32
    %c0_i32_1 = arith.constant 0 : i32
    return %c0_i32, %c0_i32_0 : i32, i32
  }
  func.func @transform_5(%arg0: i32) -> (i32, i32) {
    %c0_i32 = arith.constant 0 : i32
    %c0_i32_0 = arith.constant 0 : i32
    %c0_i32_1 = arith.constant 0 : i32
    return %c0_i32, %c0_i32_0 : i32, i32
  }
  func.func @transform_6(%arg0: i32) -> (i32, i32) {
    %c0_i32 = arith.constant 0 : i32
    %c0_i32_0 = arith.constant 0 : i32
    %c0_i32_1 = arith.constant 0 : i32
    return %c0_i32, %c0_i32_0 : i32, i32
  }
  func.func @transform_7(%arg0: i32) -> (i32, i32) {
    %c0_i32 = arith.constant 0 : i32
    %c0_i32_0 = arith.constant 0 : i32
    %c0_i32_1 = arith.constant 0 : i32
    return %c0_i32, %c0_i32_0 : i32, i32
  }
  func.func @transform_8(%arg0: i32) -> (i32, i32) {
    %c0_i32 = arith.constant 0 : i32
    %c0_i32_0 = arith.constant 0 : i32
    %c0_i32_1 = arith.constant 0 : i32
    return %c0_i32, %c0_i32_0 : i32, i32
  }
  func.func @transform_9(%arg0: i32) -> (i32, i32) {
    %c0_i32 = arith.constant 0 : i32
    %c0_i32_0 = arith.constant 0 : i32
    %c0_i32_1 = arith.constant 0 : i32
    return %c0_i32, %c0_i32_0 : i32, i32
  }
  func.func @transform_10(%arg0: i32) -> (i32, i32) {
    %c0_i32 = arith.constant 0 : i32
    %c0_i32_0 = arith.constant 0 : i32
    %c0_i32_1 = arith.constant 0 : i32
    return %c0_i32, %c0_i32_0 : i32, i32
  }
  func.func @transform_11(%arg0: i32) -> (i32, i32) {
    %c0_i32 = arith.constant 0 : i32
    %c0_i32_0 = arith.constant 0 : i32
    %c0_i32_1 = arith.constant 0 : i32
    return %c0_i32, %c0_i32_0 : i32, i32
  }
  func.func @transform_12(%arg0: i32) -> (i32, i32) {
    %c0_i32 = arith.constant 0 : i32
    %c0_i32_0 = arith.constant 0 : i32
    %c0_i32_1 = arith.constant 0 : i32
    return %c0_i32, %c0_i32_0 : i32, i32
  }
  func.func @transform_13(%arg0: i32) -> (i32, i32) {
    %c0_i32 = arith.constant 0 : i32
    %c0_i32_0 = arith.constant 0 : i32
    %c0_i32_1 = arith.constant 0 : i32
    return %c0_i32, %c0_i32_0 : i32, i32
  }
  func.func @transform_14(%arg0: i32) -> (i32, i32, i32) {
    %c0_i32 = arith.constant 0 : i32
    %c0_i32_0 = arith.constant 0 : i32
    %c0_i32_1 = arith.constant 0 : i32
    return %arg0, %c0_i32, %c0_i32_0 : i32, i32, i32
  }
  func.func @transform_15(%arg0: i32) -> (i32, i32, i32) {
    %c0_i32 = arith.constant 0 : i32
    %c0_i32_0 = arith.constant 0 : i32
    %c0_i32_1 = arith.constant 0 : i32
    return %arg0, %c0_i32, %c0_i32_0 : i32, i32, i32
  }
  func.func @transform_16(%arg0: i32) -> (i32, i32) {
    %c0_i32 = arith.constant 0 : i32
    %c0_i32_0 = arith.constant 0 : i32
    %c0_i32_1 = arith.constant 0 : i32
    return %c0_i32, %c0_i32_0 : i32, i32
  }
  func.func @transform_17(%arg0: i32) -> (i32, i32) {
    %c0_i32 = arith.constant 0 : i32
    %c0_i32_0 = arith.constant 0 : i32
    %c0_i32_1 = arith.constant 0 : i32
    return %c0_i32, %c0_i32_0 : i32, i32
  }
}

</mosaic_0001>

<bundles_post_ra>
// kernel: decoder_decode.1
= control target key start
LH: loop header
LB: loop body
LE: loop exit
PB: predicated region body
PF: predicated region fallthrough
CT: control target
= control target key end

     0   :  { %s8285_s0 = inlined_call_operand.vmem [shape: f32[4,8,128], index: 0, kind: input, shape index: {}]   ;;  %s8286_s1 = inlined_call_operand.vmem [shape: f32[8,128], index: 1, kind: input, shape index: {}]   ;;  %s8287_s2 = inlined_call_operand.hbm [shape: f32[8,128], index: 2, kind: input, shape index: {}]   ;;  %s8288_s3 = inlined_call_operand.hbm [shape: bf16[8,128,128], index: 3, kind: input, shape index: {}]   ;;  %s8289_s4 = inlined_call_operand.hbm [shape: s32[8,128], index: 4, kind: input, shape index: {}]   ;;  %s8290_s5 = inlined_call_operand.hbm [shape: bf16[128,128], index: 5, kind: input, shape index: {}]   ;;  %s8291_s6 = inlined_call_operand.hbm [shape: bf16[128,128], index: 6, kind: input, shape index: {}]   ;;  %s8292_s7 = inlined_call_operand.hbm [shape: f32[1,128], index: 7, kind: input, shape index: {}]   ;;  %s8293_s8 = inlined_call_operand.hbm [shape: bf16[1,128], index: 8, kind: input, shape index: {}]   ;;  %s8294_s9 = inlined_call_operand.hbm [shape: bf16[256,512], index: 9, kind: input, shape index: {}]   ;;  %s8295_s10 = inlined_call_operand.hbm [shape: bf16[128,512], index: 10, kind: input, shape index: {}]   ;;  %s8296_s11 = inlined_call_operand.hbm [shape: f32[1,512], index: 11, kind: input, shape index: {}]   ;;  %s8297_s12 = inlined_call_operand.vmem [shape: bf16[384,256], index: 12, kind: input, shape index: {}]   ;;  %s8298_s13 = inlined_call_operand.hbm [shape: f32[1,256], index: 13, kind: input, shape index: {}]   ;;  %s8299_s14 = inlined_call_operand.hbm [shape: f32[4,8,256], index: 14, kind: output, shape index: {0}]   ;;  %s8300_s15 = inlined_call_operand.hbm [shape: f32[4,8,128], index: 15, kind: output, shape index: {1}]   ;;  %s8301_s16 = inlined_call_operand.hbm [shape: f32[8,128], index: 16, kind: output, shape index: {2}]   ;;  %s8302_s17 = inlined_call_operand.hbm [shape: f32[8,128], index: 17, kind: output, shape index: {3}]  }
   0x1   :  { %8331 = sst [smem:[#allocation51_spill]] %s8285_s0 }
   0x2   :  { %8332 = sst [smem:[#allocation52_spill]] %s8286_s1 }
   0x3   :  { %8333 = sst [smem:[#allocation53_spill]] %s8287_s2 }
   0x4   :  { %8334 = sst [smem:[#allocation54_spill]] %s8288_s3 }
   0x5   :  { %8335 = sst [smem:[#allocation55_spill]] %s8302_s17 }
   0x6   :  { %23 = vsyncpa [#allocation5], 0 }
   0x7   :  { %24 = vsyncpa [#allocation8], 0 }
   0x8   :  { %25 = vsyncpa [#allocation11], 0 }
   0x9   :  { %26 = vsyncpa [#allocation14], 0 }
   0xa   :  { %27 = vsyncpa [#allocation17], 0 }
   0xb   :  { %28 = vsyncpa [#allocation20], 0 }
   0xc   :  { %29 = vsyncpa [#allocation6], 0 }
   0xd   :  { %31 = vsyncpa [#allocation6 + $0x1], 0 }
   0xe   :  { %32 = vsyncpa [#allocation24], 0 }
   0xf   :  { %34 = vsyncpa [#allocation24 + $0x1], 0 }
  0x10   :  { %35 = vsyncpa [#allocation27], 0  ;;  %s6983_s24 = smov 0   ;;  %s6985_s25 = smov 0  }
  0x11   :  { %s6987_s26 = smov 0   ;;  %s6989_s27 = smov 0  }
  0x12 LB: > { %8336 = sst [smem:[#allocation38_spill]] %s6856_s24  ;;  %s7004_s28 = sadd.s32 4294967295, %s6868_s27   ;;  %s6868_s27 = sphi %s6989_s27, %s8427_s27   ;;  %s6864_s26 = sphi %s6987_s26, %s8429_s26   ;;  %s6860_s25 = sphi %s6985_s25, %s8431_s25   ;;  %s6856_s24 = sphi %s6983_s24, %s8430_s24  }
  0x13   : > { %8337 = sst [smem:[#allocation39_spill]] %s6864_s26  ;;  %s8303_s29 = sadd.s32 4294967294, %s6868_s27  }
  0x14   : > { %8338 = sst [smem:[#allocation40_spill]] %s6868_s27  ;;  %s7008_s0 = sadd.s32 1, %s6868_s27  }
  0x15   : > { %8339 = sst [smem:[#allocation41_spill]] %s7008_s0  ;;  %s347_s30 = sadd.s32 1, %s6864_s26 }
  0x16   : > { %s344_s18 = ssub.s32 %s6868_s27, %s7008_s0  ;;  %p357_p0 = scmp.ne.s32.totalorder %s6864_s26, %s6860_s25 }
  0x17   : > { %p345_p1 = scmp.eq.s32.totalorder %s344_s18, 0  ;;  %p8307_p2 = scmp.eq.s32.totalorder %s7004_s28, 3 }
  0x18   : > { %p363_p3 = scmp.ne.s32.totalorder %s6860_s25, %s6856_s24  ;;  %p364_p4 = scmp.eq.s32.totalorder %s8303_s29, 3 }
  0x19   : > { %s7021_s19 = scalar_select %p345_p1, %s6864_s26, %s347_s30  }
  0x1a   : > { %p7025_p5 = por %p8307_p2, %p357_p0  ;;  %p7029_p6 = por %p364_p4, %p363_p3 }
  0x1b   : > { %8340 = sst [smem:[#allocation42_spill]] %s7021_s19  ;;  %p4618_p7 = scmp.ge.s32.totalorder %s6868_s27, 1 }
  0x1c   : > { %s8341_s1 = scalar_select %p7025_p5, 1, 0 }
  0x1d   : > { %s8342_s20 = scalar_select %p7029_p6, 1, 0 }
  0x1e   : > { %p439_p8 = scmp.lt.s32.totalorder %s6868_s27, 5  ;;  %p8312_p10 = scmp.eq.s32.totalorder %s7004_s28, 0 }
  0x1f   : > { %8343 = sst [smem:[#allocation43_spill]] %s8342_s20  ;;  %s6870_s22 = smov [#allocation7]  }
  0x20   : > { %p7037_p11 = pnand %p4618_p7, %p439_p8  ;;  %s465_s23 = sshll.u32 %s6870_s22, 4  ;;  %s466_s23 = int_to_ptr.vmem [resolvable:$true] %s465_s23 }
  0x21   : > { %s6871_s18 = smov [#allocation10]   ;;  %s6872_s19 = smov [#allocation13]  }
  0x22   : > { %s8344_s21 = scalar_select %p7037_p11, 1, 0 }
  0x23   : > { %p5654_p12 = pneg %p7037_p11  ;;  %s489_s29 = sshll.u32 %s6871_s18, 4  ;;  %s490_s29 = int_to_ptr.vmem [resolvable:$true] %s489_s29 }
  0x24   : > { %s516_s26 = sshll.u32 %s6872_s19, 4  ;;  %s6423_s22 = scalar_lea.vmem %s466_s23, 8192  ;;  %s517_s26 = int_to_ptr.vmem [resolvable:$true] %s516_s26 }
  0x25   : > { %p7045_p13 = pnand %p8312_p10, %p5654_p12  ;;  %p6424_p1 = scmp.ne.s32.totalorder %s466_s23, %s6423_s22 }
  0x26   : > { %p6431_p7 = scmp.lt.s32.totalorder %s466_s23, %s466_s23  ;;  %p6432_p8 = scmp.lt.s32.totalorder %s6423_s22, %s6423_s22 }
  0x27   : > { %p7051_p0 = pneg %p7045_p13 }
  0x28   : > { %p6433_p12 = por %p6432_p8, %p6431_p7 }
  0x29   : > { %p6426_p3 = pnand %p6424_p1, %p7051_p0 }
  0x2b   : > { %p6427_p4 = pneg %p6426_p3 }
  0x2d   : > { %p6434_p2 = pnand %p6433_p12, %p6427_p4 }
  0x2f   : > { %6437 = shalt.err (!%p6434_p2)
}
  0x30   : > { %s8313_s18 = smov 64   ;;  %s8314_s19 = smov 4  }
  0x31   : > { %s8347_s3 = sld [smem:[#allocation54_spill]]  ;;  %s6449_s27 = scalar_lea.vmem %s490_s29, 1024 }
  0x32   : > { %p6450_p1 = scmp.ne.s32.totalorder %s490_s29, %s6449_s27  ;;  %p6457_p7 = scmp.lt.s32.totalorder %s490_s29, %s490_s29 }
  0x33   : > { %p6458_p4 = scmp.lt.s32.totalorder %s6449_s27, %s6449_s27 }
  0x34   : > { %p6452_p3 = pnand %p6450_p1, %p7051_p0 }
  0x35   : > { %p6459_p2 = por %p6458_p4, %p6457_p7 }
  0x36   : > { %p6453_p9 = pneg %p6452_p3 }
  0x37   : > { %5660 = dma.hbm_to_vmem [thread:$0]  (!%p7045_p13), %s8347_s3, 8192, %s466_s23, [#allocation8], %s8313_s18, %s8313_s18, %s8314_s19  }
  0x38   : > { %p6460_p8 = pnand %p6459_p2, %p6453_p9 }
  0x3a   : > { %6463 = shalt.err (!%p6460_p8)
}
  0x3b   : > { %5666 = dma.hbm_to_vmem [thread:$0]  (!%p7045_p13), %s8290_s5, 1024, %s490_s29, [#allocation11], %s8313_s18, %s8313_s18, %s8314_s19  }
  0x3c   : > { %s6475_s24 = scalar_lea.vmem %s517_s26, 16  ;;  %s6482_s27 = scalar_lea.vmem %s517_s26, 32 }
  0x3d   : > { %p6476_p12 = scmp.ne.s32.totalorder %s517_s26, %s6475_s24  ;;  %p6483_p7 = scmp.lt.s32.totalorder %s517_s26, %s517_s26 }
  0x3e   : > { %p6484_p9 = scmp.lt.s32.totalorder %s6482_s27, %s6475_s24 }
  0x3f   : > { %p6478_p1 = pnand %p6476_p12, %p7051_p0 }
  0x40   : > { %p6485_p4 = por %p6484_p9, %p6483_p7 }
  0x41   : > { %p6479_p3 = pneg %p6478_p1 }
  0x43   : > { %p6486_p2 = pnand %p6485_p4, %p6479_p3 }
  0x45   : > { %6489 = shalt.err (!%p6486_p2)
}
  0x46   : > { %5672 = dma.hbm_to_vmem [thread:$0]  (!%p7045_p13), %s8292_s7, 16, %s517_s26, [#allocation14]  }
  0x47   : > { %s6875_s17 = smov [#allocation16]  }
  0x48   : > { %s537_s29 = sshll.u32 %s6875_s17, 4  ;;  %s538_s29 = int_to_ptr.vmem [resolvable:$true] %s537_s29 }
  0x49   : > { %s6501_s22 = scalar_lea.vmem %s538_s29, 8192  ;;  %p6509_p10 = scmp.lt.s32.totalorder %s538_s29, %s538_s29 }
  0x4a   : > { %p6502_p8 = scmp.ne.s32.totalorder %s538_s29, %s6501_s22  ;;  %p6510_p6 = scmp.lt.s32.totalorder %s6501_s22, %s6501_s22 }
  0x4c   : > { %p6504_p12 = pnand %p6502_p8, %p7051_p0  ;;  %p6511_p7 = por %p6510_p6, %p6509_p10 }
  0x4e   : > { %p6505_p1 = pneg %p6504_p12 }
  0x50   : > { %p6512_p3 = pnand %p6511_p7, %p6505_p1 }
  0x52   : > { %6515 = shalt.err (!%p6512_p3)
}
  0x53   : > { %s8317_s24 = smov 256   ;;  %s8318_s27 = smov 16  }
  0x54   : > { %5678 = dma.hbm_to_vmem [thread:$0]  (!%p7045_p13), %s8294_s9, 8192, %s538_s29, [#allocation17], %s8317_s24, %s8317_s24, %s8318_s27  }
  0x55   : > { %s6878_s23 = smov [#allocation19]   ;;  %s6879_s18 = smov [#allocation4]  }
  0x56   : > { %s564_s17 = sshll.u32 %s6878_s23, 4  ;;  %s455_s19 = sshll.u32 %s6879_s18, 4  ;;  %s565_s17 = int_to_ptr.vmem [resolvable:$true] %s564_s17  ;;  %s456_s19 = int_to_ptr.vmem [resolvable:$true] %s455_s19 }
  0x57   : > { %s6527_s22 = scalar_lea.vmem %s565_s17, 64  ;;  %p6535_p4 = scmp.lt.s32.totalorder %s565_s17, %s565_s17 }
  0x58   : > { %p6528_p6 = scmp.ne.s32.totalorder %s565_s17, %s6527_s22  ;;  %p6536_p2 = scmp.lt.s32.totalorder %s6527_s22, %s6527_s22 }
  0x5a   : > { %p6530_p10 = pnand %p6528_p6, %p7051_p0  ;;  %p6537_p8 = por %p6536_p2, %p6535_p4 }
  0x5c   : > { %p6531_p9 = pneg %p6530_p10 }
  0x5e   : > { %p6538_p12 = pnand %p6537_p8, %p6531_p9 }
  0x60   : > { %6541 = shalt.err (!%p6538_p12)
}
  0x61   : > { %5684 = dma.hbm_to_vmem [thread:$0]  (!%p7045_p13), %s8296_s11, 64, %s565_s17, [#allocation20]  }
  0x62   : > { %s6553_s18 = scalar_lea.vmem %s456_s19, 128  ;;  %p6561_p5 = scmp.lt.s32.totalorder %s456_s19, %s456_s19 }
  0x63   : > { %p6554_p1 = scmp.ne.s32.totalorder %s456_s19, %s6553_s18  ;;  %p6562_p6 = scmp.lt.s32.totalorder %s6553_s18, %s6553_s18 }
  0x65   : > { %p6556_p7 = pnand %p6554_p1, %p7051_p0  ;;  %p6563_p10 = por %p6562_p6, %p6561_p5 }
  0x67   : > { %p6557_p3 = pneg %p6556_p7 }
  0x69   : > { %p6564_p11 = pnand %p6563_p10, %p6557_p3 }
  0x6b   : > { %6567 = shalt.err (!%p6564_p11)
}
  0x6c   : > { %s8348_s2 = sld [smem:[#allocation53_spill]]  ;;  %s6880_s22 = smov [#allocation9]  }
  0x6d   : > { %s479_s26 = sshll.u32 %s6880_s22, 4  ;;  %s6881_s17 = smov [#allocation12]   ;;  %s480_s26 = int_to_ptr.vmem [resolvable:$true] %s479_s26 }
  0x6e   : > { %s502_s29 = sshll.u32 %s6881_s17, 4  ;;  %s6579_s24 = scalar_lea.vmem %s480_s26, 128  ;;  %s503_s29 = int_to_ptr.vmem [resolvable:$true] %s502_s29 }
  0x6f   : > { %p6580_p9 = scmp.ne.s32.totalorder %s480_s26, %s6579_s24  ;;  %p6587_p2 = scmp.lt.s32.totalorder %s480_s26, %s480_s26 }
  0x70   : > { %p6588_p11 = scmp.lt.s32.totalorder %s6579_s24, %s6579_s24 }
  0x71   : > { %p6582_p4 = pnand %p6580_p9, %p7051_p0 }
  0x72   : > { %5657 = dma.hbm_to_vmem [thread:$0]  (!%p7045_p13), %s8348_s2, 128, %s456_s19, [#allocation5]  }
  0x73   : > { %p6583_p5 = pneg %p6582_p4  ;;  %p6589_p8 = por %p6588_p11, %p6587_p2 }
  0x75   : > { %p6590_p12 = pnand %p6589_p8, %p6583_p5 }
  0x77   : > { %6593 = shalt.err (!%p6590_p12)
}
  0x78   : > { %5663 = dma.hbm_to_vmem [thread:$0]  (!%p7045_p13), %s8289_s4, 128, %s480_s26, [#allocation8]  }
  0x79   : > { %s6605_s20 = scalar_lea.vmem %s503_s29, 1024  ;;  %p6613_p6 = scmp.lt.s32.totalorder %s503_s29, %s503_s29 }
  0x7a   : > { %p6606_p1 = scmp.ne.s32.totalorder %s503_s29, %s6605_s20  ;;  %p6614_p10 = scmp.lt.s32.totalorder %s6605_s20, %s6605_s20 }
  0x7c   : > { %p6608_p7 = pnand %p6606_p1, %p7051_p0  ;;  %p6615_p9 = por %p6614_p10, %p6613_p6 }
  0x7e   : > { %p6609_p3 = pneg %p6608_p7 }
  0x80   : > { %p6616_p4 = pnand %p6615_p9, %p6609_p3 }
  0x82   : > { %6619 = shalt.err (!%p6616_p4)
}
  0x83   : > { %s8349_s24 = smov 4   ;;  %s8350_s23 = smov 64  }
  0x84   : > { %5669 = dma.hbm_to_vmem [thread:$0]  (!%p7045_p13), %s8291_s6, 1024, %s503_s29, [#allocation11], %s8350_s23, %s8350_s23, %s8349_s24  }
  0x85   : > { %s6882_s26 = smov [#allocation15]   ;;  %s6883_s19 = smov [#allocation18]  }
  0x86   : > { %s527_s18 = sshll.u32 %s6882_s26, 4  ;;  %s550_s27 = sshll.u32 %s6883_s19, 4  ;;  %s528_s18 = int_to_ptr.vmem [resolvable:$true] %s527_s18  ;;  %s551_s27 = int_to_ptr.vmem [resolvable:$true] %s550_s27 }
  0x87   : > { %s6631_s20 = scalar_lea.vmem %s528_s18, 16  ;;  %s6638_s2 = scalar_lea.vmem %s528_s18, 32 }
  0x88   : > { %p6632_p5 = scmp.ne.s32.totalorder %s528_s18, %s6631_s20  ;;  %p6639_p8 = scmp.lt.s32.totalorder %s528_s18, %s528_s18 }
  0x89   : > { %p6640_p12 = scmp.lt.s32.totalorder %s6638_s2, %s6631_s20 }
  0x8a   : > { %p6634_p2 = pnand %p6632_p5, %p7051_p0 }
  0x8b   : > { %p6641_p1 = por %p6640_p12, %p6639_p8 }
  0x8c   : > { %p6635_p11 = pneg %p6634_p2 }
  0x8e   : > { %p6642_p7 = pnand %p6641_p1, %p6635_p11 }
  0x90   : > { %6645 = shalt.err (!%p6642_p7)
}
  0x91   : > { %5675 = dma.hbm_to_vmem [thread:$0]  (!%p7045_p13), %s8293_s8, 16, %s528_s18, [#allocation14]  }
  0x92   : > { %s6657_s23 = scalar_lea.vmem %s551_s27, 4096  ;;  %p6665_p9 = scmp.lt.s32.totalorder %s551_s27, %s551_s27 }
  0x93   : > { %p6658_p3 = scmp.ne.s32.totalorder %s551_s27, %s6657_s23  ;;  %p6666_p4 = scmp.lt.s32.totalorder %s6657_s23, %s6657_s23 }
  0x95   : > { %p6660_p6 = pnand %p6658_p3, %p7051_p0  ;;  %p6667_p5 = por %p6666_p4, %p6665_p9 }
  0x97   : > { %p6661_p10 = pneg %p6660_p6 }
  0x99   : > { %p6668_p2 = pnand %p6667_p5, %p6661_p10 }
  0x9b   : > { %6671 = shalt.err (!%p6668_p2)
}
  0x9c   : > { %s8351_s2 = smov 16   ;;  %s8352_s22 = smov 256  }
  0x9d   : > { %5681 = dma.hbm_to_vmem [thread:$0]  (!%p7045_p13), %s8295_s10, 4096, %s551_s27, [#allocation17], %s8352_s22, %s8352_s22, %s8351_s2  }
  0x9e   : > { %s6884_s18 = smov [#allocation21]  }
  0x9f   : > { %s578_s19 = sshll.u32 %s6884_s18, 4  ;;  %s579_s19 = int_to_ptr.vmem [resolvable:$true] %s578_s19 }
  0xa0   : > { %s6683_s20 = scalar_lea.vmem %s579_s19, 32  ;;  %p6691_p1 = scmp.lt.s32.totalorder %s579_s19, %s579_s19 }
  0xa1   : > { %p6684_p11 = scmp.ne.s32.totalorder %s579_s19, %s6683_s20  ;;  %p6692_p7 = scmp.lt.s32.totalorder %s6683_s20, %s6683_s20 }
  0xa3   : > { %p6686_p8 = pnand %p6684_p11, %p7051_p0  ;;  %p6693_p3 = por %p6692_p7, %p6691_p1 }
  0xa5   : > { %p6687_p12 = pneg %p6686_p8 }
  0xa7   : > { %p6694_p6 = pnand %p6693_p3, %p6687_p12 }
  0xa9   : > { %6697 = shalt.err (!%p6694_p6)
}
  0xaa   : > { %5687 = dma.hbm_to_vmem [thread:$0]  (!%p7045_p13), %s8298_s13, 32, %s579_s19, [#allocation20]  }
  0xab   : > { %p8353_p10 = scmp.ne.s32.totalorder %s8344_s21, 0 }
  0xad   : > { %598 = sbr.rel (%p8353_p10) target bundleno = 2256 (0x8d0), region = 76 }
  0xb2   : > { %p8354_p9 = scmp.eq.s32.totalorder %s7004_s28, 0 }
  0xb4   : > { %6815 = dma.done.wait (%p8354_p9), [#allocation5], 128   ;;  %p8355_p0 = pmov %p8354_p9 }
  0xb6   : > { %6817 = vsyncadd (%p8355_p0), [#allocation5], 4294967168  ;;  %p8356_p4 = pmov %p8355_p0 }
  0xb7   : > { %p8357_p5 = pmov %p8355_p0 }
  0xb8   : > { %6819 = dma.done.wait (%p8356_p4), [#allocation8], 8320  }
  0xb9   : > { %6821 = vsyncadd (%p8357_p5), [#allocation8], 4294958976  ;;  %p8358_p2 = pmov %p8355_p0 }
  0xba   : > { %p8359_p13 = pmov %p8355_p0 }
  0xbb   : > { %6823 = dma.done.wait (%p8358_p2), [#allocation11], 2048  }
  0xbc   : > { %6825 = vsyncadd (%p8359_p13), [#allocation11], 4294965248  ;;  %p8360_p11 = pmov %p8355_p0 }
  0xbd   : > { %p8361_p8 = pmov %p8355_p0 }
  0xbe   : > { %6827 = dma.done.wait (%p8360_p11), [#allocation14], 32  }
  0xbf   : > { %6829 = vsyncadd (%p8361_p8), [#allocation14], 4294967264  ;;  %p8362_p12 = pmov %p8355_p0 }
  0xc0   : > { %p8363_p1 = pmov %p8355_p0 }
  0xc1   : > { %6831 = dma.done.wait (%p8362_p12), [#allocation17], 12288  }
  0xc2   : > { %6833 = vsyncadd (%p8363_p1), [#allocation17], 4294955008  ;;  %p8364_p7 = pmov %p8355_p0 }
  0xc3   : > { %p8365_p3 = pmov %p8355_p0 }
  0xc4   : > { %6835 = dma.done.wait (%p8364_p7), [#allocation20], 96  }
  0xc5   : > { %6837 = vsyncadd (%p8365_p3), [#allocation20], 4294967200  ;;  %s7174_s0 = sand.u32 1, %s6860_s25   ;;  %p694_p6 = scmp.lt.s32.totalorder %s7004_s28, 3 }
  0xc6   : > { %s4643_s21 = sshll.u32 %s7174_s0, 4  ;;  %s4644_s30 = sshll.u32 %s7174_s0, 3 }
  0xc7   : > { %s695_s27 = scalar_select %p694_p6, %s7004_s28, 3 }
  0xc8   : > { %s8366_s17 = sld [smem:[#allocation51_spill]]  ;;  %s7185_s18 = scalar_lea.vmem [#allocation22], %s4643_s21 }
  0xc9   : > { %s4645_s23 = sshll.u32 %s695_s27, 3  ;;  %s7187_s19 = scalar_lea.vmem [#allocation23], %s4644_s30 }
  0xca   : > { %p8367_p10 = scmp.ne.s32.totalorder %s7004_s28, 0 }
  0xcb   : > { %s8368_s24 = sld [smem:[#allocation52_spill]] (!%p8367_p10) }
  0xcc   : > { %702 = sbr.rel (%p8367_p10) target bundleno = 211 (0xd3), region = 124 }
  0xce   : > { %s7183_s26 = scalar_lea.vmem %s8366_s17, %s4645_s23 }
  0xd1   : > { %v703_v0 = vld [vmem:[%s8368_s24] sm:$0xff]  ;;  %v705_v1 = vld [vmem:[#allocation4] sm:$0xff] }
  0xd2   : > { %704 = vst [vmem:[#allocation2] sm:$0xff] %v703_v0  ;;  %706 = vst [vmem:[#allocation3] sm:$0xff] %v705_v1 }
  0xd3 PF: > { %v5775_v2 = vld [vmem:[#allocation10 + $0x38] sm:$0xff]   ;;  %v8326_v3 = vmov 0.0   ;;  %v5777_v5 = vld [vmem:[#allocation10 + $0x30] sm:$0xff]   ;;  %vm6886_vm0 = vmmov 0   ;;  %v5780_v7 = vld [vmem:[#allocation12 + $0x28] sm:$0xff]   ;;  %vm2686_vm1 = vcmask 1041409  }
  0xd4   : > { %5114 = vmatprep.subr.bf16.mxu0 %v8326_v3  ;;  %v5776_v4 = vld [vmem:[#allocation12 + $0x38] sm:$0xff]   ;;  %5130 = vmatprep.mubr.msk.bf16.mxu0 %vm6886_vm0, %v8326_v3  ;;  %v5778_v6 = vld [vmem:[#allocation12 + $0x30] sm:$0xff]   ;;  %v5779_v8 = vld [vmem:[#allocation10 + $0x28] sm:$0xff]   ;;  %vm2689_vm2 = vcmask 1042434   ;;  %vm2692_vm3 = vcmask 1043459   ;;  %vm2695_vm4 = vcmask 1044484  }
  0xd5   : > { %5115 = vmatpush3.bf16.msra.mxu0 %v5775_v2  ;;  %5134 = vmatprep.subr.bf16.mxu1 %v5776_v4  ;;  %v5782_v9 = vld [vmem:[#allocation12 + $0x20] sm:$0xff]   ;;  %v5784_v11 = vld [vmem:[#allocation12 + $0x18] sm:$0xff]   ;;  %v5786_v13 = vld [vmem:[#allocation12 + $0x10] sm:$0xff]   ;;  %vm2698_vm5 = vcmask 1045509   ;;  %vm2701_vm6 = vcmask 1046534   ;;  %vm2704_vm7 = vcmask 1047559  }
  0xd6   : > { %5116 = vmatprep.subr.bf16.mxu0 %v8326_v3  ;;  %5135 = vmatpush3.bf16.msra.mxu1 %v5776_v4  ;;  %v5781_v10 = vld [vmem:[#allocation10 + $0x20] sm:$0xff]   ;;  %v5783_v12 = vld [vmem:[#allocation10 + $0x18] sm:$0xff]   ;;  %v5785_v15 = vld [vmem:[#allocation10 + $0x10] sm:$0xff]   ;;  %p4876_p9 = scmp.ne.s32.totalorder %s7004_s28, 3 }
  0xd7   : > { %5136 = vmatprep.subr.bf16.mxu1 %v5778_v6  ;;  %v5791_v14 = vld [vmem:[#allocation7] sm:$0xff]   ;;  %v5788_v16 = vld [vmem:[#allocation12 + $0x8] sm:$0xff]   ;;  %v5789_v18 = vld [vmem:[#allocation10] sm:$0xff]  }
  0xd8   : > { %5150 = vmatprep.mubr.bf16.mxu1 %v5791_v14  ;;  %v5787_v17 = vld [vmem:[#allocation10 + $0x8] sm:$0xff]   ;;  %v5790_v19 = vld [vmem:[#allocation12] sm:$0xff]   ;;  %v5794_v24 = vld [vmem:[#allocation7 + $0x18] sm:$0xff]  }
  0xd9   : > { %5117 = vmatpush3.bf16.msra.mxu0 %v5777_v5  ;;  %v708_v20 = vld [vmem:[#allocation2] sm:$0xff]  ;;  %v5793_v23 = vld [vmem:[#allocation7 + $0x10] sm:$0xff]   ;;  %v5795_v25 = vld [vmem:[#allocation7 + $0x20] sm:$0xff]  }
  0xda   : > { %5118 = vmatprep.subr.bf16.mxu0 %v8326_v3  ;;  %5137 = vmatpush3.bf16.msra.mxu1 %v5778_v6  ;;  %v7204_v21 = vpack.c.bf16 %v708_v20, %v708_v20  ;;  %v5792_v22 = vld [vmem:[#allocation7 + $0x8] sm:$0xff]   ;;  %v5797_v27 = vld [vmem:[#allocation7 + $0x30] sm:$0xff]   ;;  %v5798_v28 = vld [vmem:[#allocation7 + $0x38] sm:$0xff]   ;;  %v6887_v6 = vmov 1966171168  }
  0xdb   : > { %5138 = vmatprep.subr.bf16.mxu1 %v5780_v7  ;;  %v5796_v26 = vld [vmem:[#allocation7 + $0x28] sm:$0xff]   ;;  %v5799_v29 = vld [vmem:[#allocation7 + $0x40] sm:$0xff]   ;;  %v5801_v31 = vld [vmem:[#allocation7 + $0x50] sm:$0xff]  }
  0xdc   : > { %8369 = vst [vmem:[#allocation44_spill] sm:$0xff] %v7204_v21  ;;  %v5800_v30 = vld [vmem:[#allocation7 + $0x48] sm:$0xff]   ;;  %v5802_v32 = vld [vmem:[#allocation7 + $0x58] sm:$0xff]   ;;  %v5803_v33 = vld [vmem:[#allocation7 + $0x60] sm:$0xff]  }
  0xdd   : > { %5119 = vmatpush3.bf16.msra.mxu0 %v5779_v8  ;;  %v5804_v34 = vld [vmem:[#allocation7 + $0x68] sm:$0xff]   ;;  %v5805_v35 = vld [vmem:[#allocation7 + $0x70] sm:$0xff]   ;;  %v5806_v36 = vld [vmem:[#allocation7 + $0x78] sm:$0xff]   ;;  %v1949_v8 = vlaneseq }
  0xde   : > { %5120 = vmatprep.subr.bf16.mxu0 %v8326_v3  ;;  %5139 = vmatpush3.bf16.msra.mxu1 %v5780_v7  ;;  %v5807_v37 = vld [vmem:[#allocation7 + $0x80] sm:$0xff]   ;;  %v5808_v38 = vld [vmem:[#allocation7 + $0x88] sm:$0xff]   ;;  %v5809_v39 = vld [vmem:[#allocation7 + $0x90] sm:$0xff]   ;;  %v1947_v7 = vunpack.c.l.s4 %v6887_v6 }
  0xdf   : > { %5140 = vmatprep.subr.bf16.mxu1 %v5782_v9  ;;  %v5810_v40 = vld [vmem:[#allocation7 + $0x98] sm:$0xff]   ;;  %v5811_v41 = vld [vmem:[#allocation7 + $0xa0] sm:$0xff]   ;;  %v5812_v42 = vld [vmem:[#allocation7 + $0xa8] sm:$0xff]  }
  0xe0   : > { %v5813_v43 = vld [vmem:[#allocation7 + $0xb0] sm:$0xff]   ;;  %v5814_v44 = vld [vmem:[#allocation7 + $0xb8] sm:$0xff]   ;;  %v5815_v45 = vld [vmem:[#allocation7 + $0xc0] sm:$0xff]  }
  0xe1   : > { %5121 = vmatpush3.bf16.msra.mxu0 %v5781_v10  ;;  %v5816_v46 = vld [vmem:[#allocation7 + $0xc8] sm:$0xff]   ;;  %v5817_v47 = vld [vmem:[#allocation7 + $0xd0] sm:$0xff]   ;;  %v5818_v48 = vld [vmem:[#allocation7 + $0xd8] sm:$0xff]   ;;  %v1948_v10 = vunpack.c.0.s8 %v1947_v7 }
  0xe2   : > { %5122 = vmatprep.subr.bf16.mxu0 %v8326_v3  ;;  %5141 = vmatpush3.bf16.msra.mxu1 %v5782_v9  ;;  %v5819_v49 = vld [vmem:[#allocation7 + $0xe0] sm:$0xff]   ;;  %v5820_v50 = vld [vmem:[#allocation7 + $0xe8] sm:$0xff]   ;;  %v5821_v51 = vld [vmem:[#allocation7 + $0xf0] sm:$0xff]  }
  0xe3   : > { %5142 = vmatprep.subr.bf16.mxu1 %v5784_v11  ;;  %v5822_v52 = vld [vmem:[#allocation7 + $0xf8] sm:$0xff]   ;;  %v5823_v53 = vld [vmem:[#allocation7 + $0x100] sm:$0xff]   ;;  %v5824_v54 = vld [vmem:[#allocation7 + $0x108] sm:$0xff]  }
  0xe4   : > { %v5825_v55 = vld [vmem:[#allocation7 + $0x110] sm:$0xff]   ;;  %v5826_v56 = vld [vmem:[#allocation7 + $0x118] sm:$0xff]   ;;  %v5827_v57 = vld [vmem:[#allocation7 + $0x120] sm:$0xff]  }
  0xe5   : > { %5123 = vmatpush3.bf16.msra.mxu0 %v5783_v12  ;;  %v5828_v58 = vld [vmem:[#allocation7 + $0x128] sm:$0xff]   ;;  %v5829_v59 = vld [vmem:[#allocation7 + $0x130] sm:$0xff]   ;;  %v5830_v60 = vld [vmem:[#allocation7 + $0x138] sm:$0xff]  }
  0xe6   : > { %5124 = vmatprep.subr.bf16.mxu0 %v8326_v3  ;;  %5143 = vmatpush3.bf16.msra.mxu1 %v5784_v11  ;;  %v5831_v61 = vld [vmem:[#allocation7 + $0x140] sm:$0xff]   ;;  %v5832_v62 = vld [vmem:[#allocation7 + $0x148] sm:$0xff]   ;;  %v5833_v63 = vld [vmem:[#allocation7 + $0x150] sm:$0xff]   ;;  %v7211_v11 = vshrl.u32 %v1949_v8, 7 }
  0xe7   : > { %5144 = vmatprep.subr.bf16.mxu1 %v5786_v13  ;;  %v5834_v0 = vld [vmem:[#allocation7 + $0x158] sm:$0xff]   ;;  %v5835_v1 = vld [vmem:[#allocation7 + $0x160] sm:$0xff]   ;;  %v5836_v2 = vld [vmem:[#allocation7 + $0x168] sm:$0xff]  }
  0xe8   : > { %v5837_v4 = vld [vmem:[#allocation7 + $0x170] sm:$0xff]   ;;  %v5838_v5 = vld [vmem:[#allocation7 + $0x178] sm:$0xff]   ;;  %v5839_v9 = vld [vmem:[#allocation7 + $0x180] sm:$0xff]   ;;  %8370 = vst [vmem:[#allocation45_spill] sm:$0xff] %v7211_v11  ;;  %v7214_v14 = vsub.s32 %v1948_v10, %v7211_v11 }
  0xe9   : > { %5125 = vmatpush3.bf16.msra.mxu0 %v5785_v15  ;;  %v4647_v12 = vld [vmem:[#allocation13] ss:$0 sm:$0xff]  ;;  %v5841_v15 = vld [vmem:[#allocation7 + $0x190] sm:$0xff]   ;;  %v5850_v8 = vld [vmem:[#allocation7 + $0x1d8] sm:$0xff]  }
  0xea   : > { %5126 = vmatprep.subr.bf16.mxu0 %v8326_v3  ;;  %5145 = vmatpush3.bf16.msra.mxu1 %v5786_v13  ;;  %v5840_v13 = vld [vmem:[#allocation7 + $0x188] sm:$0xff]   ;;  %8371 = vst [vmem:[#allocation46_spill] sm:$0xff] %v7214_v14  ;;  %v5851_v10 = vld [vmem:[#allocation7 + $0x1e0] sm:$0xff]  }
  0xeb   : > { %5146 = vmatprep.subr.bf16.mxu1 %v5788_v16 }
  0xed   : > { %5127 = vmatpush3.bf16.msra.mxu0 %v5787_v17 }
  0xee   : > { %5128 = vmatprep.subr.bf16.mxu0 %v8326_v3  ;;  %5147 = vmatpush3.bf16.msra.mxu1 %v5788_v16 }
  0xef   : > { %5148 = vmatprep.subr.bf16.mxu1 %v5790_v19 }
  0xf1   : > { %5129 = vmatpush3.bf16.msra.mxu0 %v5789_v18 }
  0xf2   : > { %5278 = vmatprep.subr.bf16.mxu0 %v8326_v3  ;;  %5149 = vmatpush3.bf16.msra.mxu1 %v5790_v19 }
  0xf3   : > { %5358 = vmatprep.subr.bf16.mxu1 %v8326_v3 }
  0xf4   : > { %5131 = vmatmul.mubr.bf16.vlgmr.msra.gmra.mxu0 %v7204_v21 }
  0xf5   : > { %5294 = vmatprep.mubr.msk.bf16.mxu0 %vm6886_vm0, %v8326_v3  ;;  %5151 = vmatmul.mubr.bf16.vlgmr.msra.gmra.mxu1 %v5792_v22  ;;  %v7221_v22 = vsub.s32 0, %v7211_v11 }
  0xf6   : > { %5154 = vmatprep.mubr.bf16.mxu1 %v5793_v23 }
  0xfd   : > { %5155 = vmatmul.mubr.bf16.gmra.mxu1 %v5794_v24 }
  0xfe   : > { %5158 = vmatprep.mubr.bf16.mxu1 %v5795_v25 }
 0x105   : > { %5159 = vmatmul.mubr.bf16.gmra.mxu1 %v5796_v26 }
 0x106   : > { %5162 = vmatprep.mubr.bf16.mxu1 %v5797_v27  ;;  %v5842_v27 = vld [vmem:[#allocation7 + $0x198] sm:$0xff]  }
 0x10d   : > { %5163 = vmatmul.mubr.bf16.gmra.mxu1 %v5798_v28 }
 0x10e   : > { %5166 = vmatprep.mubr.bf16.mxu1 %v5799_v29  ;;  %v5843_v29 = vld [vmem:[#allocation7 + $0x1a0] sm:$0xff]  }
 0x115   : > { %5167 = vmatmul.mubr.bf16.gmra.mxu1 %v5800_v30 }
 0x116   : > { %5170 = vmatprep.mubr.bf16.mxu1 %v5801_v31 }
 0x11d   : > { %5171 = vmatmul.mubr.bf16.gmra.mxu1 %v5802_v32 }
 0x11e   : > { %5174 = vmatprep.mubr.bf16.mxu1 %v5803_v33 }
 0x125   : > { %5175 = vmatmul.mubr.bf16.gmra.mxu1 %v5804_v34 }
 0x126   : > { %5178 = vmatprep.mubr.bf16.mxu1 %v5805_v35 }
 0x12d   : > { %5179 = vmatmul.mubr.bf16.gmra.mxu1 %v5806_v36 }
 0x12e   : > { %5182 = vmatprep.mubr.bf16.mxu1 %v5807_v37 }
 0x135   : > { %5183 = vmatmul.mubr.bf16.gmra.mxu1 %v5808_v38 }
 0x136   : > { %5186 = vmatprep.mubr.bf16.mxu1 %v5809_v39  ;;  %v5844_v39 = vld [vmem:[#allocation7 + $0x1a8] sm:$0xff]  }
 0x13d   : > { %5187 = vmatmul.mubr.bf16.gmra.mxu1 %v5810_v40  ;;  %v5845_v40 = vld [vmem:[#allocation7 + $0x1b0] sm:$0xff]  }
 0x13e   : > { %5190 = vmatprep.mubr.bf16.mxu1 %v5811_v41 }
 0x145   : > { %5191 = vmatmul.mubr.bf16.gmra.mxu1 %v5812_v42 }
 0x146   : > { %5194 = vmatprep.mubr.bf16.mxu1 %v5813_v43 }
 0x14d   : > { %5195 = vmatmul.mubr.bf16.gmra.mxu1 %v5814_v44 }
 0x14e   : > { %5198 = vmatprep.mubr.bf16.mxu1 %v5815_v45  ;;  %v5846_v45 = vld [vmem:[#allocation7 + $0x1b8] sm:$0xff]  }
 0x155   : > { %5199 = vmatmul.mubr.bf16.gmra.mxu1 %v5816_v46  ;;  %v5847_v46 = vld [vmem:[#allocation7 + $0x1c0] sm:$0xff]  }
 0x156   : > { %5202 = vmatprep.mubr.bf16.mxu1 %v5817_v47 }
 0x15d   : > { %5203 = vmatmul.mubr.bf16.gmra.mxu1 %v5818_v48 }
 0x15e   : > { %5206 = vmatprep.mubr.bf16.mxu1 %v5819_v49 }
 0x165   : > { %5207 = vmatmul.mubr.bf16.gmra.mxu1 %v5820_v50 }
 0x166   : > { %5210 = vmatprep.mubr.bf16.mxu1 %v5821_v51 }
 0x16d   : > { %5211 = vmatmul.mubr.bf16.gmra.mxu1 %v5822_v52 }
 0x16e   : > { %5214 = vmatprep.mubr.bf16.mxu1 %v5823_v53 }
 0x175   : > { %5215 = vmatmul.mubr.bf16.gmra.mxu1 %v5824_v54 }
 0x176   : > { %5218 = vmatprep.mubr.bf16.mxu1 %v5825_v55 }
 0x17d   : > { %5219 = vmatmul.mubr.bf16.gmra.mxu1 %v5826_v56 }
 0x17e   : > { %5222 = vmatprep.mubr.bf16.mxu1 %v5827_v57 }
 0x185   : > { %5223 = vmatmul.mubr.bf16.gmra.mxu1 %v5828_v58 }
 0x186   : > { %5226 = vmatprep.mubr.bf16.mxu1 %v5829_v59 }
 0x18d   : > { %5227 = vmatmul.mubr.bf16.gmra.mxu1 %v5830_v60  ;;  %v5848_v60 = vld [vmem:[#allocation7 + $0x1c8] sm:$0xff]  }
 0x18e   : > { %5230 = vmatprep.mubr.bf16.mxu1 %v5831_v61 }
 0x195   : > { %5231 = vmatmul.mubr.bf16.gmra.mxu1 %v5832_v62  ;;  %v5849_v62 = vld [vmem:[#allocation7 + $0x1d0] sm:$0xff]  }
 0x196   : > { %5234 = vmatprep.mubr.bf16.mxu1 %v5833_v63 }
 0x19d   : > { %5235 = vmatmul.mubr.bf16.gmra.mxu1 %v5834_v0 }
 0x19e   : > { %5238 = vmatprep.mubr.bf16.mxu1 %v5835_v1 }
 0x1a5   : > { %5239 = vmatmul.mubr.bf16.gmra.mxu1 %v5836_v2 }
 0x1a6   : > { %5242 = vmatprep.mubr.bf16.mxu1 %v5837_v4 }
 0x1ad   : > { %5243 = vmatmul.mubr.bf16.gmra.mxu1 %v5838_v5 }
 0x1ae   : > { %5246 = vmatprep.mubr.bf16.mxu1 %v5839_v9 }
 0x1b4   : > { %v945_v16 = vpop.f32.mrf.mxu0 }
 0x1b5   : > { %v7216_v17 = vadd.f32 %v4647_v12, %v945_v16  ;;  %v5152_v18 = vpop.f32.mrf.mxu1  ;;  %5247 = vmatmul.mubr.bf16.gmra.mxu1 %v5840_v13 }
 0x1b6   : > { %v5132_v19 = vpop.f32.mrf.mxu0  ;;  %5250 = vmatprep.mubr.bf16.mxu1 %v5841_v15 }
 0x1b7   : > { %v1952_v20 = vrot.slane %v7216_v17, %v7214_v14  ;;  %v1433_v23 = vpop.f32.mrf.mxu1 }
 0x1b8   : > { %v948_v24 = vpop.f32.mrf.mxu0 }
 0x1b9   : > { %v7224_v25 = vrot.slane %v1952_v20, %v7214_v14  ;;  %v5153_v26 = vpop.f32.mrf.mxu1  ;;  %v1960_v50 = vcombine.high %v1952_v20, %v1952_v20 }
 0x1ba   : > { %v5133_v28 = vpop.f32.mrf.mxu0 }
 0x1bb   : > { %v7228_v30 = vrot.slane %v7224_v25, %v7221_v22  ;;  %v1436_v31 = vpop.f32.mrf.mxu1  ;;  %v7258_v58 = vrot.slane %v1960_v50, %v7214_v14 }
 0x1bd   : > { %v2036_v32 = vadd.f32 %v5152_v18, %v7228_v30  ;;  %v2034_v33 = vadd.f32 %v7228_v30, %v1433_v23  ;;  %v7232_v34 = vpop.f32.mrf.mxu1  ;;  %5251 = vmatmul.mubr.bf16.gmra.mxu1 %v5842_v27  ;;  %v2037_v35 = vadd.f32 %v5153_v26, %v7228_v30  ;;  %v2035_v36 = vadd.f32 %v7228_v30, %v1436_v31  ;;  %v5852_v26 = vld [vmem:[#allocation7 + $0x1e8] sm:$0xff]  }
 0x1be   : > { %5254 = vmatprep.mubr.bf16.mxu1 %v5843_v29  ;;  %v7263_v0 = vrot.slane %v7258_v58, %v7221_v22  ;;  %v5853_v29 = vld [vmem:[#allocation7 + $0x1f0] sm:$0xff]  }
 0x1bf   : > { %6071 = vtanh.f32 %v2036_v32  ;;  %v7236_v37 = vpop.f32.mrf.mxu1 }
 0x1c0   : > { %6073 = vtanh.f32 %v2034_v33 }
 0x1c1   : > { %6075 = vtanh.f32 %v2037_v35  ;;  %v7238_v38 = vpop.f32.mrf.mxu1 }
 0x1c2   : > { %6077 = vtanh.f32 %v2035_v36 }
 0x1c3   : > { %v7240_v41 = vpop.f32.mrf.mxu1 }
 0x1c5   : > { %v5160_v42 = vpop.f32.mrf.mxu1  ;;  %5255 = vmatmul.mubr.bf16.gmra.mxu1 %v5844_v39 }
 0x1c6   : > { %5258 = vmatprep.mubr.bf16.mxu1 %v5845_v40  ;;  %v2044_v13 = vadd.f32 %v5160_v42, %v7228_v30 }
 0x1c7   : > { %v7242_v43 = vpop.f32.mrf.mxu1 }
 0x1c8   : > { %v2042_v42 = vadd.f32 %v7228_v30, %v7242_v43 }
 0x1c9   : > { %v5161_v44 = vpop.f32.mrf.mxu1 }
 0x1ca   : > { %v2045_v16 = vadd.f32 %v5161_v44, %v7228_v30 }
 0x1cb   : > { %v1468_v47 = vpop.f32.mrf.mxu1 }
 0x1cc   : > { %v7244_v48 = vpop.eup %6071  ;;  %v2043_v35 = vadd.f32 %v7228_v30, %v1468_v47 }
 0x1cd   : > { %v7246_v49 = vpop.eup %6073  ;;  %v5164_v51 = vpop.f32.mrf.mxu1  ;;  %5259 = vmatmul.mubr.bf16.gmra.mxu1 %v5846_v45 }
 0x1ce   : > { %v7248_v52 = vpop.eup %6075  ;;  %5262 = vmatprep.mubr.bf16.mxu1 %v5847_v46  ;;  %v2048_v54 = vadd.f32 %v5164_v51, %v7228_v30  ;;  %v5854_v46 = vld [vmem:[#allocation7 + $0x1f8] sm:$0xff]  }
 0x1cf   : > { %v7250_v53 = vpop.eup %6077  ;;  %v1481_v55 = vpop.f32.mrf.mxu1  ;;  %v2292_v56 = vpack.c.bf16 %v7248_v52, %v7244_v48 }
 0x1d0   : > { %v2291_v57 = vpack.c.bf16 %v7250_v53, %v7246_v49  ;;  %6079 = vtanh.f32 %v2048_v54  ;;  %v2046_v1 = vadd.f32 %v7228_v30, %v1481_v55  ;;  %v2041_v55 = vadd.f32 %v7238_v38, %v7228_v30 }
 0x1d1   : > { %v5165_v59 = vpop.f32.mrf.mxu1 }
 0x1d2   : > { %v2049_v61 = vadd.f32 %v5165_v59, %v7228_v30 }
 0x1d3   : > { %v1484_v63 = vpop.f32.mrf.mxu1 }
 0x1d4   : > { %6081 = vtanh.f32 %v2049_v61  ;;  %v2047_v4 = vadd.f32 %v7228_v30, %v1484_v63  ;;  %v2040_v63 = vadd.f32 %v7232_v34, %v7228_v30 }
 0x1d5   : > { %v5168_v2 = vpop.f32.mrf.mxu1  ;;  %5263 = vmatmul.mubr.bf16.gmra.mxu1 %v5848_v60  ;;  %6083 = vtanh.f32 %v2046_v1 }
 0x1d6   : > { %5266 = vmatprep.mubr.bf16.mxu1 %v5849_v62  ;;  %v2052_v5 = vadd.f32 %v5168_v2, %v7263_v0  ;;  %6085 = vtanh.f32 %v2047_v4  ;;  %v1990_v62 = vcombine.high %v7224_v25, %v7224_v25  ;;  %v2038_v25 = vadd.f32 %v7228_v30, %v7236_v37 }
 0x1d7   : > { %v7268_v6 = vpop.f32.mrf.mxu1 }
 0x1d8   : > { %6087 = vtanh.f32 %v2052_v5 }
 0x1d9   : > { %v5169_v7 = vpop.f32.mrf.mxu1 }
 0x1da   : > { %v2053_v9 = vadd.f32 %v5169_v7, %v7263_v0  ;;  %v7323_v7 = vrot.slane %v1990_v62, %v7221_v22 }
 0x1db   : > { %v7271_v12 = vpop.f32.mrf.mxu1 }
 0x1dc   : > { %6089 = vtanh.f32 %v2053_v9 }
 0x1dd   : > { %v5172_v15 = vpop.f32.mrf.mxu1  ;;  %5267 = vmatmul.mubr.bf16.gmra.mxu1 %v5850_v8  ;;  %v6080_v20 = vpop.eup %6079  ;;  %6091 = vtanh.f32 %v2044_v13  ;;  %v2039_v8 = vadd.f32 %v7228_v30, %v7240_v41 }
 0x1de   : > { %5270 = vmatprep.mubr.bf16.mxu1 %v5851_v10  ;;  %v2056_v18 = vadd.f32 %v5172_v15, %v7263_v0  ;;  %6093 = vtanh.f32 %v2045_v16 }
 0x1df   : > { %v7276_v19 = vpop.f32.mrf.mxu1 }
 0x1e0   : > { %6095 = vtanh.f32 %v2056_v18 }
 0x1e1   : > { %v6082_v23 = vpop.eup %6081  ;;  %v5173_v24 = vpop.f32.mrf.mxu1 }
 0x1e2   : > { %v2057_v27 = vadd.f32 %v5173_v24, %v7263_v0  ;;  %v2298_v28 = vpack.c.bf16 %v6082_v23, %v6080_v20  ;;  %v6084_v33 = vpop.eup %6083 }
 0x1e3   : > { %v7279_v31 = vpop.f32.mrf.mxu1  ;;  %v6086_v36 = vpop.eup %6085 }
 0x1e4   : > { %6097 = vtanh.f32 %v2057_v27  ;;  %5279 = vmatpush3.bf16.xpose.msra.mxu0 %v2298_v28  ;;  %v2297_v50 = vpack.c.bf16 %v6086_v36, %v6084_v33 }
 0x1e5   : > { %v7281_v32 = vpop.f32.mrf.mxu1  ;;  %5271 = vmatmul.mubr.bf16.gmra.mxu1 %v5852_v26  ;;  %5280 = vmatprep.subr.bf16.mxu0 %v8326_v3  ;;  %v7287_v40 = vpop.eup %6087  ;;  %6099 = vtanh.f32 %v2043_v35 }
 0x1e6   : > { %5274 = vmatprep.mubr.bf16.mxu1 %v5853_v29  ;;  %6101 = vtanh.f32 %v2042_v42 }
 0x1e7   : > { %v7285_v39 = vpop.f32.mrf.mxu1  ;;  %6103 = vtanh.f32 %v2041_v55 }
 0x1e8   : > { %6105 = vtanh.f32 %v2040_v63 }
 0x1e9   : > { %v7291_v44 = vpop.eup %6089  ;;  %v7293_v45 = vpop.f32.mrf.mxu1  ;;  %6107 = vtanh.f32 %v2038_v25 }
 0x1ea   : > { %v6092_v43 = vpop.eup %6091  ;;  %6109 = vtanh.f32 %v2039_v8 }
 0x1eb   : > { %v7297_v47 = vpop.f32.mrf.mxu1  ;;  %v6094_v59 = vpop.eup %6093 }
 0x1ec   : > { %5281 = vmatpush3.bf16.xpose.msra.mxu0 %v2297_v50  ;;  %v2296_v38 = vpack.c.bf16 %v6094_v59, %v6092_v43 }
 0x1ed   : > { %v7299_v54 = vpop.f32.mrf.mxu1  ;;  %5275 = vmatmul.mubr.bf16.gmra.mxu1 %v5854_v46  ;;  %5282 = vmatprep.subr.bf16.mxu0 %v8326_v3  ;;  %v7308_v61 = vpop.eup %6095 }
 0x1ee   : > { %5374 = vmatprep.mubr.msk.bf16.mxu1 %vm6886_vm0, %v8326_v3 }
 0x1ef   : > { %v7306_v60 = vpop.f32.mrf.mxu1 }
 0x1f1   : > { %v7314_v1 = vpop.eup %6097  ;;  %v7316_v2 = vpop.f32.mrf.mxu1 }
 0x1f2   : > { %v2302_v4 = vpack.c.bf16 %v7314_v1, %v7308_v61  ;;  %v6100_v10 = vpop.eup %6099 }
 0x1f3   : > { %v7320_v5 = vpop.f32.mrf.mxu1  ;;  %v6102_v16 = vpop.eup %6101 }
 0x1f4   : > { %5283 = vmatpush3.bf16.xpose.msra.mxu0 %v2296_v38  ;;  %v2295_v23 = vpack.c.bf16 %v6100_v10, %v6102_v16  ;;  %v6104_v26 = vpop.eup %6103 }
 0x1f5   : > { %v5184_v34 = vpop.f32.mrf.mxu1  ;;  %5284 = vmatprep.subr.bf16.mxu0 %v8326_v3  ;;  %v6106_v29 = vpop.eup %6105 }
 0x1f6   : > { %v2068_v9 = vadd.f32 %v5184_v34, %v7323_v7  ;;  %v2294_v36 = vpack.c.bf16 %v6104_v26, %v6106_v29  ;;  %v6108_v43 = vpop.eup %6107 }
 0x1f7   : > { %v1561_v13 = vpop.f32.mrf.mxu1  ;;  %v6110_v59 = vpop.eup %6109 }
 0x1f8   : > { %v2066_v15 = vadd.f32 %v7323_v7, %v1561_v13  ;;  %6111 = vtanh.f32 %v2068_v9  ;;  %v2293_v10 = vpack.c.bf16 %v6110_v59, %v6108_v43  ;;  %v2062_v43 = vadd.f32 %v7263_v0, %v7306_v60 }
 0x1f9   : > { %v5185_v18 = vpop.f32.mrf.mxu1  ;;  %v2063_v59 = vadd.f32 %v7263_v0, %v7320_v5  ;;  %v2050_v5 = vadd.f32 %v7263_v0, %v7268_v6 }
 0x1fa   : > { %v2069_v20 = vadd.f32 %v5185_v18, %v7323_v7 }
 0x1fb   : > { %v1564_v37 = vpop.f32.mrf.mxu1 }
 0x1fc   : > { %6113 = vtanh.f32 %v2069_v20  ;;  %v2067_v24 = vadd.f32 %v7323_v7, %v1564_v37  ;;  %5285 = vmatpush3.bf16.xpose.msra.mxu0 %v2295_v23  ;;  %v2064_v23 = vadd.f32 %v7299_v54, %v7263_v0 }
 0x1fd   : > { %6115 = vtanh.f32 %v2066_v15  ;;  %v5188_v30 = vpop.f32.mrf.mxu1  ;;  %5286 = vmatprep.subr.bf16.mxu0 %v8326_v3 }
 0x1fe   : > { %6117 = vtanh.f32 %v2067_v24  ;;  %v2072_v41 = vadd.f32 %v5188_v30, %v7323_v7  ;;  %v2065_v24 = vadd.f32 %v7316_v2, %v7263_v0 }
 0x1ff   : > { %v1577_v27 = vpop.f32.mrf.mxu1 }
 0x200   : > { %v2070_v28 = vadd.f32 %v7323_v7, %v1577_v27  ;;  %6119 = vtanh.f32 %v2072_v41  ;;  %v1992_v27 = vcombine.high %v7258_v58, %v7258_v58 }
 0x201   : > { %v5189_v33 = vpop.f32.mrf.mxu1 }
 0x202   : > { %v2073_v35 = vadd.f32 %v5189_v33, %v7323_v7  ;;  %v7377_v58 = vrot.slane %v1992_v27, %v7221_v22 }
 0x203   : > { %v1580_v42 = vpop.f32.mrf.mxu1 }
 0x204   : > { %6121 = vtanh.f32 %v2073_v35  ;;  %v2071_v46 = vadd.f32 %v7323_v7, %v1580_v42  ;;  %5287 = vmatpush3.bf16.xpose.msra.mxu0 %v2294_v36 }
 0x205   : > { %6123 = vtanh.f32 %v2070_v28  ;;  %v5192_v50 = vpop.f32.mrf.mxu1  ;;  %5288 = vmatprep.subr.bf16.mxu0 %v8326_v3  ;;  %v7341_v63 = vpop.eup %6111 }
 0x206   : > { %6125 = vtanh.f32 %v2071_v46  ;;  %v2076_v55 = vadd.f32 %v5192_v50, %v7323_v7 }
 0x207   : > { %v1593_v62 = vpop.f32.mrf.mxu1 }
 0x208   : > { %v2074_v38 = vadd.f32 %v7323_v7, %v1593_v62  ;;  %6127 = vtanh.f32 %v2076_v55 }
 0x209   : > { %v7344_v25 = vpop.eup %6113  ;;  %v5193_v34 = vpop.f32.mrf.mxu1 }
 0x20a   : > { %v7346_v8 = vpop.eup %6115  ;;  %v2077_v9 = vadd.f32 %v5193_v34, %v7323_v7 }
 0x20b   : > { %v7351_v15 = vpop.eup %6117  ;;  %v1596_v16 = vpop.f32.mrf.mxu1 }
 0x20c   : > { %6129 = vtanh.f32 %v2077_v9  ;;  %v2075_v18 = vadd.f32 %v7323_v7, %v1596_v16  ;;  %5289 = vmatpush3.bf16.xpose.msra.mxu0 %v2293_v10 }
 0x20d   : > { %6131 = vtanh.f32 %v2074_v38  ;;  %v5196_v37 = vpop.f32.mrf.mxu1  ;;  %5290 = vmatprep.subr.bf16.mxu0 %v8326_v3  ;;  %v7362_v26 = vpop.eup %6119 }
 0x20e   : > { %6133 = vtanh.f32 %v2075_v18  ;;  %v2080_v30 = vadd.f32 %v5196_v37, %v7323_v7 }
 0x20f   : > { %v1609_v41 = vpop.f32.mrf.mxu1  ;;  %6135 = vtanh.f32 %v2064_v23  ;;  %v2060_v23 = vadd.f32 %v7281_v32, %v7263_v0 }
 0x210   : > { %v2078_v28 = vadd.f32 %v7323_v7, %v1609_v41  ;;  %6137 = vtanh.f32 %v2065_v24 }
 0x211   : > { %v7367_v29 = vpop.eup %6121  ;;  %v5197_v54 = vpop.f32.mrf.mxu1  ;;  %6139 = vtanh.f32 %v2080_v30  ;;  %v2061_v30 = vadd.f32 %v7293_v45, %v7263_v0 }
 0x212   : > { %v7369_v33 = vpop.eup %6123  ;;  %v2081_v2 = vadd.f32 %v5197_v54, %v7323_v7 }
 0x213   : > { %v7374_v36 = vpop.eup %6125  ;;  %v1612_v42 = vpop.f32.mrf.mxu1 }
 0x214   : > { %6141 = vtanh.f32 %v2081_v2  ;;  %v2079_v46 = vadd.f32 %v7323_v7, %v1612_v42  ;;  %5291 = vmatpush3.bf16.xpose.msra.mxu0 %v2292_v56 }
 0x215   : > { %6143 = vtanh.f32 %v2078_v28  ;;  %v5200_v55 = vpop.f32.mrf.mxu1  ;;  %5292 = vmatprep.subr.bf16.mxu0 %v8326_v3  ;;  %v7391_v38 = vpop.eup %6127  ;;  %v7418_v28 = vld [vmem:[#allocation15] sm:$0x1] }
 0x216   : > { %6145 = vtanh.f32 %v2079_v46  ;;  %v2084_v7 = vadd.f32 %v5200_v55, %v7377_v58 }
 0x217   : > { %v1625_v62 = vpop.f32.mrf.mxu1  ;;  %6147 = vtanh.f32 %v2062_v43 }
 0x218   : > { %v2082_v48 = vadd.f32 %v7377_v58, %v1625_v62  ;;  %6149 = vtanh.f32 %v2063_v59  ;;  %v2058_v62 = vadd.f32 %v7263_v0, %v7285_v39 }
 0x219   : > { %v7394_v52 = vpop.eup %6129  ;;  %v5201_v56 = vpop.f32.mrf.mxu1  ;;  %6151 = vtanh.f32 %v2084_v7 }
 0x21a   : > { %v7396_v60 = vpop.eup %6131  ;;  %v2085_v34 = vadd.f32 %v5201_v56, %v7377_v58 }
 0x21b   : > { %v7401_v9 = vpop.eup %6133  ;;  %v1628_v10 = vpop.f32.mrf.mxu1 }
 0x21c   : > { %6153 = vtanh.f32 %v2085_v34  ;;  %v2083_v16 = vadd.f32 %v7377_v58, %v1628_v10  ;;  %5293 = vmatpush3.bf16.xpose.msra.mxu0 %v2291_v57  ;;  %v6136_v24 = vpop.eup %6135  ;;  %v2059_v34 = vadd.f32 %v7263_v0, %v7297_v47 }
 0x21d   : > { %6155 = vtanh.f32 %v2082_v48  ;;  %v5204_v37 = vpop.f32.mrf.mxu1  ;;  %5298 = vmatprep.subr.bf16.mxu0 %v8326_v3  ;;  %v6138_v27 = vpop.eup %6137 }
 0x21e   : > { %6157 = vtanh.f32 %v2083_v16  ;;  %v2088_v41 = vadd.f32 %v5204_v37, %v7377_v58  ;;  %v7415_v53 = vpop.eup %6139  ;;  %v2306_v42 = vpack.c.bf16 %v6138_v27, %v6136_v24  ;;  %v1945_v24 = vcombine.high %v7216_v17, %v7216_v17 }
 0x21f   : > { %v1641_v49 = vpop.f32.mrf.mxu1  ;;  %6159 = vtanh.f32 %v2060_v23 }
 0x220   : > { %v2086_v57 = vadd.f32 %v7377_v58, %v1641_v49  ;;  %6161 = vtanh.f32 %v2061_v30  ;;  %v7456_v17 = vrot.slane %v1945_v24, %v7214_v14 }
 0x221   : > { %v7420_v32 = vpop.eup %6141  ;;  %v5205_v54 = vpop.f32.mrf.mxu1  ;;  %6163 = vtanh.f32 %v2088_v41 }
 0x222   : > { %v7422_v2 = vpop.eup %6143  ;;  %v2089_v45 = vadd.f32 %v5205_v54, %v7377_v58  ;;  %v1961_v51 = vcombine.high %v7456_v17, %v7456_v17 }
 0x223   : > { %v7427_v43 = vpop.eup %6145  ;;  %v1644_v55 = vpop.f32.mrf.mxu1  ;;  %5295 = vmatmul.mubr.bf16.vlgmr.msra.gmra.mxu0 %v7418_v28 }
 0x224   : > { %6165 = vtanh.f32 %v2089_v45  ;;  %v2087_v59 = vadd.f32 %v7377_v58, %v1644_v55  ;;  %5299 = vmatpush3.bf16.xpose.msra.mxu0 %v2306_v42  ;;  %5314 = vmatprep.mubr.msk.bf16.mxu0 %vm6886_vm0, %v8326_v3  ;;  %v6148_v56 = vpop.eup %6147 }
 0x225   : > { %6167 = vtanh.f32 %v2086_v57  ;;  %v5208_v48 = vpop.f32.mrf.mxu1  ;;  %5300 = vmatprep.subr.bf16.mxu0 %v8326_v3  ;;  %v6150_v16 = vpop.eup %6149 }
 0x226   : > { %6169 = vtanh.f32 %v2087_v59  ;;  %v2092_v10 = vadd.f32 %v5208_v48, %v7377_v58  ;;  %v7441_v37 = vpop.eup %6151  ;;  %v2305_v49 = vpack.c.bf16 %v6150_v16, %v6148_v56  ;;  %v7467_v16 = vrot.slane %v7456_v17, %v7214_v14 }
 0x227   : > { %v1657_v23 = vpop.f32.mrf.mxu1  ;;  %6171 = vtanh.f32 %v2058_v62  ;;  %v8373_v17 = vpack.c.bf16 %v7291_v44, %v7287_v40 }
 0x228   : > { %v2090_v39 = vadd.f32 %v7377_v58, %v1657_v23  ;;  %6173 = vtanh.f32 %v2059_v34  ;;  %v7481_v55 = vrot.slane %v7467_v16, %v7221_v22 }
 0x229   : > { %v7446_v30 = vpop.eup %6153  ;;  %v5209_v41 = vpop.f32.mrf.mxu1  ;;  %6175 = vtanh.f32 %v2092_v10 }
 0x22a   : > { %v7448_v27 = vpop.eup %6155  ;;  %v2093_v47 = vadd.f32 %v5209_v41, %v7377_v58 }
 0x22b   : > { %8372 = vst [vmem:[#allocation47_spill] sm:$0xff] %v7448_v27  ;;  %v7453_v54 = vpop.eup %6157  ;;  %v1660_v45 = vpop.f32.mrf.mxu1 }
 0x22c   : > { %6177 = vtanh.f32 %v2093_v47  ;;  %v2091_v42 = vadd.f32 %v7377_v58, %v1660_v45  ;;  %5301 = vmatpush3.bf16.xpose.msra.mxu0 %v2305_v49  ;;  %v6160_v62 = vpop.eup %6159 }
 0x22d   : > { %6179 = vtanh.f32 %v2090_v39  ;;  %v5212_v59 = vpop.f32.mrf.mxu1  ;;  %5302 = vmatprep.subr.bf16.mxu0 %v8326_v3  ;;  %v6162_v56 = vpop.eup %6161 }
 0x22e   : > { %6181 = vtanh.f32 %v2091_v42  ;;  %v2096_v48 = vadd.f32 %v5212_v59, %v7377_v58  ;;  %v7463_v10 = vpop.eup %6163  ;;  %v2304_v49 = vpack.c.bf16 %v6162_v56, %v6160_v62  ;;  %v2054_v62 = vadd.f32 %v7263_v0, %v7276_v19 }
 0x22f   : > { %v1673_v34 = vpop.f32.mrf.mxu1 }
 0x230   : > { %v2094_v23 = vadd.f32 %v7377_v58, %v1673_v34  ;;  %6183 = vtanh.f32 %v2096_v48 }
 0x231   : > { %v7470_v24 = vpop.eup %6165  ;;  %v5213_v39 = vpop.f32.mrf.mxu1 }
 0x232   : > { %v7472_v41 = vpop.eup %6167  ;;  %v2097_v47 = vadd.f32 %v5213_v39, %v7377_v58  ;;  %v2055_v39 = vadd.f32 %v7263_v0, %v7279_v31  ;;  %v2051_v31 = vadd.f32 %v7263_v0, %v7271_v12 }
 0x233   : > { %v7477_v42 = vpop.eup %6169  ;;  %v1676_v59 = vpop.f32.mrf.mxu1 }
 0x234   : > { %6185 = vtanh.f32 %v2097_v47  ;;  %v2095_v34 = vadd.f32 %v7377_v58, %v1676_v59  ;;  %5303 = vmatpush3.bf16.xpose.msra.mxu0 %v2304_v49  ;;  %v6172_v48 = vpop.eup %6171 }
 0x235   : > { %6187 = vtanh.f32 %v2094_v23  ;;  %v5216_v56 = vpop.f32.mrf.mxu1  ;;  %5304 = vmatprep.subr.bf16.mxu0 %v8326_v3  ;;  %v6174_v45 = vpop.eup %6173 }
 0x236   : > { %6189 = vtanh.f32 %v2095_v34  ;;  %v2100_v47 = vadd.f32 %v5216_v56, %v7481_v55  ;;  %v7492_v49 = vpop.eup %6175  ;;  %v2303_v13 = vpack.c.bf16 %v6174_v45, %v6172_v48 }
 0x237   : > { %v1689_v58 = vpop.f32.mrf.mxu1  ;;  %6191 = vtanh.f32 %v2054_v62 }
 0x238   : > { %v2098_v59 = vadd.f32 %v7481_v55, %v1689_v58  ;;  %6193 = vtanh.f32 %v2055_v39 }
 0x239   : > { %v7495_v57 = vpop.eup %6177  ;;  %v5217_v19 = vpop.f32.mrf.mxu1  ;;  %6195 = vtanh.f32 %v2100_v47 }
 0x23a   : > { %v7497_v23 = vpop.eup %6179  ;;  %v2101_v20 = vadd.f32 %v5217_v19, %v7481_v55 }
 0x23b   : > { %v7502_v34 = vpop.eup %6181  ;;  %v1692_v56 = vpop.f32.mrf.mxu1 }
 0x23c   : > { %6197 = vtanh.f32 %v2101_v20  ;;  %v2099_v58 = vadd.f32 %v7481_v55, %v1692_v56  ;;  %5305 = vmatpush3.bf16.xpose.msra.mxu0 %v2303_v13 }
 0x23d   : > { %6199 = vtanh.f32 %v2098_v59  ;;  %v7507_v50 = vpop.f32.mrf.mxu1  ;;  %5306 = vmatprep.subr.bf16.mxu0 %v8326_v3  ;;  %v7512_v48 = vpop.eup %6183 }
 0x23e   : > { %6201 = vtanh.f32 %v2099_v58 }
 0x23f   : > { %v7510_v45 = vpop.f32.mrf.mxu1  ;;  %6203 = vtanh.f32 %v2051_v31 }
 0x240   : > { %6205 = vtanh.f32 %v2050_v5 }
 0x241   : > { %v7514_v39 = vpop.eup %6185  ;;  %v7516_v47 = vpop.f32.mrf.mxu1 }
 0x242   : > { %v7518_v20 = vpop.eup %6187 }
 0x243   : > { %v7522_v19 = vpop.eup %6189  ;;  %v7524_v59 = vpop.f32.mrf.mxu1 }
 0x244   : > { %5307 = vmatpush3.bf16.xpose.msra.mxu0 %v2302_v4  ;;  %v6192_v62 = vpop.eup %6191 }
 0x245   : > { %v5224_v58 = vpop.f32.mrf.mxu1  ;;  %5308 = vmatprep.subr.bf16.mxu0 %v8326_v3  ;;  %v6194_v35 = vpop.eup %6193 }
 0x246   : > { %v7536_v18 = vpop.eup %6195  ;;  %v2301_v56 = vpack.c.bf16 %v6194_v35, %v6192_v62  ;;  %v7557_v62 = vrot.slane %v1961_v51, %v7214_v14 }
 0x247   : > { %v7534_v13 = vpop.f32.mrf.mxu1 }
 0x248   : > { %v7562_v5 = vrot.slane %v7557_v62, %v7221_v22 }
 0x249   : > { %v7540_v61 = vpop.eup %6197  ;;  %v5225_v1 = vpop.f32.mrf.mxu1 }
 0x24a   : > { %v7542_v4 = vpop.eup %6199 }
 0x24b   : > { %v7546_v46 = vpop.eup %6201  ;;  %v7548_v12 = vpop.f32.mrf.mxu1 }
 0x24c   : > { %5309 = vmatpush3.bf16.xpose.msra.mxu0 %v2301_v56 }
 0x24d   : > { %v5228_v6 = vpop.f32.mrf.mxu1  ;;  %5310 = vmatprep.subr.bf16.mxu0 %v8326_v3 }
 0x24e   : > { %v2112_v35 = vadd.f32 %v5228_v6, %v7481_v55 }
 0x24f   : > { %v1737_v31 = vpop.f32.mrf.mxu1 }
 0x250   : > { %6207 = vtanh.f32 %v2112_v35  ;;  %v2110_v56 = vadd.f32 %v7481_v55, %v1737_v31  ;;  %v6204_v35 = vpop.eup %6203 }
 0x251   : > { %v5229_v7 = vpop.f32.mrf.mxu1  ;;  %v6206_v27 = vpop.eup %6205 }
 0x252   : > { %v2113_v11 = vadd.f32 %v5229_v7, %v7481_v55  ;;  %v2299_v44 = vpack.c.bf16 %v6204_v35, %v6206_v27 }
 0x253   : > { %v1740_v21 = vpop.f32.mrf.mxu1 }
 0x254   : > { %6209 = vtanh.f32 %v2113_v11  ;;  %5311 = vmatpush3.bf16.xpose.msra.mxu0 %v8373_v17  ;;  %v2111_v51 = vadd.f32 %v7481_v55, %v1740_v21  ;;  %v2108_v21 = vadd.f32 %v5224_v58, %v7481_v55 }
 0x255   : > { %v5232_v6 = vpop.f32.mrf.mxu1  ;;  %5312 = vmatprep.subr.bf16.mxu0 %v8326_v3  ;;  %6211 = vtanh.f32 %v2110_v56 }
 0x256   : > { %v2116_v7 = vadd.f32 %v5232_v6, %v7562_v5  ;;  %6213 = vtanh.f32 %v2111_v51 }
 0x257   : > { %v1753_v0 = vpop.f32.mrf.mxu1 }
 0x258   : > { %v2114_v14 = vadd.f32 %v7562_v5, %v1753_v0  ;;  %6215 = vtanh.f32 %v2116_v7  ;;  %v2109_v0 = vadd.f32 %v5225_v1, %v7481_v55 }
 0x259   : > { %v5233_v11 = vpop.f32.mrf.mxu1 }
 0x25a   : > { %v2117_v40 = vadd.f32 %v5233_v11, %v7562_v5 }
 0x25b   : > { %v1756_v31 = vpop.f32.mrf.mxu1 }
 0x25c   : > { %6217 = vtanh.f32 %v2117_v40  ;;  %v2115_v17 = vadd.f32 %v7562_v5, %v1756_v31  ;;  %5313 = vmatpush3.bf16.xpose.msra.mxu0 %v2299_v44  ;;  %v8374_v44 = vpack.c.bf16 %v7420_v32, %v7415_v53  ;;  %v2106_v31 = vadd.f32 %v7481_v55, %v7534_v13 }
 0x25d   : > { %6219 = vtanh.f32 %v2114_v14  ;;  %v5236_v6 = vpop.f32.mrf.mxu1  ;;  %5318 = vmatprep.subr.bf16.mxu0 %v8326_v3  ;;  %v6208_v11 = vpop.eup %6207 }
 0x25e   : > { %6221 = vtanh.f32 %v2115_v17  ;;  %v2120_v56 = vadd.f32 %v5236_v6, %v7562_v5  ;;  %v2107_v6 = vadd.f32 %v7481_v55, %v7548_v12 }
 0x25f   : > { %v1769_v51 = vpop.f32.mrf.mxu1  ;;  %6223 = vtanh.f32 %v2108_v21 }
 0x260   : > { %v2118_v27 = vadd.f32 %v7562_v5, %v1769_v51  ;;  %6225 = vtanh.f32 %v2109_v0 }
 0x261   : > { %v6210_v7 = vpop.eup %6209  ;;  %v5237_v35 = vpop.f32.mrf.mxu1  ;;  %6227 = vtanh.f32 %v2120_v56 }
 0x262   : > { %v2121_v40 = vadd.f32 %v5237_v35, %v7562_v5  ;;  %v2330_v58 = vpack.c.bf16 %v6210_v7, %v6208_v11  ;;  %v6212_v21 = vpop.eup %6211 }
 0x263   : > { %v1772_v14 = vpop.f32.mrf.mxu1  ;;  %5315 = vmatmul.mubr.bf16.vlgmr.msra.gmra.mxu0 %v7418_v28  ;;  %v6214_v53 = vpop.eup %6213 }
 0x264   : > { %6229 = vtanh.f32 %v2121_v40  ;;  %v2119_v1 = vadd.f32 %v7562_v5, %v1772_v14  ;;  %5319 = vmatpush3.bf16.xpose.msra.mxu0 %v8374_v44  ;;  %5359 = vmatpush3.bf16.xpose.msra.mxu1 %v2330_v58  ;;  %v2329_v7 = vpack.c.bf16 %v6214_v53, %v6212_v21 }
 0x265   : > { %6231 = vtanh.f32 %v2118_v27  ;;  %v5240_v17 = vpop.f32.mrf.mxu1  ;;  %5320 = vmatprep.subr.bf16.mxu0 %v8326_v3  ;;  %5360 = vmatprep.subr.bf16.mxu1 %v8326_v3  ;;  %v7594_v56 = vpop.eup %6215 }
 0x266   : > { %6233 = vtanh.f32 %v2119_v1  ;;  %v2124_v0 = vadd.f32 %v5240_v17, %v7562_v5  ;;  %5334 = vmatprep.mubr.msk.bf16.mxu0 %vm6886_vm0, %v8326_v3  ;;  %8375 = vst [vmem:[#allocation48_spill] sm:$0xff] %v7594_v56  ;;  %v8378_v1 = vpack.c.bf16 %v7427_v43, %v7422_v2 }
 0x267   : > { %v1785_v32 = vpop.f32.mrf.mxu1  ;;  %6235 = vtanh.f32 %v2106_v31  ;;  %v2104_v31 = vadd.f32 %v7507_v50, %v7481_v55  ;;  %v1991_v50 = vcombine.high %v7467_v16, %v7467_v16 }
 0x268   : > { %v2122_v13 = vadd.f32 %v7562_v5, %v1785_v32  ;;  %6237 = vtanh.f32 %v2107_v6  ;;  %v2105_v6 = vadd.f32 %v7516_v47, %v7481_v55 }
 0x269   : > { %v7597_v51 = vpop.eup %6217  ;;  %v5241_v11 = vpop.f32.mrf.mxu1  ;;  %6239 = vtanh.f32 %v2124_v0  ;;  %v7634_v16 = vrot.slane %v1991_v50, %v7221_v22 }
 0x26a   : > { %v7599_v27 = vpop.eup %6219  ;;  %v2125_v12 = vadd.f32 %v5241_v11, %v7562_v5 }
 0x26b   : > { %8376 = vst [vmem:[#allocation49_spill] sm:$0xff] %v7599_v27  ;;  %v7604_v40 = vpop.eup %6221  ;;  %v1788_v58 = vpop.f32.mrf.mxu1  ;;  %v8383_v27 = vmov 0.0  }
 0x26c   : > { %8377 = vst [vmem:[#allocation50_spill] sm:$0xff] %v7604_v40  ;;  %6241 = vtanh.f32 %v2125_v12  ;;  %v2123_v14 = vadd.f32 %v7562_v5, %v1788_v58  ;;  %5321 = vmatpush3.bf16.xpose.msra.mxu0 %v8378_v1  ;;  %5361 = vmatpush3.bf16.xpose.msra.mxu1 %v2329_v7  ;;  %v6224_v21 = vpop.eup %6223 }
 0x26d   : > { %6243 = vtanh.f32 %v2122_v13  ;;  %v5244_v17 = vpop.f32.mrf.mxu1  ;;  %5322 = vmatprep.subr.bf16.mxu0 %v8326_v3  ;;  %5362 = vmatprep.subr.bf16.mxu1 %v8326_v3  ;;  %v6226_v43 = vpop.eup %6225 }
 0x26e   : > { %6245 = vtanh.f32 %v2123_v14  ;;  %v2128_v2 = vadd.f32 %v5244_v17, %v7562_v5  ;;  %v7619_v53 = vpop.eup %6227  ;;  %v2328_v7 = vpack.c.bf16 %v6226_v43, %v6224_v21  ;;  %v8379_v17 = vpack.c.bf16 %v7394_v52, %v7391_v38 }
 0x26f   : > { %v1801_v0 = vpop.f32.mrf.mxu1  ;;  %6247 = vtanh.f32 %v2104_v31 }
 0x270   : > { %v2126_v32 = vadd.f32 %v7562_v5, %v1801_v0  ;;  %6249 = vtanh.f32 %v2105_v6  ;;  %v2102_v6 = vadd.f32 %v7481_v55, %v7510_v45 }
 0x271   : > { %v7624_v13 = vpop.eup %6229  ;;  %v5245_v11 = vpop.f32.mrf.mxu1  ;;  %6251 = vtanh.f32 %v2128_v2 }
 0x272   : > { %v7626_v12 = vpop.eup %6231  ;;  %v2129_v47 = vadd.f32 %v5245_v11, %v7562_v5 }
 0x273   : > { %v7631_v14 = vpop.eup %6233  ;;  %v1804_v1 = vpop.f32.mrf.mxu1 }
 0x274   : > { %6253 = vtanh.f32 %v2129_v47  ;;  %v2127_v31 = vadd.f32 %v7562_v5, %v1804_v1  ;;  %5323 = vmatpush3.bf16.xpose.msra.mxu0 %v8379_v17  ;;  %5363 = vmatpush3.bf16.xpose.msra.mxu1 %v2328_v7  ;;  %v6236_v43 = vpop.eup %6235  ;;  %v2103_v5 = vadd.f32 %v7481_v55, %v7524_v59 }
 0x275   : > { %6255 = vtanh.f32 %v2126_v32  ;;  %v5248_v2 = vpop.f32.mrf.mxu1  ;;  %5324 = vmatprep.subr.bf16.mxu0 %v8326_v3  ;;  %5364 = vmatprep.subr.bf16.mxu1 %v8326_v3  ;;  %v6238_v52 = vpop.eup %6237 }
 0x276   : > { %6257 = vtanh.f32 %v2127_v31  ;;  %v2132_v38 = vadd.f32 %v5248_v2, %v7634_v16  ;;  %v7649_v50 = vpop.eup %6239  ;;  %v2327_v1 = vpack.c.bf16 %v6238_v52, %v6236_v43 }
 0x277   : > { %v1817_v0 = vpop.f32.mrf.mxu1  ;;  %6259 = vtanh.f32 %v2102_v6  ;;  %v8380_v6 = vpack.c.bf16 %v7401_v9, %v7396_v60 }
 0x278   : > { %v2130_v11 = vadd.f32 %v7634_v16, %v1817_v0  ;;  %6261 = vtanh.f32 %v2103_v5 }
 0x279   : > { %v7652_v45 = vpop.eup %6241  ;;  %v5249_v32 = vpop.f32.mrf.mxu1  ;;  %6263 = vtanh.f32 %v2132_v38 }
 0x27a   : > { %v7654_v47 = vpop.eup %6243  ;;  %v2133_v7 = vadd.f32 %v5249_v32, %v7634_v16 }
 0x27b   : > { %v7659_v59 = vpop.eup %6245  ;;  %v1820_v31 = vpop.f32.mrf.mxu1 }
 0x27c   : > { %6265 = vtanh.f32 %v2133_v7  ;;  %v2131_v17 = vadd.f32 %v7634_v16, %v1820_v31  ;;  %5325 = vmatpush3.bf16.xpose.msra.mxu0 %v8380_v6  ;;  %5365 = vmatpush3.bf16.xpose.msra.mxu1 %v2327_v1  ;;  %v6248_v5 = vpop.eup %6247  ;;  %v8382_v6 = vpack.c.bf16 %v7374_v36, %v7369_v33 }
 0x27d   : > { %6267 = vtanh.f32 %v2130_v11  ;;  %v7667_v43 = vpop.f32.mrf.mxu1  ;;  %5326 = vmatprep.subr.bf16.mxu0 %v8326_v3  ;;  %5366 = vmatprep.subr.bf16.mxu1 %v8326_v3  ;;  %v6250_v38 = vpop.eup %6249 }
 0x27e   : > { %6269 = vtanh.f32 %v2131_v17  ;;  %v7673_v0 = vpop.eup %6251  ;;  %v2326_v11 = vpack.c.bf16 %v6250_v38, %v6248_v5  ;;  %v8381_v17 = vpack.c.bf16 %v7367_v29, %v7362_v26 }
 0x27f   : > { %v7671_v52 = vpop.f32.mrf.mxu1 }
 0x281   : > { %v7675_v60 = vpop.eup %6253  ;;  %v7677_v9 = vpop.f32.mrf.mxu1 }
 0x282   : > { %v7679_v32 = vpop.eup %6255 }
 0x283   : > { %v7683_v1 = vpop.eup %6257  ;;  %v7685_v31 = vpop.f32.mrf.mxu1 }
 0x284   : > { %5327 = vmatpush3.bf16.xpose.msra.mxu0 %v8381_v17  ;;  %5367 = vmatpush3.bf16.xpose.msra.mxu1 %v2326_v11  ;;  %v6260_v5 = vpop.eup %6259  ;;  %v1993_v11 = vcombine.high %v7557_v62, %v7557_v62 }
 0x285   : > { %v5256_v44 = vpop.f32.mrf.mxu1  ;;  %5328 = vmatprep.subr.bf16.mxu0 %v8326_v3  ;;  %5368 = vmatprep.subr.bf16.mxu1 %v8326_v3  ;;  %v6262_v38 = vpop.eup %6261 }
 0x286   : > { %v7696_v21 = vpop.eup %6263  ;;  %v2325_v29 = vpack.c.bf16 %v6262_v38, %v6260_v5  ;;  %v7718_v36 = vrot.slane %v1993_v11, %v7221_v22 }
 0x287   : > { %v7694_v35 = vpop.f32.mrf.mxu1 }
 0x289   : > { %v7698_v58 = vpop.eup %6265  ;;  %v5257_v2 = vpop.f32.mrf.mxu1 }
 0x28a   : > { %v7700_v26 = vpop.eup %6267 }
 0x28b   : > { %v7704_v17 = vpop.eup %6269  ;;  %v1852_v55 = vpop.f32.mrf.mxu1 }
 0x28c   : > { %5329 = vmatpush3.bf16.xpose.msra.mxu0 %v8382_v6  ;;  %5369 = vmatpush3.bf16.xpose.msra.mxu1 %v2325_v29  ;;  %v2339_v7 = vpack.c.bf16 %v7704_v17, %v7700_v26  ;;  %v8384_v6 = vpack.c.bf16 %v7344_v25, %v7341_v63 }
 0x28d   : > { %v5260_v3 = vpop.f32.mrf.mxu1  ;;  %5330 = vmatprep.subr.bf16.mxu0 %v8383_v27  ;;  %5370 = vmatprep.subr.bf16.mxu1 %v8383_v27 }
 0x28e   : > { %v2144_v5 = vadd.f32 %v5260_v3, %v7634_v16  ;;  %v8385_v3 = vpack.c.bf16 %v7540_v61, %v7536_v18 }
 0x28f   : > { %v1865_v38 = vpop.f32.mrf.mxu1 }
 0x290   : > { %6271 = vtanh.f32 %v2144_v5  ;;  %v2142_v29 = vadd.f32 %v7634_v16, %v1865_v38  ;;  %v8386_v38 = vpack.c.bf16 %v7351_v15, %v7346_v8  ;;  %v8388_v8 = vpack.c.bf16 %v7514_v39, %v7512_v48 }
 0x291   : > { %v5261_v40 = vpop.f32.mrf.mxu1  ;;  %v2138_v48 = vadd.f32 %v7634_v16, %v7694_v35 }
 0x292   : > { %v2145_v56 = vadd.f32 %v5261_v40, %v7634_v16 }
 0x293   : > { %v1868_v33 = vpop.f32.mrf.mxu1 }
 0x294   : > { %6273 = vtanh.f32 %v2145_v56  ;;  %5331 = vmatpush3.bf16.xpose.msra.mxu0 %v8384_v6  ;;  %5371 = vmatpush3.bf16.xpose.msra.mxu1 %v8385_v3  ;;  %v2143_v40 = vadd.f32 %v7634_v16, %v1868_v33  ;;  %v8387_v33 = vpack.c.bf16 %v7546_v46, %v7542_v4  ;;  %v2141_v6 = vadd.f32 %v5257_v2, %v7634_v16 }
 0x295   : > { %v5264_v62 = vpop.f32.mrf.mxu1  ;;  %5332 = vmatprep.subr.bf16.mxu0 %v8383_v27  ;;  %5372 = vmatprep.subr.bf16.mxu1 %v8383_v27  ;;  %6275 = vtanh.f32 %v2142_v29  ;;  %v2140_v29 = vadd.f32 %v5256_v44, %v7634_v16  ;;  %v2139_v46 = vadd.f32 %v7634_v16, %v1852_v55 }
 0x296   : > { %v2148_v11 = vadd.f32 %v5264_v62, %v7718_v36  ;;  %6277 = vtanh.f32 %v2143_v40 }
 0x297   : > { %v1881_v56 = vpop.f32.mrf.mxu1 }
 0x298   : > { %v2146_v5 = vadd.f32 %v7718_v36, %v1881_v56  ;;  %6279 = vtanh.f32 %v2148_v11 }
 0x299   : > { %v5265_v63 = vpop.f32.mrf.mxu1 }
 0x29a   : > { %v2149_v25 = vadd.f32 %v5265_v63, %v7718_v36  ;;  %v2137_v63 = vadd.f32 %v7677_v9, %v7634_v16 }
 0x29b   : > { %v1884_v18 = vpop.f32.mrf.mxu1 }
 0x29c   : > { %6281 = vtanh.f32 %v2149_v25  ;;  %v2147_v61 = vadd.f32 %v7718_v36, %v1884_v18  ;;  %5333 = vmatpush3.bf16.xpose.msra.mxu0 %v8386_v38  ;;  %5373 = vmatpush3.bf16.xpose.msra.mxu1 %v8387_v33  ;;  %v2136_v18 = vadd.f32 %v7667_v43, %v7634_v16  ;;  %v2134_v43 = vadd.f32 %v7634_v16, %v7671_v52 }
 0x29d   : > { %6283 = vtanh.f32 %v2146_v5  ;;  %5338 = vmatprep.subr.bf16.mxu0 %v8383_v27  ;;  %5398 = vmatprep.subr.bf16.mxu1 %v8383_v27  ;;  %v6272_v3 = vpop.eup %6271  ;;  %v8389_v5 = vpack.c.bf16 %v7522_v19, %v7518_v20  ;;  %v8390_v20 = vpack.c.bf16 %v7495_v57, %v7492_v49  ;;  %v2135_v19 = vadd.f32 %v7634_v16, %v7685_v31 }
 0x29e   : > { %6285 = vtanh.f32 %v2147_v61  ;;  %v8391_v57 = vpack.c.bf16 %v7502_v34, %v7497_v23  ;;  %v8393_v52 = vpack.c.bf16 %v7477_v42, %v7472_v41  ;;  %v8396_v41 = vld [vmem:[#allocation47_spill] sm:$0xff] }
 0x29f   : > { %6287 = vtanh.f32 %v2141_v6  ;;  %v8397_v42 = vpack.c.bf16 %v7453_v54, %v8396_v41  ;;  %v8398_v54 = vpack.c.bf16 %v7675_v60, %v7673_v0  ;;  %v8399_v60 = vpack.c.bf16 %v7683_v1, %v7679_v32  ;;  %v6351_v32 = vld [vmem:[#allocation7 + $0x18] sm:$0xff]  }
 0x2a0   : > { %6289 = vtanh.f32 %v2140_v29  ;;  %v8392_v29 = vpack.c.bf16 %v7470_v24, %v7463_v10  ;;  %v8394_v10 = vpack.c.bf16 %v7446_v30, %v7441_v37  ;;  %v8395_v24 = vpack.c.bf16 %v7698_v58, %v7696_v21  ;;  %v7819_v37 = vpop.f32.mrf.mxu1  ;;  %v6347_v21 = vld [vmem:[#allocation7 + $0x38] sm:$0xff]  }
 0x2a1   : > { %v6274_v62 = vpop.eup %6273  ;;  %6291 = vtanh.f32 %v2139_v46 }
 0x2a2   : > { %v2346_v40 = vpack.c.bf16 %v6274_v62, %v6272_v3  ;;  %v6276_v15 = vpop.eup %6275  ;;  %6293 = vtanh.f32 %v2138_v48  ;;  %v6348_v62 = vld [vmem:[#allocation7 + $0x30] sm:$0xff]  }
 0x2a3   : > { %5335 = vmatmul.mubr.bf16.vlgmr.msra.gmra.mxu0 %v7418_v28  ;;  %5375 = vmatmul.mubr.bf16.vlgmr.msra.gmra.mxu1 %v7418_v28  ;;  %v6278_v4 = vpop.eup %6277  ;;  %6295 = vtanh.f32 %v2137_v63  ;;  %v6352_v48 = vld [vmem:[#allocation7 + $0x10] sm:$0xff]   ;;  %v6354_v63 = vld [vmem:[#allocation7] sm:$0xff]  }
 0x2a4   : > { %5339 = vmatpush3.bf16.xpose.msra.mxu0 %v8388_v8  ;;  %5399 = vmatpush3.bf16.xpose.msra.mxu1 %v2346_v40  ;;  %v2345_v11 = vpack.c.bf16 %v6278_v4, %v6276_v15  ;;  %6297 = vtanh.f32 %v2136_v18  ;;  %v6349_v40 = vld [vmem:[#allocation7 + $0x28] sm:$0xff]   ;;  %v6350_v15 = vld [vmem:[#allocation7 + $0x20] sm:$0xff]   ;;  %v8400_v4 = vpack.c.bf16 %v7652_v45, %v7649_v50  ;;  %v8402_v18 = vpack.c.bf16 %v7624_v13, %v7619_v53  ;;  %v8404_v53 = vld [vmem:[#allocation48_spill] sm:$0xff] }
 0x2a5   : > { %5340 = vmatprep.subr.bf16.mxu0 %v8383_v27  ;;  %5400 = vmatprep.subr.bf16.mxu1 %v8383_v27  ;;  %v7756_v44 = vpop.eup %6279  ;;  %6299 = vtanh.f32 %v2135_v19  ;;  %v6353_v50 = vld [vmem:[#allocation7 + $0x8] sm:$0xff]   ;;  %v8405_v13 = vpack.c.bf16 %v7597_v51, %v8404_v53 }
 0x2a6   : > { %5354 = vmatprep.mubr.msk.bf16.mxu0 %vm6886_vm0, %v8383_v27  ;;  %5414 = vmatprep.mubr.msk.bf16.mxu1 %vm6886_vm0, %v8383_v27  ;;  %6301 = vtanh.f32 %v2134_v43  ;;  %v8407_v43 = vld [vmem:[#allocation49_spill] sm:$0xff] }
 0x2a9   : > { %v7760_v39 = vpop.eup %6281 }
 0x2aa   : > { %v7762_v2 = vpop.eup %6283  ;;  %v2348_v55 = vpack.c.bf16 %v7760_v39, %v7756_v44 }
 0x2ab   : > { %v7766_v56 = vpop.eup %6285 }
 0x2ac   : > { %5341 = vmatpush3.bf16.xpose.msra.mxu0 %v8389_v5  ;;  %5401 = vmatpush3.bf16.xpose.msra.mxu1 %v2345_v11  ;;  %v2347_v35 = vpack.c.bf16 %v7766_v56, %v7762_v2  ;;  %v6288_v25 = vpop.eup %6287  ;;  %v8401_v5 = vpack.c.bf16 %v7659_v59, %v7654_v47 }
 0x2ad   : > { %5342 = vmatprep.subr.bf16.mxu0 %v8383_v27  ;;  %5402 = vmatprep.subr.bf16.mxu1 %v8383_v27  ;;  %v6290_v61 = vpop.eup %6289 }
 0x2ae   : > { %v2344_v38 = vpack.c.bf16 %v6288_v25, %v6290_v61  ;;  %v6292_v9 = vpop.eup %6291  ;;  %v8403_v61 = vpack.c.bf16 %v7631_v14, %v7626_v12  ;;  %v8406_v14 = vld [vmem:[#allocation50_spill] sm:$0xff] }
 0x2af   : > { %v6294_v33 = vpop.eup %6293 }
 0x2b0   : > { %v2343_v6 = vpack.c.bf16 %v6292_v9, %v6294_v33  ;;  %v6296_v49 = vpop.eup %6295  ;;  %v8408_v33 = vpack.c.bf16 %v8406_v14, %v8407_v43 }
 0x2b1   : > { %v6298_v3 = vpop.eup %6297 }
 0x2b2   : > { %v2342_v31 = vpack.c.bf16 %v6296_v49, %v6298_v3  ;;  %v6300_v16 = vpop.eup %6299 }
 0x2b3   : > { %v6302_v23 = vpop.eup %6301 }
 0x2b4   : > { %5343 = vmatpush3.bf16.xpose.msra.mxu0 %v8390_v20  ;;  %5403 = vmatpush3.bf16.xpose.msra.mxu1 %v2344_v38  ;;  %v2341_v34 = vpack.c.bf16 %v6300_v16, %v6302_v23 }
 0x2b5   : > { %5344 = vmatprep.subr.bf16.mxu0 %v8383_v27  ;;  %5404 = vmatprep.subr.bf16.mxu1 %v8383_v27 }
 0x2bc   : > { %5345 = vmatpush3.bf16.xpose.msra.mxu0 %v8391_v57  ;;  %5405 = vmatpush3.bf16.xpose.msra.mxu1 %v2343_v6 }
 0x2bd   : > { %5346 = vmatprep.subr.bf16.mxu0 %v8383_v27  ;;  %5406 = vmatprep.subr.bf16.mxu1 %v8383_v27 }
 0x2c4   : > { %5347 = vmatpush3.bf16.xpose.msra.mxu0 %v8392_v29  ;;  %5407 = vmatpush3.bf16.xpose.msra.mxu1 %v2342_v31 }
 0x2c5   : > { %5348 = vmatprep.subr.bf16.mxu0 %v8383_v27  ;;  %5408 = vmatprep.subr.bf16.mxu1 %v8383_v27 }
 0x2cc   : > { %5349 = vmatpush3.bf16.xpose.msra.mxu0 %v8393_v52  ;;  %5409 = vmatpush3.bf16.xpose.msra.mxu1 %v2341_v34 }
 0x2cd   : > { %5350 = vmatprep.subr.bf16.mxu0 %v8383_v27  ;;  %5410 = vmatprep.subr.bf16.mxu1 %v8383_v27 }
 0x2d4   : > { %5351 = vmatpush3.bf16.xpose.msra.mxu0 %v8394_v10  ;;  %5411 = vmatpush3.bf16.xpose.msra.mxu1 %v8395_v24 }
 0x2d5   : > { %5352 = vmatprep.subr.bf16.mxu0 %v8383_v27  ;;  %5412 = vmatprep.subr.bf16.mxu1 %v8383_v27 }
 0x2dc   : > { %5353 = vmatpush3.bf16.xpose.msra.mxu0 %v8397_v42  ;;  %5413 = vmatpush3.bf16.xpose.msra.mxu1 %v2339_v7  ;;  %v7834_v7 = vpop.f32.mrf.mxu1 }
 0x2dd   : > { %5378 = vmatprep.subr.bf16.mxu0 %v8383_v27  ;;  %5438 = vmatprep.subr.bf16.mxu1 %v8383_v27 }
 0x2de   : > { %v7837_v0 = vpop.f32.mrf.mxu1 }
 0x2e0   : > { %v7844_v8 = vpop.f32.mrf.mxu1 }
 0x2e2   : > { %v5272_v46 = vpop.f32.mrf.mxu1 }
 0x2e3   : > { %5355 = vmatmul.mubr.bf16.vlgmr.msra.gmra.mxu0 %v7418_v28  ;;  %v7822_v30 = vpop.f32.mrf.mxu0  ;;  %5415 = vmatmul.mubr.bf16.vlgmr.msra.gmra.mxu1 %v7418_v28  ;;  %v2156_v51 = vadd.f32 %v5272_v46, %v7718_v36 }
 0x2e4   : > { %5379 = vmatpush3.bf16.xpose.msra.mxu0 %v8398_v54  ;;  %5394 = vmatprep.mubr.msk.bf16.mxu0 %vm6886_vm0, %v8383_v27  ;;  %v1913_v1 = vpop.f32.mrf.mxu1  ;;  %v2152_v54 = vadd.f32 %v7819_v37, %v7718_v36 }
 0x2e5   : > { %5380 = vmatprep.subr.bf16.mxu0 %v8383_v27  ;;  %v5296_v58 = vpop.f32.mrf.mxu0  ;;  %5439 = vmatpush3.bf16.msra.mxu1 %v6347_v21  ;;  %v2154_v52 = vadd.f32 %v7718_v36, %v1913_v1 }
 0x2e6   : > { %5440 = vmatprep.subr.bf16.mxu1 %v8383_v27  ;;  %5454 = vmatprep.mubr.msk.bf16.mxu1 %vm6886_vm0, %v8383_v27  ;;  %v5273_v11 = vpop.f32.mrf.mxu1 }
 0x2e7   : > { %v2392_v26 = vpop.f32.mrf.mxu0  ;;  %v2157_v6 = vadd.f32 %v5273_v11, %v7718_v36  ;;  %v6356_v11 = vld [vmem:[#allocation7 + $0xb8] sm:$0xff]  }
 0x2e8   : > { %v1916_v45 = vpop.f32.mrf.mxu1  ;;  %v2151_v26 = vadd.f32 %v7718_v36, %v7844_v8 }
 0x2e9   : > { %v5297_v17 = vpop.f32.mrf.mxu0  ;;  %5441 = vmatpush3.bf16.msra.mxu1 %v6348_v62  ;;  %v2155_v16 = vadd.f32 %v7718_v36, %v1916_v45  ;;  %v2150_v62 = vadd.f32 %v7718_v36, %v7834_v7 }
 0x2ea   : > { %5442 = vmatprep.subr.bf16.mxu1 %v8383_v27  ;;  %v5276_v25 = vpop.f32.mrf.mxu1 }
 0x2eb   : > { %v2160_v20 = vadd.f32 %v5276_v25, %v7718_v36  ;;  %v6359_v25 = vld [vmem:[#allocation7 + $0xa0] sm:$0xff]  }
 0x2ec   : > { %5381 = vmatpush3.bf16.xpose.msra.mxu0 %v8399_v60  ;;  %v1929_v47 = vpop.f32.mrf.mxu1 }
 0x2ed   : > { %5382 = vmatprep.subr.bf16.mxu0 %v8383_v27  ;;  %5443 = vmatpush3.bf16.msra.mxu1 %v6349_v40  ;;  %v2158_v12 = vadd.f32 %v7718_v36, %v1929_v47  ;;  %v6362_v47 = vld [vmem:[#allocation7 + $0x88] sm:$0xff]  }
 0x2ee   : > { %5444 = vmatprep.subr.bf16.mxu1 %v8383_v27  ;;  %v5277_v59 = vpop.f32.mrf.mxu1 }
 0x2ef   : > { %v2161_v38 = vadd.f32 %v5277_v59, %v7718_v36  ;;  %v6363_v59 = vld [vmem:[#allocation7 + $0x80] sm:$0xff]  }
 0x2f0   : > { %v1932_v19 = vpop.f32.mrf.mxu1 }
 0x2f1   : > { %5445 = vmatpush3.bf16.msra.mxu1 %v6350_v15  ;;  %6303 = vtanh.f32 %v2161_v38  ;;  %v2159_v9 = vadd.f32 %v7718_v36, %v1932_v19 }
 0x2f2   : > { %5446 = vmatprep.subr.bf16.mxu1 %v8383_v27  ;;  %6305 = vtanh.f32 %v2160_v20 }
 0x2f3   : > { %6307 = vtanh.f32 %v2159_v9 }
 0x2f4   : > { %5383 = vmatpush3.bf16.xpose.msra.mxu0 %v8400_v4  ;;  %6309 = vtanh.f32 %v2158_v12 }
 0x2f5   : > { %5384 = vmatprep.subr.bf16.mxu0 %v8383_v27  ;;  %5447 = vmatpush3.bf16.msra.mxu1 %v6351_v32  ;;  %6311 = vtanh.f32 %v2157_v6  ;;  %v6355_v32 = vld [vmem:[#allocation15] sm:$0x1] }
 0x2f6   : > { %5448 = vmatprep.subr.bf16.mxu1 %v8383_v27  ;;  %6313 = vtanh.f32 %v2156_v51 }
 0x2f7   : > { %6315 = vtanh.f32 %v2155_v16 }
 0x2f8   : > { %6317 = vtanh.f32 %v2154_v52 }
 0x2f9   : > { %5449 = vmatpush3.bf16.msra.mxu1 %v6352_v48 }
 0x2fa   : > { %5450 = vmatprep.subr.bf16.mxu1 %v8383_v27 }
 0x2fc   : > { %5385 = vmatpush3.bf16.xpose.msra.mxu0 %v8401_v5  ;;  %v6357_v5 = vld [vmem:[#allocation7 + $0xb0] sm:$0xff]  }
 0x2fd   : > { %5386 = vmatprep.subr.bf16.mxu0 %v8383_v27  ;;  %5451 = vmatpush3.bf16.msra.mxu1 %v6353_v50 }
 0x2fe   : > { %5452 = vmatprep.subr.bf16.mxu1 %v8383_v27  ;;  %v6304_v57 = vpop.eup %6303 }
 0x2ff   : > { %v6306_v49 = vpop.eup %6305 }
 0x300   : > { %v2354_v3 = vpack.c.bf16 %v6304_v57, %v6306_v49  ;;  %v6308_v23 = vpop.eup %6307 }
 0x301   : > { %5453 = vmatpush3.bf16.msra.mxu1 %v6354_v63  ;;  %v6310_v10 = vpop.eup %6309  ;;  %v6358_v63 = vld [vmem:[#allocation7 + $0xa8] sm:$0xff]  }
 0x302   : > { %5458 = vmatprep.subr.bf16.mxu1 %v8383_v27  ;;  %v2353_v41 = vpack.c.bf16 %v6308_v23, %v6310_v10  ;;  %v6312_v42 = vpop.eup %6311 }
 0x303   : > { %v6314_v58 = vpop.eup %6313 }
 0x304   : > { %5387 = vmatpush3.bf16.xpose.msra.mxu0 %v8402_v18  ;;  %v2352_v21 = vpack.c.bf16 %v6312_v42, %v6314_v58  ;;  %v6316_v17 = vpop.eup %6315  ;;  %v6361_v18 = vld [vmem:[#allocation7 + $0x90] sm:$0xff]  }
 0x305   : > { %5388 = vmatprep.subr.bf16.mxu0 %v8383_v27  ;;  %v6318_v60 = vpop.eup %6317 }
 0x30c   : > { %5389 = vmatpush3.bf16.xpose.msra.mxu0 %v8403_v61 }
 0x30d   : > { %5390 = vmatprep.subr.bf16.mxu0 %v8383_v27 }
 0x314   : > { %5391 = vmatpush3.bf16.xpose.msra.mxu0 %v8405_v13 }
 0x315   : > { %5392 = vmatprep.subr.bf16.mxu0 %v8383_v27 }
 0x31c   : > { %5393 = vmatpush3.bf16.xpose.msra.mxu0 %v8408_v33 }
 0x31d   : > { %5418 = vmatprep.subr.bf16.mxu0 %v8383_v27 }
 0x323   : > { %v7881_v31 = vpop.f32.mrf.mxu0  ;;  %5395 = vmatmul.mubr.bf16.vlgmr.msra.gmra.mxu0 %v7418_v28  ;;  %v2153_v28 = vadd.f32 %v7837_v0, %v7718_v36  ;;  %v2351_v0 = vpack.c.bf16 %v6316_v17, %v6318_v60 }
 0x324   : > { %5419 = vmatpush3.bf16.xpose.msra.mxu0 %v2354_v3  ;;  %5434 = vmatprep.mubr.msk.bf16.mxu0 %vm6886_vm0, %v8383_v27  ;;  %v2685_v36 = vrot.slane %v7881_v31, 7 }
 0x325   : > { %5420 = vmatprep.subr.bf16.mxu0 %v8383_v27  ;;  %v5316_v29 = vpop.f32.mrf.mxu0  ;;  %6319 = vtanh.f32 %v2153_v28 }
 0x326   : > { %6321 = vtanh.f32 %v2152_v54  ;;  %v2687_v44 = vsel %vm2686_vm1, %v2685_v36, %v7822_v30  ;;  %v6360_v30 = vld [vmem:[#allocation7 + $0x98] sm:$0xff]  }
 0x327   : > { %v2432_v34 = vpop.f32.mrf.mxu0  ;;  %6323 = vtanh.f32 %v2151_v26 }
 0x328   : > { %6325 = vtanh.f32 %v2150_v62  ;;  %v2675_v34 = vld [vmem:[#allocation9] sm:$0xff] }
 0x329   : > { %v5317_v24 = vpop.f32.mrf.mxu0  ;;  %vm2676_vm8 = vcmp.eq.s32.totalorder %v2675_v34, 0 }
 0x32c   : > { %5421 = vmatpush3.bf16.xpose.msra.mxu0 %v2353_v41 }
 0x32d   : > { %5422 = vmatprep.subr.bf16.mxu0 %v8383_v27 }
 0x332   : > { %v6320_v37 = vpop.eup %6319 }
 0x333   : > { %v6322_v40 = vpop.eup %6321 }
 0x334   : > { %5423 = vmatpush3.bf16.xpose.msra.mxu0 %v2352_v21  ;;  %v2350_v15 = vpack.c.bf16 %v6320_v37, %v6322_v40  ;;  %v6324_v46 = vpop.eup %6323  ;;  %v8409_v40 = vld [vmem:[#allocation46_spill] sm:$0xff] }
 0x335   : > { %5424 = vmatprep.subr.bf16.mxu0 %v8383_v27  ;;  %v6326_v4 = vpop.eup %6325 }
 0x336   : > { %v2349_v8 = vpack.c.bf16 %v6324_v46, %v6326_v4 }
 0x33c   : > { %5425 = vmatpush3.bf16.xpose.msra.mxu0 %v2351_v0 }
 0x33d   : > { %5426 = vmatprep.subr.bf16.mxu0 %v8383_v27 }
 0x344   : > { %5427 = vmatpush3.bf16.xpose.msra.mxu0 %v2350_v15 }
 0x345   : > { %5428 = vmatprep.subr.bf16.mxu0 %v8383_v27 }
 0x34c   : > { %5429 = vmatpush3.bf16.xpose.msra.mxu0 %v2349_v8 }
 0x34d   : > { %5430 = vmatprep.subr.bf16.mxu0 %v8383_v27 }
 0x354   : > { %5431 = vmatpush3.bf16.xpose.msra.mxu0 %v2348_v55 }
 0x355   : > { %5432 = vmatprep.subr.bf16.mxu0 %v8383_v27 }
 0x35c   : > { %5433 = vmatpush3.bf16.xpose.msra.mxu0 %v2347_v35 }
 0x35d   : > { %5478 = vmatprep.subr.bf16.mxu0 %v8383_v27 }
 0x363   : > { %v2469_v7 = vpop.f32.mrf.mxu0  ;;  %5435 = vmatmul.mubr.bf16.vlgmr.msra.gmra.mxu0 %v6355_v32  ;;  %v2549_v1 = vpop.f32.mrf.mxu1 }
 0x364   : > { %v2688_v48 = vrot.slane %v2469_v7, 6  ;;  %5479 = vmatpush3.bf16.msra.mxu0 %v6356_v11  ;;  %5494 = vmatprep.mubr.msk.bf16.mxu0 %vm6886_vm0, %v8383_v27  ;;  %v2694_v38 = vrot.slane %v2549_v1, 4  ;;  %v6365_v11 = vld [vmem:[#allocation7 + $0x138] sm:$0xff]  }
 0x365   : > { %v5336_v39 = vpop.f32.mrf.mxu0  ;;  %v5376_v2 = vpop.f32.mrf.mxu1  ;;  %5480 = vmatprep.subr.bf16.mxu0 %v8383_v27 }
 0x366   : > { %v2690_v55 = vsel %vm2689_vm2, %v2688_v48, %v2687_v44  ;;  %v6364_v48 = vld [vmem:[#allocation7 + $0x78] sm:$0xff]   ;;  %v6366_v44 = vld [vmem:[#allocation7 + $0x70] sm:$0xff]   ;;  %v6368_v2 = vld [vmem:[#allocation7 + $0x68] sm:$0xff]  }
 0x367   : > { %v2472_v56 = vpop.f32.mrf.mxu0  ;;  %v2552_v35 = vpop.f32.mrf.mxu1  ;;  %v6367_v39 = vld [vmem:[#allocation7 + $0x130] sm:$0xff]  }
 0x368   : > { %5481 = vmatpush3.bf16.msra.mxu0 %v6357_v5  ;;  %v6370_v56 = vld [vmem:[#allocation7 + $0x60] sm:$0xff]   ;;  %v6372_v5 = vld [vmem:[#allocation7 + $0x58] sm:$0xff]  }
 0x369   : > { %v5337_v50 = vpop.f32.mrf.mxu0  ;;  %v5377_v45 = vpop.f32.mrf.mxu1  ;;  %5482 = vmatprep.subr.bf16.mxu0 %v8383_v27  ;;  %v6371_v35 = vld [vmem:[#allocation7 + $0x120] sm:$0xff]  }
 0x36a   : > { %v6373_v50 = vld [vmem:[#allocation7 + $0x118] sm:$0xff]   ;;  %v6374_v45 = vld [vmem:[#allocation7 + $0x50] sm:$0xff]  }
 0x36c   : > { %5483 = vmatpush3.bf16.msra.mxu0 %v6358_v63 }
 0x36d   : > { %5484 = vmatprep.subr.bf16.mxu0 %v8383_v27 }
 0x370   : > { %5485 = vmatpush3.bf16.msra.mxu0 %v6359_v25  ;;  %v6375_v25 = vld [vmem:[#allocation7 + $0x110] sm:$0xff]  }
 0x371   : > { %5486 = vmatprep.subr.bf16.mxu0 %v8383_v27 }
 0x374   : > { %5487 = vmatpush3.bf16.msra.mxu0 %v6360_v30 }
 0x375   : > { %5488 = vmatprep.subr.bf16.mxu0 %v8383_v27 }
 0x378   : > { %5489 = vmatpush3.bf16.msra.mxu0 %v6361_v18  ;;  %v6376_v18 = vld [vmem:[#allocation7 + $0x48] sm:$0xff]  }
 0x379   : > { %5490 = vmatprep.subr.bf16.mxu0 %v8383_v27 }
 0x37c   : > { %5491 = vmatpush3.bf16.msra.mxu0 %v6362_v47 }
 0x37d   : > { %5492 = vmatprep.subr.bf16.mxu0 %v8383_v27 }
 0x380   : > { %5493 = vmatpush3.bf16.msra.mxu0 %v6363_v59  ;;  %v6377_v59 = vld [vmem:[#allocation7 + $0x108] sm:$0xff]  }
 0x381   : > { %5518 = vmatprep.subr.bf16.mxu0 %v8383_v27 }
 0x3a3   : > { %v2509_v61 = vpop.f32.mrf.mxu0  ;;  %v2629_v20 = vpop.f32.mrf.mxu1 }
 0x3a4   : > { %v2691_v19 = vrot.slane %v2509_v61, 5  ;;  %v2700_v51 = vrot.slane %v2629_v20, 2 }
 0x3a5   : > { %v5356_v53 = vpop.f32.mrf.mxu0  ;;  %v5416_v13 = vpop.f32.mrf.mxu1 }
 0x3a6   : > { %v2693_v9 = vsel %vm2692_vm3, %v2691_v19, %v2690_v55  ;;  %v6369_v55 = vld [vmem:[#allocation7 + $0x128] sm:$0xff]   ;;  %v6379_v19 = vld [vmem:[#allocation7 + $0x100] sm:$0xff]   ;;  %v6380_v13 = vld [vmem:[#allocation7 + $0xf8] sm:$0xff]  }
 0x3a7   : > { %v2696_v12 = vsel %vm2695_vm4, %v2694_v38, %v2693_v9  ;;  %v2512_v14 = vpop.f32.mrf.mxu0  ;;  %v2632_v43 = vpop.f32.mrf.mxu1  ;;  %v6378_v38 = vld [vmem:[#allocation7 + $0x40] sm:$0xff]   ;;  %v6381_v9 = vld [vmem:[#allocation7 + $0x1b8] sm:$0xff]  }
 0x3a8   : > { %v6383_v14 = vld [vmem:[#allocation7 + $0x1b0] sm:$0xff]   ;;  %v6384_v43 = vld [vmem:[#allocation7 + $0xe8] sm:$0xff]  }
 0x3a9   : > { %v5357_v33 = vpop.f32.mrf.mxu0  ;;  %v5417_v6 = vpop.f32.mrf.mxu1 }
 0x3aa   : > { %v6385_v33 = vld [vmem:[#allocation7 + $0x1a8] sm:$0xff]   ;;  %v6386_v6 = vld [vmem:[#allocation7 + $0xe0] sm:$0xff]  }
 0x3e3   : > { %v2589_v57 = vpop.f32.mrf.mxu0 }
 0x3e4   : > { %v2697_v49 = vrot.slane %v2589_v57, 3  ;;  %v6387_v57 = vld [vmem:[#allocation7 + $0x1a0] sm:$0xff]  }
 0x3e5   : > { %v5396_v3 = vpop.f32.mrf.mxu0 }
 0x3e6   : > { %v2699_v31 = vsel %vm2698_vm5, %v2697_v49, %v2696_v12  ;;  %v6382_v12 = vld [vmem:[#allocation7 + $0xf0] sm:$0xff]   ;;  %v6389_v49 = vld [vmem:[#allocation7 + $0x198] sm:$0xff]  }
 0x3e7   : > { %v2592_v29 = vpop.f32.mrf.mxu0  ;;  %v2702_v16 = vsel %vm2701_vm6, %v2700_v51, %v2699_v31  ;;  %v6388_v51 = vld [vmem:[#allocation7 + $0xd8] sm:$0xff]   ;;  %v6390_v3 = vld [vmem:[#allocation7 + $0xd0] sm:$0xff]  }
 0x3e8   : > { %v6391_v29 = vld [vmem:[#allocation7 + $0x190] sm:$0xff]  }
 0x3e9   : > { %v5397_v23 = vpop.f32.mrf.mxu0 }
 0x3ea   : > { %v6392_v23 = vld [vmem:[#allocation7 + $0xc8] sm:$0xff]  }
 0x423   : > { %v2669_v52 = vpop.f32.mrf.mxu0 }
 0x424   : > { %v2703_v10 = vrot.slane %v2669_v52, 1  ;;  %v6393_v52 = vld [vmem:[#allocation7 + $0x188] sm:$0xff]  }
 0x425   : > { %v5436_v24 = vpop.f32.mrf.mxu0 }
 0x426   : > { %v2705_v41 = vsel %vm2704_vm7, %v2703_v10, %v2702_v16  ;;  %v6394_v24 = vld [vmem:[#allocation7 + $0xc0] sm:$0xff]  }
 0x427   : > { %v2707_v28 = vsel %vm2676_vm8, -1e+10, %v2705_v41  ;;  %v2672_v42 = vpop.f32.mrf.mxu0 }
 0x428   : > { %2708 = vmax.xlane.f32.xlu0 %v2707_v28 }
 0x429   : > { %v5437_v54 = vpop.f32.mrf.mxu0 }
 0x42a   : > { %v6396_v54 = vld [vmem:[#allocation7 + $0x178] sm:$0xff]  }
 0x4b1   : > { %v2709_v58 = vpop.xlane.xlu0 %2708 }
 0x4b2   : > { %v2710_v21 = vsub.f32 %v2707_v28, %v2709_v58  ;;  %v6395_v28 = vld [vmem:[#allocation7 + $0x180] sm:$0xff]   ;;  %v6397_v58 = vld [vmem:[#allocation7 + $0x170] sm:$0xff]  }
 0x4b4   : > { %v2711_v26 = vmul.f32 1.442695, %v2710_v21  ;;  %v6398_v21 = vld [vmem:[#allocation7 + $0x168] sm:$0xff]  }
 0x4b6   : > { %6327 = vpow2.f32 %v2711_v26  ;;  %v6399_v26 = vld [vmem:[#allocation7 + $0x160] sm:$0xff]  }
 0x4c3   : > { %v6328_v17 = vpop.eup %6327 }
 0x4c4   : > { %2713 = vadd.xlane.f32.xlu0 %v6328_v17 }
 0x54d   : > { %v2714_v62 = vpop.xlane.xlu0 %2713 }
 0x54e   : > { %6329 = vrcp.f32 %v2714_v62  ;;  %v6401_v62 = vld [vmem:[#allocation7 + $0x150] sm:$0xff]  }
 0x55b   : > { %v6330_v60 = vpop.eup %6329 }
 0x55c   : > { %v2716_v0 = vmul.f32 %v6330_v60, %v6328_v17  ;;  %v6400_v17 = vld [vmem:[#allocation7 + $0x158] sm:$0xff]  }
 0x55e   : > { %2717 = vst [vmem:[%s7187_s19] sm:$0xff] %v2716_v0  ;;  %v2718_v37 = vpack.c.bf16 %v2716_v0, %v2716_v0  ;;  %v6402_v0 = vld [vmem:[#allocation7 + $0x148] sm:$0xff]  }
 0x560   : > { %v2726_v15 = vrot.slane %v2718_v37, %v8409_v40 }
 0x562   : > { %v2734_v46 = vrot.slane %v2726_v15, %v8409_v40  ;;  %v2727_v4 = vcombine.high %v2726_v15, %v2726_v15 }
 0x564   : > { %v4728_v8 = vpack.i.b16 %v2734_v46, %v2734_v46  ;;  %v7933_v36 = vrot.slane %v2727_v4, %v8409_v40  ;;  %v2745_v63 = vunpack.i.h.s16 %v2734_v46  ;;  %v7955_v30 = vcombine.high %v2734_v46, %v2734_v46  ;;  %v6403_v40 = vld [vmem:[#allocation7 + $0x140] sm:$0xff]   ;;  %v6404_v46 = vld [vmem:[#allocation7 + $0x1f8] sm:$0xff]   ;;  %v6405_v4 = vld [vmem:[#allocation7 + $0x1f0] sm:$0xff]  }
 0x566   : > { %v2756_v7 = vrot.slane %v4728_v8, %v7221_v22  ;;  %v4729_v32 = vpack.i.b16 %v7933_v36, %v7933_v36  ;;  %v2798_v47 = vpack.i.b16 %v2745_v63, %v2745_v63  ;;  %v4730_v61 = vpack.i.b16 %v7955_v30, %v7955_v30  ;;  %v5857_v8 = vld [vmem:[#allocation18 + $0xe4] ss:$16 sps:$4 sm:$0xff]   ;;  %v6410_v63 = vld [vmem:[#allocation7 + $0x1c8] sm:$0xff]  }
 0x567   : > { %v2747_v31 = vunpack.i.h.s16 %v7933_v36  ;;  %v7984_v16 = vcombine.high %v7933_v36, %v7933_v36  ;;  %v2749_v60 = vunpack.i.h.s16 %v7955_v30  ;;  %v5855_v36 = vld [vmem:[#allocation18 + $0xe0] ss:$16 sps:$4 sm:$0xff]  }
 0x568   : > { %5455 = vmatmul.mubr.bf16.vlgmr.msra.gmra.mxu1 %v2756_v7  ;;  %v2848_v1 = vrot.slane %v4729_v32, %v7221_v22  ;;  %v2802_v20 = vrot.slane %v2798_v47, %v7221_v22  ;;  %v2940_v53 = vrot.slane %v4730_v61, %v7221_v22  ;;  %v5860_v7 = vld [vmem:[#allocation18 + $0xc4] ss:$16 sps:$4 sm:$0xff]   ;;  %v6406_v32 = vld [vmem:[#allocation7 + $0x1e8] sm:$0xff]  }
 0x569   : > { %5459 = vmatpush3.bf16.msra.mxu1 %v6364_v48  ;;  %5474 = vmatprep.mubr.msk.bf16.mxu1 %vm6886_vm0, %v8383_v27  ;;  %v2890_v34 = vpack.i.b16 %v2747_v31, %v2747_v31  ;;  %v4731_v10 = vpack.i.b16 %v7984_v16, %v7984_v16  ;;  %v2982_v37 = vpack.i.b16 %v2749_v60, %v2749_v60  ;;  %v5863_v48 = vld [vmem:[#allocation18 + $0xa4] ss:$16 sps:$4 sm:$0xff]   ;;  %v5897_v31 = vld [vmem:[#allocation16 + $0xc0] ss:$16 sps:$4 sm:$0xff]   ;;  %v5918_v60 = vld [vmem:[#allocation16 + $0xe8] ss:$16 sps:$4 sm:$0xff]  }
 0x56a   : > { %5495 = vmatmul.mubr.bf16.vlgmr.msra.gmra.mxu0 %v2848_v1  ;;  %5460 = vmatprep.subr.bf16.mxu1 %v8383_v27  ;;  %v5858_v1 = vld [vmem:[#allocation18 + $0xc0] ss:$16 sps:$4 sm:$0xff]   ;;  %v6411_v47 = vld [vmem:[#allocation7 + $0x1c0] sm:$0xff]  }
 0x56b   : > { %5519 = vmatpush3.bf16.msra.mxu0 %v6365_v11  ;;  %5534 = vmatprep.mubr.msk.bf16.mxu0 %vm6886_vm0, %v8383_v27  ;;  %v2894_v41 = vrot.slane %v2890_v34, %v7221_v22  ;;  %v3032_v42 = vrot.slane %v4731_v10, %v7221_v22  ;;  %v2986_v15 = vrot.slane %v2982_v37, %v7221_v22  ;;  %v6407_v11 = vld [vmem:[#allocation7 + $0x1e0] sm:$0xff]   ;;  %v5903_v34 = vld [vmem:[#allocation16 + $0xa0] ss:$16 sps:$4 sm:$0xff]  }
 0x56c   : > { %5520 = vmatprep.subr.bf16.mxu0 %v8383_v27  ;;  %v5900_v10 = vld [vmem:[#allocation18 + $0x48] ss:$16 sps:$4 sm:$0xff]  }
 0x56d   : > { %5461 = vmatpush3.bf16.msra.mxu1 %v6366_v44  ;;  %v5861_v44 = vld [vmem:[#allocation18 + $0xa0] ss:$16 sps:$4 sm:$0xff]   ;;  %v5924_v37 = vld [vmem:[#allocation16 + $0xc8] ss:$16 sps:$4 sm:$0xff]  }
 0x56e   : > { %5462 = vmatprep.subr.bf16.mxu1 %v8383_v27 }
 0x56f   : > { %5521 = vmatpush3.bf16.msra.mxu0 %v6367_v39  ;;  %v5866_v39 = vld [vmem:[#allocation18 + $0x84] ss:$16 sps:$4 sm:$0xff]  }
 0x570   : > { %5522 = vmatprep.subr.bf16.mxu0 %v8383_v27 }
 0x571   : > { %5463 = vmatpush3.bf16.msra.mxu1 %v6368_v2  ;;  %v6408_v2 = vld [vmem:[#allocation7 + $0x1d8] sm:$0xff]  }
 0x572   : > { %5464 = vmatprep.subr.bf16.mxu1 %v8383_v27 }
 0x573   : > { %5523 = vmatpush3.bf16.msra.mxu0 %v6369_v55  ;;  %v5864_v55 = vld [vmem:[#allocation18 + $0x80] ss:$16 sps:$4 sm:$0xff]  }
 0x574   : > { %5524 = vmatprep.subr.bf16.mxu0 %v8383_v27 }
 0x575   : > { %5465 = vmatpush3.bf16.msra.mxu1 %v6370_v56  ;;  %v5869_v56 = vld [vmem:[#allocation18 + $0x64] ss:$16 sps:$4 sm:$0xff]  }
 0x576   : > { %5466 = vmatprep.subr.bf16.mxu1 %v8383_v27 }
 0x577   : > { %5525 = vmatpush3.bf16.msra.mxu0 %v6371_v35  ;;  %v6409_v35 = vld [vmem:[#allocation7 + $0x1d0] sm:$0xff]  }
 0x578   : > { %5526 = vmatprep.subr.bf16.mxu0 %v8383_v27 }
 0x579   : > { %5467 = vmatpush3.bf16.msra.mxu1 %v6372_v5  ;;  %v5867_v5 = vld [vmem:[#allocation18 + $0x60] ss:$16 sps:$4 sm:$0xff]  }
 0x57a   : > { %5468 = vmatprep.subr.bf16.mxu1 %v8383_v27 }
 0x57b   : > { %5527 = vmatpush3.bf16.msra.mxu0 %v6373_v50  ;;  %v2751_v50 = vunpack.i.h.s16 %v7984_v16  ;;  %v5894_v16 = vld [vmem:[#allocation18 + $0x68] ss:$16 sps:$4 sm:$0xff]  }
 0x57c   : > { %5528 = vmatprep.subr.bf16.mxu0 %v8383_v27 }
 0x57d   : > { %5469 = vmatpush3.bf16.msra.mxu1 %v6374_v45  ;;  %v5875_v45 = vld [vmem:[#allocation18 + $0x44] ss:$16 sps:$4 sm:$0xff]   ;;  %v3074_v30 = vpack.i.b16 %v2751_v50, %v2751_v50  ;;  %v5956_v50 = vld [vmem:[#allocation16 + $0x2c] ss:$16 sps:$4 sm:$0xff]  }
 0x57e   : > { %5470 = vmatprep.subr.bf16.mxu1 %v8383_v27 }
 0x57f   : > { %5529 = vmatpush3.bf16.msra.mxu0 %v6375_v25  ;;  %v5873_v25 = vld [vmem:[#allocation18 + $0x40] ss:$16 sps:$4 sm:$0xff]   ;;  %v3078_v61 = vrot.slane %v3074_v30, %v7221_v22  ;;  %v5962_v30 = vld [vmem:[#allocation16 + $0xc] ss:$16 sps:$4 sm:$0xff]  }
 0x580   : > { %5530 = vmatprep.subr.bf16.mxu0 %v8383_v27 }
 0x581   : > { %5471 = vmatpush3.bf16.msra.mxu1 %v6376_v18  ;;  %v5872_v18 = vld [vmem:[#allocation18 + $0xec] ss:$16 sps:$4 sm:$0xff]  }
 0x582   : > { %5472 = vmatprep.subr.bf16.mxu1 %v8383_v27 }
 0x583   : > { %5531 = vmatpush3.bf16.msra.mxu0 %v6377_v59  ;;  %v5870_v59 = vld [vmem:[#allocation18 + $0xe8] ss:$16 sps:$4 sm:$0xff]  }
 0x584   : > { %5532 = vmatprep.subr.bf16.mxu0 %v8383_v27 }
 0x585   : > { %5473 = vmatpush3.bf16.msra.mxu1 %v6378_v38  ;;  %v5878_v38 = vld [vmem:[#allocation18 + $0xcc] ss:$16 sps:$4 sm:$0xff]  }
 0x586   : > { %5498 = vmatprep.subr.bf16.mxu1 %v8383_v27 }
 0x587   : > { %5533 = vmatpush3.bf16.msra.mxu0 %v6379_v19  ;;  %v5879_v19 = vld [vmem:[#allocation18 + $0x20] ss:$16 sps:$4 sm:$0xff]  }
 0x588   : > { %5475 = vmatmul.mubr.bf16.vlgmr.msra.gmra.mxu1 %v2802_v20  ;;  %5558 = vmatprep.subr.bf16.mxu0 %v8383_v27  ;;  %v5881_v20 = vld [vmem:[#allocation18 + $0x24] ss:$16 sps:$4 sm:$0xff]  }
 0x589   : > { %5499 = vmatpush3.bf16.msra.mxu1 %v6380_v13  ;;  %5514 = vmatprep.mubr.msk.bf16.mxu1 %vm6886_vm0, %v8383_v27  ;;  %v5887_v13 = vld [vmem:[#allocation18 + $0x4] ss:$16 sps:$4 sm:$0xff]  }
 0x58a   : > { %5535 = vmatmul.mubr.bf16.vlgmr.msra.gmra.mxu0 %v2940_v53  ;;  %5500 = vmatprep.subr.bf16.mxu1 %v8383_v27  ;;  %v5876_v53 = vld [vmem:[#allocation18 + $0xc8] ss:$16 sps:$4 sm:$0xff]  }
 0x58b   : > { %5559 = vmatpush3.bf16.msra.mxu0 %v6381_v9  ;;  %5574 = vmatprep.mubr.msk.bf16.mxu0 %vm6886_vm0, %v8383_v27  ;;  %v5885_v9 = vld [vmem:[#allocation18] ss:$16 sps:$4 sm:$0xff]  }
 0x58c   : > { %5560 = vmatprep.subr.bf16.mxu0 %v8383_v27 }
 0x58d   : > { %5501 = vmatpush3.bf16.msra.mxu1 %v6382_v12  ;;  %v5882_v12 = vld [vmem:[#allocation18 + $0xa8] ss:$16 sps:$4 sm:$0xff]  }
 0x58e   : > { %5502 = vmatprep.subr.bf16.mxu1 %v8383_v27 }
 0x58f   : > { %5561 = vmatpush3.bf16.msra.mxu0 %v6383_v14  ;;  %v5890_v14 = vld [vmem:[#allocation18 + $0x8c] ss:$16 sps:$4 sm:$0xff]  }
 0x590   : > { %5562 = vmatprep.subr.bf16.mxu0 %v8383_v27 }
 0x591   : > { %5503 = vmatpush3.bf16.msra.mxu1 %v6384_v43  ;;  %v6888_v43 = vmov 0  }
 0x592   : > { %5504 = vmatprep.subr.bf16.mxu1 %v8383_v27 }
 0x593   : > { %5563 = vmatpush3.bf16.msra.mxu0 %v6385_v33  ;;  %v5891_v33 = vld [vmem:[#allocation16 + $0xe0] ss:$16 sps:$4 sm:$0xff]  }
 0x594   : > { %5564 = vmatprep.subr.bf16.mxu0 %v8383_v27 }
 0x595   : > { %5505 = vmatpush3.bf16.msra.mxu1 %v6386_v6  ;;  %v5893_v6 = vld [vmem:[#allocation16 + $0xe4] ss:$16 sps:$4 sm:$0xff]  }
 0x596   : > { %5506 = vmatprep.subr.bf16.mxu1 %v8383_v27 }
 0x597   : > { %5565 = vmatpush3.bf16.msra.mxu0 %v6387_v57  ;;  %v8410_v57 = vld [vmem:[#allocation44_spill] sm:$0xff] }
 0x598   : > { %5566 = vmatprep.subr.bf16.mxu0 %v8383_v27 }
 0x599   : > { %5507 = vmatpush3.bf16.msra.mxu1 %v6388_v51  ;;  %v5888_v51 = vld [vmem:[#allocation18 + $0x88] ss:$16 sps:$4 sm:$0xff]  }
 0x59a   : > { %5508 = vmatprep.subr.bf16.mxu1 %v8383_v27 }
 0x59b   : > { %5567 = vmatpush3.bf16.msra.mxu0 %v6389_v49  ;;  %v5899_v49 = vld [vmem:[#allocation16 + $0xc4] ss:$16 sps:$4 sm:$0xff]  }
 0x59c   : > { %5568 = vmatprep.subr.bf16.mxu0 %v8383_v27 }
 0x59d   : > { %5509 = vmatpush3.bf16.msra.mxu1 %v6390_v3  ;;  %v5896_v3 = vld [vmem:[#allocation18 + $0x6c] ss:$16 sps:$4 sm:$0xff]  }
 0x59e   : > { %5510 = vmatprep.subr.bf16.mxu1 %v8383_v27 }
 0x59f   : > { %5569 = vmatpush3.bf16.msra.mxu0 %v6391_v29  ;;  %v5905_v29 = vld [vmem:[#allocation16 + $0xa4] ss:$16 sps:$4 sm:$0xff]  }
 0x5a0   : > { %5570 = vmatprep.subr.bf16.mxu0 %v8383_v27 }
 0x5a1   : > { %5511 = vmatpush3.bf16.msra.mxu1 %v6392_v23  ;;  %v5902_v23 = vld [vmem:[#allocation18 + $0x4c] ss:$16 sps:$4 sm:$0xff]  }
 0x5a2   : > { %5512 = vmatprep.subr.bf16.mxu1 %v8383_v27 }
 0x5a3   : > { %5571 = vmatpush3.bf16.msra.mxu0 %v6393_v52  ;;  %v5911_v52 = vld [vmem:[#allocation16 + $0x84] ss:$16 sps:$4 sm:$0xff]  }
 0x5a4   : > { %5572 = vmatprep.subr.bf16.mxu0 %v8383_v27 }
 0x5a5   : > { %5513 = vmatpush3.bf16.msra.mxu1 %v6394_v24  ;;  %v5908_v24 = vld [vmem:[#allocation18 + $0x2c] ss:$16 sps:$4 sm:$0xff]  }
 0x5a6   : > { %5538 = vmatprep.subr.bf16.mxu1 %v8383_v27 }
 0x5a7   : > { %5573 = vmatpush3.bf16.msra.mxu0 %v6395_v28  ;;  %v5917_v28 = vld [vmem:[#allocation16 + $0x64] ss:$16 sps:$4 sm:$0xff]  }
 0x5a8   : > { %5515 = vmatmul.mubr.bf16.vlgmr.msra.gmra.mxu1 %v2894_v41  ;;  %3416 = vmatprep.subr.bf16.mxu0 %v5857_v8  ;;  %v5909_v41 = vld [vmem:[#allocation16 + $0x80] ss:$16 sps:$4 sm:$0xff]   ;;  %v5938_v8 = vld [vmem:[#allocation16 + $0x8c] ss:$16 sps:$4 sm:$0xff]  }
 0x5a9   : > { %5539 = vmatpush3.bf16.msra.mxu1 %v6396_v54  ;;  %5554 = vmatprep.mubr.msk.bf16.mxu1 %vm6886_vm0, %v8383_v27  ;;  %v5914_v54 = vld [vmem:[#allocation18 + $0xc] ss:$16 sps:$4 sm:$0xff]  }
 0x5aa   : > { %5575 = vmatmul.mubr.bf16.vlgmr.msra.gmra.mxu0 %v3032_v42  ;;  %5540 = vmatprep.subr.bf16.mxu1 %v8383_v27  ;;  %v5906_v42 = vld [vmem:[#allocation18 + $0x28] ss:$16 sps:$4 sm:$0xff]  }
 0x5ab   : > { %3417 = vmatpush1.bf16.msra.mxu0 %v5855_v36  ;;  %3448 = vmatprep.mubr.bf16.mxu0 %v6888_v43  ;;  %v5933_v36 = vld [vmem:[#allocation16] ss:$16 sps:$4 sm:$0xff]  }
 0x5ac   : > { %3418 = vmatprep.subr.bf16.mxu0 %v5860_v7  ;;  %v5935_v7 = vld [vmem:[#allocation16 + $0x4] ss:$16 sps:$4 sm:$0xff]  }
 0x5ad   : > { %5541 = vmatpush3.bf16.msra.mxu1 %v6397_v58  ;;  %v5915_v58 = vld [vmem:[#allocation16 + $0x60] ss:$16 sps:$4 sm:$0xff]  }
 0x5ae   : > { %5542 = vmatprep.subr.bf16.mxu1 %v8383_v27 }
 0x5af   : > { %3419 = vmatpush1.bf16.msra.mxu0 %v5858_v1  ;;  %v5936_v1 = vld [vmem:[#allocation16 + $0x88] ss:$16 sps:$4 sm:$0xff]  }
 0x5b0   : > { %3420 = vmatprep.subr.bf16.mxu0 %v5863_v48  ;;  %v5939_v48 = vld [vmem:[#allocation16 + $0x1e0] ss:$16 sps:$4 sm:$0xff]  }
 0x5b1   : > { %5543 = vmatpush3.bf16.msra.mxu1 %v6398_v21  ;;  %v5923_v21 = vld [vmem:[#allocation16 + $0x44] ss:$16 sps:$4 sm:$0xff]  }
 0x5b2   : > { %5544 = vmatprep.subr.bf16.mxu1 %v8383_v27 }
 0x5b3   : > { %3421 = vmatpush1.bf16.msra.mxu0 %v5861_v44  ;;  %v5947_v44 = vld [vmem:[#allocation16 + $0x1c4] ss:$16 sps:$4 sm:$0xff]  }
 0x5b4   : > { %3422 = vmatprep.subr.bf16.mxu0 %v5866_v39  ;;  %v5942_v39 = vld [vmem:[#allocation16 + $0x68] ss:$16 sps:$4 sm:$0xff]  }
 0x5b5   : > { %5545 = vmatpush3.bf16.msra.mxu1 %v6399_v26  ;;  %v5912_v26 = vld [vmem:[#allocation18 + $0x8] ss:$16 sps:$4 sm:$0xff]  }
 0x5b6   : > { %5546 = vmatprep.subr.bf16.mxu1 %v8383_v27 }
 0x5b7   : > { %3423 = vmatpush1.bf16.msra.mxu0 %v5864_v55  ;;  %v5950_v55 = vld [vmem:[#allocation16 + $0x4c] ss:$16 sps:$4 sm:$0xff]  }
 0x5b8   : > { %3424 = vmatprep.subr.bf16.mxu0 %v5869_v56  ;;  %v5953_v56 = vld [vmem:[#allocation16 + $0x1a4] ss:$16 sps:$4 sm:$0xff]  }
 0x5b9   : > { %5547 = vmatpush3.bf16.msra.mxu1 %v6400_v17  ;;  %v5920_v17 = vld [vmem:[#allocation16 + $0xec] ss:$16 sps:$4 sm:$0xff]  }
 0x5ba   : > { %5548 = vmatprep.subr.bf16.mxu1 %v8383_v27 }
 0x5bb   : > { %3425 = vmatpush1.bf16.msra.mxu0 %v5867_v5  ;;  %v5951_v5 = vld [vmem:[#allocation16 + $0x1a0] ss:$16 sps:$4 sm:$0xff]  }
 0x5bc   : > { %3426 = vmatprep.subr.bf16.mxu0 %v5875_v45  ;;  %v5959_v45 = vld [vmem:[#allocation16 + $0x184] ss:$16 sps:$4 sm:$0xff]  }
 0x5bd   : > { %5549 = vmatpush3.bf16.msra.mxu1 %v6401_v62  ;;  %v5921_v62 = vld [vmem:[#allocation16 + $0x40] ss:$16 sps:$4 sm:$0xff]  }
 0x5be   : > { %5550 = vmatprep.subr.bf16.mxu1 %v8383_v27 }
 0x5bf   : > { %3427 = vmatpush1.bf16.msra.mxu0 %v5873_v25  ;;  %v5957_v25 = vld [vmem:[#allocation16 + $0x180] ss:$16 sps:$4 sm:$0xff]  }
 0x5c0   : > { %3428 = vmatprep.subr.bf16.mxu0 %v5881_v20  ;;  %v5966_v20 = vld [vmem:[#allocation16 + $0x1e8] ss:$16 sps:$4 sm:$0xff]  }
 0x5c1   : > { %5551 = vmatpush3.bf16.msra.mxu1 %v6402_v0  ;;  %v5926_v0 = vld [vmem:[#allocation16 + $0xcc] ss:$16 sps:$4 sm:$0xff]  }
 0x5c2   : > { %5552 = vmatprep.subr.bf16.mxu1 %v8383_v27 }
 0x5c3   : > { %3429 = vmatpush1.bf16.msra.mxu0 %v5879_v19  ;;  %v5969_v19 = vld [vmem:[#allocation16 + $0x140] ss:$16 sps:$4 sm:$0xff]  }
 0x5c4   : > { %3430 = vmatprep.subr.bf16.mxu0 %v5887_v13  ;;  %v5972_v13 = vld [vmem:[#allocation16 + $0x1c8] ss:$16 sps:$4 sm:$0xff]  }
 0x5c5   : > { %5553 = vmatpush3.bf16.msra.mxu1 %v6403_v40  ;;  %v5932_v40 = vld [vmem:[#allocation16 + $0xac] ss:$16 sps:$4 sm:$0xff]  }
 0x5c6   : > { %5578 = vmatprep.subr.bf16.mxu1 %v8383_v27 }
 0x5c7   : > { %3431 = vmatpush1.bf16.msra.mxu0 %v5885_v9 }
 0x5c8   : > { %5555 = vmatmul.mubr.bf16.vlgmr.msra.gmra.mxu1 %v2986_v15  ;;  %3818 = vmatprep.subr.bf16.mxu0 %v5893_v6  ;;  %v5929_v15 = vld [vmem:[#allocation16 + $0x24] ss:$16 sps:$4 sm:$0xff]  }
 0x5c9   : > { %5579 = vmatpush3.bf16.msra.mxu1 %v6404_v46  ;;  %5594 = vmatprep.mubr.msk.bf16.mxu1 %vm6886_vm0, %v8383_v27  ;;  %v5927_v46 = vld [vmem:[#allocation16 + $0x20] ss:$16 sps:$4 sm:$0xff]  }
 0x5ca   : > { %5580 = vmatprep.subr.bf16.mxu1 %v8383_v27  ;;  %3449 = vmatmul.mubr.bf16.vlgmr.msra.gmra.mxu0 %v8410_v57 }
 0x5cb   : > { %3819 = vmatpush1.bf16.msra.mxu0 %v5891_v33  ;;  %v5977_v33 = vld [vmem:[#allocation16 + $0x124] ss:$16 sps:$4 sm:$0xff]  }
 0x5cc   : > { %3820 = vmatprep.subr.bf16.mxu0 %v5899_v49  ;;  %v5978_v49 = vld [vmem:[#allocation16 + $0x1a8] ss:$16 sps:$4 sm:$0xff]  }
 0x5cd   : > { %5581 = vmatpush3.bf16.msra.mxu1 %v6405_v4  ;;  %v5930_v4 = vld [vmem:[#allocation16 + $0xa8] ss:$16 sps:$4 sm:$0xff]  }
 0x5ce   : > { %5582 = vmatprep.subr.bf16.mxu1 %v8383_v27 }
 0x5cf   : > { %3821 = vmatpush1.bf16.msra.mxu0 %v5897_v31 }
 0x5d0   : > { %3822 = vmatprep.subr.bf16.mxu0 %v5905_v29  ;;  %v5981_v29 = vld [vmem:[#allocation16 + $0x100] ss:$16 sps:$4 sm:$0xff]  }
 0x5d1   : > { %5583 = vmatpush3.bf16.msra.mxu1 %v6406_v32  ;;  %v5941_v32 = vld [vmem:[#allocation16 + $0x1e4] ss:$16 sps:$4 sm:$0xff]  }
 0x5d2   : > { %5584 = vmatprep.subr.bf16.mxu1 %v8383_v27 }
 0x5d3   : > { %3823 = vmatpush1.bf16.msra.mxu0 %v5903_v34 }
 0x5d4   : > { %3824 = vmatprep.subr.bf16.mxu0 %v5911_v52  ;;  %v5984_v52 = vld [vmem:[#allocation16 + $0x188] ss:$16 sps:$4 sm:$0xff]  }
 0x5d5   : > { %5585 = vmatpush3.bf16.msra.mxu1 %v6407_v11  ;;  %v5944_v11 = vld [vmem:[#allocation16 + $0x6c] ss:$16 sps:$4 sm:$0xff]  }
 0x5d6   : > { %5586 = vmatprep.subr.bf16.mxu1 %v8383_v27 }
 0x5d7   : > { %3825 = vmatpush1.bf16.msra.mxu0 %v5909_v41  ;;  %v5992_v41 = vld [vmem:[#allocation16 + $0x14c] ss:$16 sps:$4 sm:$0xff]  }
 0x5d8   : > { %3826 = vmatprep.subr.bf16.mxu0 %v5917_v28  ;;  %v6001_v28 = vld [vmem:[%s8297_s12 + $0x74] ss:$8 sps:$4 sm:$0xff]  }
 0x5d9   : > { %5587 = vmatpush3.bf16.msra.mxu1 %v6408_v2  ;;  %v5945_v2 = vld [vmem:[#allocation16 + $0x1c0] ss:$16 sps:$4 sm:$0xff]  }
 0x5da   : > { %5588 = vmatprep.subr.bf16.mxu1 %v8383_v27 }
 0x5db   : > { %3827 = vmatpush1.bf16.msra.mxu0 %v5915_v58  ;;  %v5993_v58 = vld [vmem:[#allocation16 + $0x128] ss:$16 sps:$4 sm:$0xff]  }
 0x5dc   : > { %3828 = vmatprep.subr.bf16.mxu0 %v5923_v21  ;;  %v5998_v21 = vld [vmem:[#allocation16 + $0x10c] ss:$16 sps:$4 sm:$0xff]  }
 0x5dd   : > { %5589 = vmatpush3.bf16.msra.mxu1 %v6409_v35  ;;  %v5948_v35 = vld [vmem:[#allocation16 + $0x48] ss:$16 sps:$4 sm:$0xff]  }
 0x5de   : > { %5590 = vmatprep.subr.bf16.mxu1 %v8383_v27 }
 0x5df   : > { %3829 = vmatpush1.bf16.msra.mxu0 %v5921_v62 }
 0x5e0   : > { %3830 = vmatprep.subr.bf16.mxu0 %v5929_v15 }
 0x5e1   : > { %5591 = vmatpush3.bf16.msra.mxu1 %v6410_v63  ;;  %v5954_v63 = vld [vmem:[#allocation16 + $0x28] ss:$16 sps:$4 sm:$0xff]  }
 0x5e2   : > { %5592 = vmatprep.subr.bf16.mxu1 %v8383_v27  ;;  %v5884_v27 = vld [vmem:[#allocation18 + $0xac] ss:$16 sps:$4 sm:$0xff]  }
 0x5e3   : > { %3831 = vmatpush1.bf16.msra.mxu0 %v5927_v46 }
 0x5e4   : > { %3832 = vmatprep.subr.bf16.mxu0 %v5935_v7 }
 0x5e5   : > { %5593 = vmatpush3.bf16.msra.mxu1 %v6411_v47  ;;  %v5960_v47 = vld [vmem:[#allocation16 + $0x8] ss:$16 sps:$4 sm:$0xff]  }
 0x5e6   : > { %3457 = vmatprep.subr.bf16.mxu1 %v5872_v18  ;;  %v5965_v18 = vld [vmem:[#allocation16 + $0x164] ss:$16 sps:$4 sm:$0xff]  }
 0x5e7   : > { %3833 = vmatpush1.bf16.msra.mxu0 %v5933_v36 }
 0x5e8   : > { %5595 = vmatmul.mubr.bf16.vlgmr.msra.gmra.mxu1 %v3078_v61  ;;  %3834 = vmatprep.subr.bf16.mxu0 %v5941_v32  ;;  %v5968_v61 = vld [vmem:[#allocation16 + $0x1ec] ss:$16 sps:$4 sm:$0xff]  }
 0x5e9   : > { %3458 = vmatpush1.bf16.msra.mxu1 %v5870_v59  ;;  %3489 = vmatprep.mubr.bf16.mxu1 %v6888_v43  ;;  %v5963_v59 = vld [vmem:[#allocation16 + $0x160] ss:$16 sps:$4 sm:$0xff]  }
 0x5ea   : > { %3459 = vmatprep.subr.bf16.mxu1 %v5878_v38  ;;  %v5971_v38 = vld [vmem:[#allocation16 + $0x144] ss:$16 sps:$4 sm:$0xff]  }
 0x5eb   : > { %3835 = vmatpush2.bf16.msra.mxu0 %v5939_v48 }
 0x5ec   : > { %3836 = vmatprep.subr.bf16.mxu0 %v5947_v44 }
 0x5ed   : > { %3460 = vmatpush1.bf16.msra.mxu1 %v5876_v53  ;;  %v5974_v53 = vld [vmem:[#allocation16 + $0x1cc] ss:$16 sps:$4 sm:$0xff]  }
 0x5ee   : > { %3461 = vmatprep.subr.bf16.mxu1 %v5884_v27 }
 0x5ef   : > { %3837 = vmatpush2.bf16.msra.mxu0 %v5945_v2 }
 0x5f0   : > { %3838 = vmatprep.subr.bf16.mxu0 %v5953_v56 }
 0x5f1   : > { %3462 = vmatpush1.bf16.msra.mxu1 %v5882_v12 }
 0x5f2   : > { %3463 = vmatprep.subr.bf16.mxu1 %v5890_v14  ;;  %v5980_v14 = vld [vmem:[#allocation16 + $0x1ac] ss:$16 sps:$4 sm:$0xff]  }
 0x5f3   : > { %3839 = vmatpush2.bf16.msra.mxu0 %v5951_v5 }
 0x5f4   : > { %3840 = vmatprep.subr.bf16.mxu0 %v5959_v45 }
 0x5f5   : > { %3464 = vmatpush1.bf16.msra.mxu1 %v5888_v51  ;;  %v5975_v51 = vld [vmem:[#allocation16 + $0x120] ss:$16 sps:$4 sm:$0xff]  }
 0x5f6   : > { %3465 = vmatprep.subr.bf16.mxu1 %v5896_v3 }
 0x5f7   : > { %3841 = vmatpush2.bf16.msra.mxu0 %v5957_v25 }
 0x5f8   : > { %3842 = vmatprep.subr.bf16.mxu0 %v5965_v18 }
 0x5f9   : > { %3466 = vmatpush1.bf16.msra.mxu1 %v5894_v16  ;;  %v5983_v16 = vld [vmem:[#allocation16 + $0x104] ss:$16 sps:$4 sm:$0xff]  }
 0x5fa   : > { %3467 = vmatprep.subr.bf16.mxu1 %v5902_v23  ;;  %v5986_v23 = vld [vmem:[#allocation16 + $0x18c] ss:$16 sps:$4 sm:$0xff]  }
 0x5fb   : > { %3843 = vmatpush2.bf16.msra.mxu0 %v5963_v59 }
 0x5fc   : > { %3844 = vmatprep.subr.bf16.mxu0 %v5971_v38 }
 0x5fd   : > { %3468 = vmatpush1.bf16.msra.mxu1 %v5900_v10  ;;  %v5989_v10 = vld [vmem:[#allocation16 + $0x16c] ss:$16 sps:$4 sm:$0xff]  }
 0x5fe   : > { %3469 = vmatprep.subr.bf16.mxu1 %v5908_v24  ;;  %v5987_v24 = vld [vmem:[#allocation16 + $0x168] ss:$16 sps:$4 sm:$0xff]  }
 0x5ff   : > { %3845 = vmatpush2.bf16.msra.mxu0 %v5969_v19 }
 0x600   : > { %3846 = vmatprep.subr.bf16.mxu0 %v5977_v33 }
 0x601   : > { %3470 = vmatpush1.bf16.msra.mxu1 %v5906_v42  ;;  %v5990_v42 = vld [vmem:[#allocation16 + $0x148] ss:$16 sps:$4 sm:$0xff]  }
 0x602   : > { %3471 = vmatprep.subr.bf16.mxu1 %v5914_v54  ;;  %v5995_v54 = vld [vmem:[#allocation16 + $0x12c] ss:$16 sps:$4 sm:$0xff]  }
 0x603   : > { %3847 = vmatpush2.bf16.msra.mxu0 %v5975_v51 }
 0x604   : > { %3848 = vmatprep.subr.bf16.mxu0 %v5983_v16 }
 0x605   : > { %3472 = vmatpush1.bf16.msra.mxu1 %v5912_v26  ;;  %v5996_v26 = vld [vmem:[#allocation16 + $0x108] ss:$16 sps:$4 sm:$0xff]  }
 0x606   : > { %3859 = vmatprep.subr.bf16.mxu1 %v5920_v17 }
 0x607   : > { %3849 = vmatpush2.bf16.msra.mxu0 %v5981_v29 }
 0x608   : > { %3490 = vmatmul.mubr.bf16.vlgmr.msra.gmra.mxu1 %v8410_v57  ;;  %4253 = vmatprep.subr.bf16.mxu0 %v6001_v28 }
 0x609   : > { %3860 = vmatpush1.bf16.msra.mxu1 %v5918_v60 }
 0x60a   : > { %3861 = vmatprep.subr.bf16.mxu1 %v5926_v0 }
 0x60d   : > { %3862 = vmatpush1.bf16.msra.mxu1 %v5924_v37 }
 0x60e   : > { %3863 = vmatprep.subr.bf16.mxu1 %v5932_v40 }
 0x611   : > { %3864 = vmatpush1.bf16.msra.mxu1 %v5930_v4 }
 0x612   : > { %3865 = vmatprep.subr.bf16.mxu1 %v5938_v8 }
 0x615   : > { %3866 = vmatpush1.bf16.msra.mxu1 %v5936_v1 }
 0x616   : > { %3867 = vmatprep.subr.bf16.mxu1 %v5944_v11 }
 0x619   : > { %3868 = vmatpush1.bf16.msra.mxu1 %v5942_v39 }
 0x61a   : > { %3869 = vmatprep.subr.bf16.mxu1 %v5950_v55 }
 0x61d   : > { %3870 = vmatpush1.bf16.msra.mxu1 %v5948_v35 }
 0x61e   : > { %3871 = vmatprep.subr.bf16.mxu1 %v5956_v50 }
 0x621   : > { %3872 = vmatpush1.bf16.msra.mxu1 %v5954_v63 }
 0x622   : > { %3873 = vmatprep.subr.bf16.mxu1 %v5962_v30 }
 0x625   : > { %3874 = vmatpush1.bf16.msra.mxu1 %v5960_v47 }
 0x626   : > { %3875 = vmatprep.subr.bf16.mxu1 %v5968_v61 }
 0x628   : > { %v2792_v27 = vpop.f32.mrf.mxu1 }
 0x629   : > { %3876 = vmatpush2.bf16.msra.mxu1 %v5966_v20  ;;  %v3120_v60 = vpack.c.bf16 %v2792_v27, %v2792_v27 }
 0x62a   : > { %v5456_v9 = vpop.f32.mrf.mxu1  ;;  %v2884_v12 = vpop.f32.mrf.mxu0  ;;  %3877 = vmatprep.subr.bf16.mxu1 %v5974_v53 }
 0x62b   : > { %v3122_v17 = vpack.c.bf16 %v2884_v12, %v2884_v12  ;;  %v3136_v36 = vunpack.c.l.b16 %v3120_v60 }
 0x62c   : > { %v2795_v6 = vpop.f32.mrf.mxu1  ;;  %v5496_v57 = vpop.f32.mrf.mxu0 }
 0x62d   : > { %3878 = vmatpush2.bf16.msra.mxu1 %v5972_v13  ;;  %v3138_v37 = vunpack.c.l.b16 %v3122_v17 }
 0x62e   : > { %v5457_v3 = vpop.f32.mrf.mxu1  ;;  %v2887_v31 = vpop.f32.mrf.mxu0  ;;  %3879 = vmatprep.subr.bf16.mxu1 %v5980_v14 }
 0x62f   : > { %v3146_v32 = vrot.slane %v3138_v37, 6  ;;  %v6004_v37 = vld [vmem:[%s8297_s12 + $0x64] ss:$8 sps:$4 sm:$0xff]  }
 0x630   : > { %v5497_v34 = vpop.f32.mrf.mxu0 }
 0x631   : > { %3880 = vmatpush2.bf16.msra.mxu1 %v5978_v49 }
 0x632   : > { %3881 = vmatprep.subr.bf16.mxu1 %v5986_v23  ;;  %v707_v23 = vld [vmem:[%s7183_s26] sm:$0xff] }
 0x635   : > { %3882 = vmatpush2.bf16.msra.mxu1 %v5984_v52 }
 0x636   : > { %3883 = vmatprep.subr.bf16.mxu1 %v5989_v10 }
 0x639   : > { %3884 = vmatpush2.bf16.msra.mxu1 %v5987_v24 }
 0x63a   : > { %3885 = vmatprep.subr.bf16.mxu1 %v5992_v41  ;;  %v8031_v41 = vpack.c.bf16 %v707_v23, %v707_v23  ;;  %v8411_v23 = vld [vmem:[#allocation45_spill] sm:$0xff] }
 0x63d   : > { %3886 = vmatpush2.bf16.msra.mxu1 %v5990_v42 }
 0x63e   : > { %3887 = vmatprep.subr.bf16.mxu1 %v5995_v54  ;;  %v5999_v54 = vld [vmem:[%s8297_s12 + $0x70] ss:$8 sps:$4 sm:$0xff]  }
 0x641   : > { %3888 = vmatpush2.bf16.msra.mxu1 %v5993_v58 }
 0x642   : > { %3889 = vmatprep.subr.bf16.mxu1 %v5998_v21 }
 0x645   : > { %3890 = vmatpush2.bf16.msra.mxu1 %v5996_v26 }
 0x648   : > { %v2838_v62 = vpop.f32.mrf.mxu1 }
 0x649   : > { %v3121_v0 = vpack.c.bf16 %v2838_v62, %v2838_v62 }
 0x64a   : > { %v5476_v40 = vpop.f32.mrf.mxu1  ;;  %v2976_v15 = vpop.f32.mrf.mxu0 }
 0x64b   : > { %v3137_v46 = vunpack.c.l.b16 %v3121_v0  ;;  %v3124_v2 = vpack.c.bf16 %v2976_v15, %v2976_v15  ;;  %v6002_v40 = vld [vmem:[%s8297_s12 + $0x60] ss:$8 sps:$4 sm:$0xff]   ;;  %v6005_v15 = vld [vmem:[%s8297_s12 + $0x50] ss:$8 sps:$4 sm:$0xff]  }
 0x64c   : > { %v2841_v4 = vpop.f32.mrf.mxu1  ;;  %v5536_v8 = vpop.f32.mrf.mxu0 }
 0x64d   : > { %v3144_v7 = vrot.slane %v3137_v46, 7  ;;  %v3140_v35 = vunpack.c.l.b16 %v3124_v2  ;;  %v6010_v46 = vld [vmem:[%s8297_s12 + $0x44] ss:$8 sps:$4 sm:$0xff]   ;;  %v6008_v4 = vld [vmem:[%s8297_s12 + $0x40] ss:$8 sps:$4 sm:$0xff]  }
 0x64e   : > { %v5477_v1 = vpop.f32.mrf.mxu1  ;;  %v2979_v48 = vpop.f32.mrf.mxu0  ;;  %v6013_v8 = vld [vmem:[%s8297_s12 + $0x34] ss:$8 sps:$4 sm:$0xff]   ;;  %v6020_v2 = vld [vmem:[%s8297_s12] ss:$8 sps:$4 sm:$0xff]  }
 0x64f   : > { %v3145_v11 = vsel %vm2686_vm1, %v3144_v7, %v3136_v36  ;;  %v3150_v18 = vrot.slane %v3140_v35, 4  ;;  %v6011_v36 = vld [vmem:[%s8297_s12 + $0x30] ss:$8 sps:$4 sm:$0xff]   ;;  %v6016_v7 = vld [vmem:[%s8297_s12 + $0x24] ss:$8 sps:$4 sm:$0xff]  }
 0x650   : > { %v5537_v44 = vpop.f32.mrf.mxu0  ;;  %v3147_v39 = vsel %vm2689_vm2, %v3146_v32, %v3145_v11  ;;  %v6014_v32 = vld [vmem:[%s8297_s12 + $0x20] ss:$8 sps:$4 sm:$0xff]   ;;  %v6019_v1 = vld [vmem:[%s8297_s12 + $0x14] ss:$8 sps:$4 sm:$0xff]   ;;  %v6017_v48 = vld [vmem:[%s8297_s12 + $0x10] ss:$8 sps:$4 sm:$0xff]  }
 0x651   : > { %v6028_v11 = vld [vmem:[%s8297_s12 + $0x174] ss:$8 sps:$4 sm:$0xff]   ;;  %v6022_v44 = vld [vmem:[%s8297_s12 + $0x4] ss:$8 sps:$4 sm:$0xff]   ;;  %v6032_v35 = vld [vmem:[%s8297_s12 + $0x160] ss:$8 sps:$4 sm:$0xff]  }
 0x652   : > { %4294 = vmatprep.subr.bf16.mxu1 %v6028_v11 }
 0x668   : > { %v2930_v55 = vpop.f32.mrf.mxu1 }
 0x669   : > { %v3123_v56 = vpack.c.bf16 %v2930_v55, %v2930_v55  ;;  %v6034_v55 = vld [vmem:[%s8297_s12 + $0x164] ss:$8 sps:$4 sm:$0xff]  }
 0x66a   : > { %v5516_v5 = vpop.f32.mrf.mxu1  ;;  %v3068_v50 = vpop.f32.mrf.mxu0 }
 0x66b   : > { %v3139_v45 = vunpack.c.l.b16 %v3123_v56  ;;  %v3126_v14 = vpack.c.bf16 %v3068_v50, %v3068_v50  ;;  %v6025_v56 = vld [vmem:[%s8297_s12 + $0xf4] ss:$8 sps:$4 sm:$0xff]   ;;  %v6023_v5 = vld [vmem:[%s8297_s12 + $0xf0] ss:$8 sps:$4 sm:$0xff]  }
 0x66c   : > { %v2933_v63 = vpop.f32.mrf.mxu1  ;;  %v5576_v25 = vpop.f32.mrf.mxu0  ;;  %v6040_v50 = vld [vmem:[%s8297_s12 + $0x154] ss:$8 sps:$4 sm:$0xff]  }
 0x66d   : > { %v3148_v30 = vrot.slane %v3139_v45, 5  ;;  %v3142_v6 = vunpack.c.l.b16 %v3126_v14  ;;  %v6031_v45 = vld [vmem:[%s8297_s12 + $0xe4] ss:$8 sps:$4 sm:$0xff]   ;;  %v6038_v63 = vld [vmem:[%s8297_s12 + $0x150] ss:$8 sps:$4 sm:$0xff]  }
 0x66e   : > { %v5517_v47 = vpop.f32.mrf.mxu1  ;;  %v3071_v59 = vpop.f32.mrf.mxu0  ;;  %v6029_v25 = vld [vmem:[%s8297_s12 + $0xe0] ss:$8 sps:$4 sm:$0xff]   ;;  %v6064_v14 = vld [vmem:[%s8297_s12 + $0x114] ss:$8 sps:$4 sm:$0xff]  }
 0x66f   : > { %v3149_v61 = vsel %vm2692_vm3, %v3148_v30, %v3147_v39  ;;  %v3154_v29 = vrot.slane %v3142_v6, 2  ;;  %v6026_v39 = vld [vmem:[%s8297_s12 + $0x170] ss:$8 sps:$4 sm:$0xff]   ;;  %v6046_v30 = vld [vmem:[%s8297_s12 + $0x144] ss:$8 sps:$4 sm:$0xff]  }
 0x670   : > { %v5577_v38 = vpop.f32.mrf.mxu0  ;;  %v3151_v20 = vsel %vm2695_vm4, %v3150_v18, %v3149_v61  ;;  %v6037_v18 = vld [vmem:[%s8297_s12 + $0xd4] ss:$8 sps:$4 sm:$0xff]   ;;  %v6044_v47 = vld [vmem:[%s8297_s12 + $0x140] ss:$8 sps:$4 sm:$0xff]   ;;  %v6035_v59 = vld [vmem:[%s8297_s12 + $0xd0] ss:$8 sps:$4 sm:$0xff]  }
 0x671   : > { %v6052_v61 = vld [vmem:[%s8297_s12 + $0x134] ss:$8 sps:$4 sm:$0xff]   ;;  %v6043_v38 = vld [vmem:[%s8297_s12 + $0xc4] ss:$8 sps:$4 sm:$0xff]   ;;  %v6053_v6 = vld [vmem:[%s8297_s12 + $0xa0] ss:$8 sps:$4 sm:$0xff]  }
 0x688   : > { %v3022_v19 = vpop.f32.mrf.mxu1 }
 0x689   : > { %v3125_v9 = vpack.c.bf16 %v3022_v19, %v3022_v19  ;;  %v6041_v19 = vld [vmem:[%s8297_s12 + $0xc0] ss:$8 sps:$4 sm:$0xff]  }
 0x68a   : > { %v5556_v53 = vpop.f32.mrf.mxu1  ;;  %v8033_v42 = vpop.f32.mrf.mxu0 }
 0x68b   : > { %v3141_v12 = vunpack.c.l.b16 %v3125_v9  ;;  %v6049_v53 = vld [vmem:[%s8297_s12 + $0xb4] ss:$8 sps:$4 sm:$0xff]   ;;  %v6058_v9 = vld [vmem:[%s8297_s12 + $0x124] ss:$8 sps:$4 sm:$0xff]  }
 0x68c   : > { %v3025_v27 = vpop.f32.mrf.mxu1  ;;  %v8038_v58 = vpop.f32.mrf.mxu0 }
 0x68d   : > { %v3152_v33 = vrot.slane %v3141_v12, 3  ;;  %v6047_v27 = vld [vmem:[%s8297_s12 + $0xb0] ss:$8 sps:$4 sm:$0xff]   ;;  %v6055_v12 = vld [vmem:[%s8297_s12 + $0xa4] ss:$8 sps:$4 sm:$0xff]  }
 0x68e   : > { %v5557_v13 = vpop.f32.mrf.mxu1  ;;  %v3454_v21 = vpop.f32.mrf.mxu0 }
 0x68f   : > { %v3153_v3 = vsel %vm2698_vm5, %v3152_v33, %v3151_v20  ;;  %v6050_v20 = vld [vmem:[%s8297_s12 + $0x130] ss:$8 sps:$4 sm:$0xff]   ;;  %v6056_v13 = vld [vmem:[%s8297_s12 + $0x120] ss:$8 sps:$4 sm:$0xff]  }
 0x690   : > { %v3155_v10 = vsel %vm2701_vm6, %v3154_v29, %v3153_v3  ;;  %v3455_v26 = vpop.f32.mrf.mxu0  ;;  %v6062_v33 = vld [vmem:[%s8297_s12 + $0x110] ss:$8 sps:$4 sm:$0xff]   ;;  %v6065_v29 = vld [vmem:[%s8297_s12 + $0x80] ss:$8 sps:$4 sm:$0xff]  }
 0x691   : > { %v6059_v3 = vld [vmem:[%s8297_s12 + $0x90] ss:$8 sps:$4 sm:$0xff]  }
 0x6a8   : > { %v3114_v57 = vpop.f32.mrf.mxu1 }
 0x6a9   : > { %v3127_v51 = vpack.c.bf16 %v3114_v57, %v3114_v57  ;;  %v6070_v57 = vld [vmem:[%s8297_s12 + $0x104] ss:$8 sps:$4 sm:$0xff]  }
 0x6aa   : > { %v5596_v49 = vpop.f32.mrf.mxu1 }
 0x6ab   : > { %v3143_v31 = vunpack.c.l.b16 %v3127_v51  ;;  %v6061_v51 = vld [vmem:[%s8297_s12 + $0x94] ss:$8 sps:$4 sm:$0xff]   ;;  %v6068_v49 = vld [vmem:[%s8297_s12 + $0x100] ss:$8 sps:$4 sm:$0xff]  }
 0x6ac   : > { %v3117_v16 = vpop.f32.mrf.mxu1 }
 0x6ad   : > { %v3156_v34 = vrot.slane %v3143_v31, 1  ;;  %v6067_v31 = vld [vmem:[%s8297_s12 + $0x84] ss:$8 sps:$4 sm:$0xff]  }
 0x6ae   : > { %v5597_v52 = vpop.f32.mrf.mxu1  ;;  %v3900_v16 = vld [vmem:[#allocation19] sm:$0xf] }
 0x6af   : > { %v3157_v24 = vsel %vm2704_vm7, %v3156_v34, %v3155_v10  ;;  %v3908_v34 = vsub.s32 1, %v8411_v23  ;;  %v3905_v52 = vrot.slane %v3900_v16, %v7221_v22 }
 0x6b0   : > { %v3158_v28 = vpack.c.b16 %v3157_v24, %v3157_v24 }
 0x6b2   : > { %3850 = vmatprep.mubr.bf16.mxu0 %v3158_v28  ;;  %3891 = vmatprep.mubr.bf16.mxu1 %v3158_v28 }
 0x6b3   : > { %3851 = vmatmul.mubr.bf16.vlgmr.msra.gmra.mxu0 %v8031_v41  ;;  %3892 = vmatmul.mubr.bf16.vlgmr.msra.gmra.mxu1 %v8031_v41 }
 0x6b4   : > { %4285 = vmatprep.mubr.bf16.mxu0 %v3158_v28  ;;  %4254 = vmatpush1.bf16.msra.mxu0 %v5999_v54  ;;  %v3909_v54 = vrot.slane %v3900_v16, %v3908_v34 }
 0x6b5   : > { %4326 = vmatprep.mubr.bf16.mxu1 %v6888_v43  ;;  %4255 = vmatprep.subr.bf16.mxu0 %v6004_v37  ;;  %v6007_v43 = vld [vmem:[%s8297_s12 + $0x54] ss:$8 sps:$4 sm:$0xff]  }
 0x6b6   : > { %4295 = vmatpush1.bf16.msra.mxu1 %v6026_v39 }
 0x6b7   : > { %4296 = vmatprep.subr.bf16.mxu1 %v6034_v55 }
 0x6b8   : > { %4256 = vmatpush1.bf16.msra.mxu0 %v6002_v40 }
 0x6b9   : > { %4257 = vmatprep.subr.bf16.mxu0 %v6007_v43 }
 0x6ba   : > { %4297 = vmatpush1.bf16.msra.mxu1 %v6032_v35 }
 0x6bb   : > { %4298 = vmatprep.subr.bf16.mxu1 %v6040_v50 }
 0x6bc   : > { %4258 = vmatpush1.bf16.msra.mxu0 %v6005_v15 }
 0x6bd   : > { %4259 = vmatprep.subr.bf16.mxu0 %v6010_v46 }
 0x6be   : > { %4299 = vmatpush1.bf16.msra.mxu1 %v6038_v63 }
 0x6bf   : > { %4300 = vmatprep.subr.bf16.mxu1 %v6046_v30 }
 0x6c0   : > { %4260 = vmatpush1.bf16.msra.mxu0 %v6008_v4 }
 0x6c1   : > { %4261 = vmatprep.subr.bf16.mxu0 %v6013_v8 }
 0x6c2   : > { %4301 = vmatpush1.bf16.msra.mxu1 %v6044_v47 }
 0x6c3   : > { %4302 = vmatprep.subr.bf16.mxu1 %v6052_v61 }
 0x6c4   : > { %4262 = vmatpush1.bf16.msra.mxu0 %v6011_v36 }
 0x6c5   : > { %4263 = vmatprep.subr.bf16.mxu0 %v6016_v7 }
 0x6c6   : > { %4303 = vmatpush1.bf16.msra.mxu1 %v6050_v20 }
 0x6c7   : > { %4304 = vmatprep.subr.bf16.mxu1 %v6058_v9  ;;  %v4001_v9 = vld [vmem:[#allocation21] sm:$0x3] }
 0x6c8   : > { %v8043_v17 = vpop.f32.mrf.mxu1  ;;  %4264 = vmatpush1.bf16.msra.mxu0 %v6014_v32 }
 0x6c9   : > { %4265 = vmatprep.subr.bf16.mxu0 %v6019_v1 }
 0x6ca   : > { %v8045_v62 = vpop.f32.mrf.mxu1  ;;  %4305 = vmatpush1.bf16.msra.mxu1 %v6056_v13 }
 0x6cb   : > { %4306 = vmatprep.subr.bf16.mxu1 %v6064_v14  ;;  %v4010_v14 = vrot.slane %v4001_v9, %v3908_v34 }
 0x6cc   : > { %v3495_v60 = vpop.f32.mrf.mxu1  ;;  %4266 = vmatpush1.bf16.msra.mxu0 %v6017_v48  ;;  %v3912_v48 = vsub.s32 2, %v8411_v23 }
 0x6cd   : > { %4267 = vmatprep.subr.bf16.mxu0 %v6022_v44 }
 0x6ce   : > { %v3496_v0 = vpop.f32.mrf.mxu1  ;;  %4307 = vmatpush1.bf16.msra.mxu1 %v6062_v33  ;;  %v3913_v44 = vrot.slane %v3900_v16, %v3912_v48 }
 0x6cf   : > { %4308 = vmatprep.subr.bf16.mxu1 %v6070_v57 }
 0x6d0   : > { %4268 = vmatpush1.bf16.msra.mxu0 %v6020_v2 }
 0x6d1   : > { %4269 = vmatprep.subr.bf16.mxu0 %v6025_v56 }
 0x6d2   : > { %4309 = vmatpush1.bf16.msra.mxu1 %v6068_v49 }
 0x6d4   : > { %4270 = vmatpush2.bf16.msra.mxu0 %v6023_v5 }
 0x6d5   : > { %4271 = vmatprep.subr.bf16.mxu0 %v6031_v45  ;;  %4327 = vmatmul.mubr.bf16.vlgmr.msra.gmra.mxu1 %v8031_v41  ;;  %v3916_v41 = vsub.s32 3, %v8411_v23  ;;  %v709_v45 = vld [vmem:[#allocation3] sm:$0xff] }
 0x6d7   : > { %v3917_v7 = vrot.slane %v3900_v16, %v3916_v41 }
 0x6d8   : > { %4272 = vmatpush2.bf16.msra.mxu0 %v6029_v25 }
 0x6d9   : > { %4273 = vmatprep.subr.bf16.mxu0 %v6037_v18 }
 0x6dc   : > { %4274 = vmatpush2.bf16.msra.mxu0 %v6035_v59 }
 0x6dd   : > { %4275 = vmatprep.subr.bf16.mxu0 %v6043_v38 }
 0x6e0   : > { %4276 = vmatpush2.bf16.msra.mxu0 %v6041_v19 }
 0x6e1   : > { %4277 = vmatprep.subr.bf16.mxu0 %v6049_v53 }
 0x6e4   : > { %4278 = vmatpush2.bf16.msra.mxu0 %v6047_v27 }
 0x6e5   : > { %4279 = vmatprep.subr.bf16.mxu0 %v6055_v12  ;;  %v4006_v12 = vrot.slane %v4001_v9, %v7221_v22 }
 0x6e8   : > { %4280 = vmatpush2.bf16.msra.mxu0 %v6053_v6 }
 0x6e9   : > { %4281 = vmatprep.subr.bf16.mxu0 %v6061_v51 }
 0x6ec   : > { %4282 = vmatpush2.bf16.msra.mxu0 %v6059_v3 }
 0x6ed   : > { %4283 = vmatprep.subr.bf16.mxu0 %v6067_v31 }
 0x6f0   : > { %4284 = vmatpush2.bf16.msra.mxu0 %v6065_v29 }
 0x773   : > { %v3852_v10 = vpop.f32.mrf.mxu0  ;;  %v3893_v24 = vpop.f32.mrf.mxu1 }
 0x774   : > { %v3853_v28 = vadd.f32 %v3852_v10, %v8033_v42  ;;  %v3894_v11 = vadd.f32 %v3893_v24, %v8043_v17 }
 0x775   : > { %v3854_v21 = vpop.f32.mrf.mxu0  ;;  %v3895_v26 = vpop.f32.mrf.mxu1 }
 0x776   : > { %v3922_v60 = vadd.f32 %v3905_v52, %v3853_v28  ;;  %v3855_v0 = vadd.f32 %v3854_v21, %v8038_v58  ;;  %v3896_v42 = vadd.f32 %v3895_v26, %v8045_v62  ;;  %v3924_v55 = vadd.f32 %v3913_v44, %v3894_v11 }
 0x777   : > { %v3856_v37 = vpop.f32.mrf.mxu0  ;;  %v3897_v40 = vpop.f32.mrf.mxu1 }
 0x778   : > { %v3926_v43 = vsub.f32 0.0, %v3922_v60  ;;  %v3923_v15 = vadd.f32 %v3909_v54, %v3855_v0  ;;  %v3925_v1 = vadd.f32 %v3917_v7, %v3896_v42 }
 0x779   : > { %v3857_v46 = vpop.f32.mrf.mxu0  ;;  %v3898_v4 = vpop.f32.mrf.mxu1 }
 0x77a   : > { %v3927_v8 = vmul.f32 1.442695, %v3926_v43  ;;  %v3932_v36 = vsub.f32 0.0, %v3923_v15  ;;  %v3939_v58 = vsub.f32 0.0, %v3925_v1 }
 0x77c   : > { %6331 = vpow2.f32 %v3927_v8  ;;  %v3933_v32 = vmul.f32 1.442695, %v3932_v36  ;;  %v3940_v39 = vmul.f32 1.442695, %v3939_v58 }
 0x77e   : > { %6333 = vpow2.f32 %v3933_v32 }
 0x77f   : > { %6335 = vpow2.f32 %v3940_v39 }
 0x789   : > { %v6332_v2 = vpop.eup %6331 }
 0x78a   : > { %v3929_v56 = vadd.f32 1.0, %v6332_v2 }
 0x78b   : > { %v6334_v35 = vpop.eup %6333 }
 0x78c   : > { %6337 = vrcp.f32 %v3929_v56  ;;  %v3935_v5 = vadd.f32 1.0, %v6334_v35  ;;  %v6336_v62 = vpop.eup %6335 }
 0x78d   : > { %6339 = vtanh.f32 %v3924_v55  ;;  %v3942_v30 = vadd.f32 1.0, %v6336_v62 }
 0x78e   : > { %6341 = vrcp.f32 %v3935_v5 }
 0x78f   : > { %6343 = vrcp.f32 %v3942_v30 }
 0x795   : > { %v4328_v19 = vpop.f32.mrf.mxu1 }
 0x797   : > { %v4330_v53 = vpop.f32.mrf.mxu1 }
 0x799   : > { %v6338_v50 = vpop.eup %6337  ;;  %v4332_v27 = vpop.f32.mrf.mxu1 }
 0x79a   : > { %v6340_v63 = vpop.eup %6339 }
 0x79b   : > { %v6342_v25 = vpop.eup %6341  ;;  %v3946_v47 = vmul.f32 %v6340_v63, %v6338_v50  ;;  %v4333_v13 = vpop.f32.mrf.mxu1 }
 0x79c   : > { %v3945_v18 = vmul.f32 %v6342_v25, %v709_v45  ;;  %v6344_v59 = vpop.eup %6343 }
 0x79e   : > { %v3947_v17 = vadd.f32 %v3946_v47, %v3945_v18 }
 0x7a0   : > { %6345 = vtanh.f32 %v3947_v17  ;;  %3951 = vst [vmem:[#allocation3] sm:$0xff] %v3947_v17 }
 0x7ad   : > { %v6346_v61 = vpop.eup %6345 }
 0x7ae   : > { %v3949_v38 = vmul.f32 %v6346_v61, %v6344_v59 }
 0x7b0   : > { %3950 = vst [vmem:[#allocation2] sm:$0xff] %v3949_v38  ;;  %v3952_v20 = vpack.c.bf16 %v3949_v38, %v3949_v38 }
 0x7b2   : > { %4286 = vmatmul.mubr.bf16.vlgmr.msra.gmra.mxu0 %v3952_v20 }
 0x872   : > { %v4287_v33 = vpop.f32.mrf.mxu0 }
 0x873   : > { %v4288_v6 = vadd.f32 %v4287_v33, %v4006_v12 }
 0x874   : > { %v4289_v57 = vpop.f32.mrf.mxu0 }
 0x875   : > { %v4290_v51 = vadd.f32 %v4289_v57, %v4010_v14  ;;  %v4329_v49 = vadd.f32 %v4328_v19, %v4288_v6  ;;  %4340 = sbr.rel (%p4876_p9) target bundleno = 2171 (0x87b), region = 128 }
 0x876   : > { %v4291_v3 = vpop.f32.mrf.mxu0 }
 0x877   : > { %4335 = vst [vmem:[%s7185_s18] sm:$0xff] %v4329_v49  ;;  %v4331_v31 = vadd.f32 %v4330_v53, %v4290_v51 }
 0x878   : > { %v4292_v29 = vpop.f32.mrf.mxu0 }
 0x879   : > { %4336 = vst [vmem:[%s7185_s18 + $0x8] sm:$0xff] %v4331_v31 }
 0x87a   : > { %4341 = vst [vmem:[#allocation25] sm:$0xff] %v3949_v38  ;;  %4342 = vst [vmem:[#allocation26] sm:$0xff] %v3947_v17 }
 0x87b PF: > { %s4348_s20 = sand.u32 1, %s7004_s28   ;;  %s4881_s29 = sshll.u32 %s7004_s28, 7 }
 0x87c   : > { %s8207_s30 = scalar_lea.hbm %s8300_s15, %s4881_s29  ;;  %s4376_s27 = sshll.u32 %s7187_s19, 4  ;;  %s4377_s27 = int_to_ptr.vmem [resolvable:$true] %s4376_s27 }
 0x87d   : > { %s4888_s23 = sshll.u32 %s7004_s28, 8  ;;  %s4349_s2 = scalar_lea.sflag [#allocation24], %s4348_s20 }
 0x87e   : > { %s6698_s22 = scalar_lea.vmem %s4377_s27, 128  ;;  %p8412_p4 = scmp.ne.s32.totalorder %s8341_s1, 0 }
 0x87f   : > { %p6699_p0 = scmp.ne.s32.totalorder %s4377_s27, %s6698_s22  ;;  %s6889_s17 = smov [#allocation23]  }
 0x880   : > { %s6702_s26 = sshll.u32 %s6889_s17, 4  ;;  %s6703_s26 = int_to_ptr.vmem [resolvable:$false] %s6702_s26 }
 0x881   : > { %p6700_p5 = pnand %p6699_p0, %p8412_p4  ;;  %s6704_s3 = scalar_lea.vmem %s6703_s26, 256 }
 0x882   : > { %p6705_p13 = scmp.lt.s32.totalorder %s4377_s27, %s6703_s26  ;;  %p6706_p11 = scmp.lt.s32.totalorder %s6704_s3, %s6698_s22 }
 0x883   : > { %p6701_p2 = pneg %p6700_p5 }
 0x884   : > { %p6707_p8 = por %p6706_p11, %p6705_p13 }
 0x886   : > { %p6708_p12 = pnand %p6707_p8, %p6701_p2 }
 0x888   : > { %6711 = shalt.err (!%p6708_p12)
}
 0x889   : > { %s6712_s19 = scalar_lea.hbm %s8207_s30, 128  ;;  %s6716_s24 = scalar_lea.hbm %s8300_s15, 512 }
 0x88a   : > { %p6713_p1 = scmp.ne.s32.totalorder %s8207_s30, %s6712_s19  ;;  %p6717_p6 = scmp.lt.s32.totalorder %s8207_s30, %s8300_s15 }
 0x88b   : > { %p6718_p10 = scmp.lt.s32.totalorder %s6716_s24, %s6712_s19 }
 0x88c   : > { %p6714_p7 = pnand %p6713_p1, %p8412_p4 }
 0x88d   : > { %p6719_p9 = por %p6718_p10, %p6717_p6 }
 0x88e   : > { %p6715_p3 = pneg %p6714_p7 }
 0x890   : > { %p6720_p0 = pnand %p6719_p9, %p6715_p3 }
 0x892   : > { %6723 = shalt.err (!%p6720_p0)
}
 0x893   : > { %5643 = dma.vmem_to_hbm [thread:$0]  (%p8412_p4), %s4377_s27, 128, %s8207_s30, %s4349_s2  }
 0x894   : > { %s4361_s26 = scalar_lea.hbm %s8299_s14, %s4888_s23  ;;  %s4363_s20 = sshll.u32 %s7185_s18, 4  ;;  %s4364_s20 = int_to_ptr.vmem [resolvable:$true] %s4363_s20 }
 0x895   : > { %s4344_s29 = scalar_lea.sflag [#allocation6], %s7174_s0  ;;  %s6724_s21 = scalar_lea.vmem %s4364_s20, 256 }
 0x896   : > { %p6725_p5 = scmp.ne.s32.totalorder %s4364_s20, %s6724_s21  ;;  %s6890_s19 = smov [#allocation22]  }
 0x897   : > { %s6728_s24 = sshll.u32 %s6890_s19, 4  ;;  %s6729_s24 = int_to_ptr.vmem [resolvable:$false] %s6728_s24 }
 0x898   : > { %p6726_p2 = pnand %p6725_p5, %p8412_p4  ;;  %s6730_s17 = scalar_lea.vmem %s6729_s24, 512 }
 0x899   : > { %p6731_p11 = scmp.lt.s32.totalorder %s4364_s20, %s6729_s24  ;;  %p6732_p8 = scmp.lt.s32.totalorder %s6730_s17, %s6724_s21 }
 0x89a   : > { %p6727_p13 = pneg %p6726_p2 }
 0x89b   : > { %p6733_p12 = por %p6732_p8, %p6731_p11 }
 0x89d   : > { %p6734_p1 = pnand %p6733_p12, %p6727_p13 }
 0x89f   : > { %6737 = shalt.err (!%p6734_p1)
}
 0x8a0   : > { %s6738_s30 = scalar_lea.hbm %s4361_s26, 256  ;;  %s6742_s27 = scalar_lea.hbm %s8299_s14, 1024 }
 0x8a1   : > { %p6739_p7 = scmp.ne.s32.totalorder %s4361_s26, %s6738_s30  ;;  %p6743_p10 = scmp.lt.s32.totalorder %s4361_s26, %s8299_s14 }
 0x8a2   : > { %p6744_p9 = scmp.lt.s32.totalorder %s6742_s27, %s6738_s30 }
 0x8a3   : > { %p6740_p3 = pnand %p6739_p7, %p8412_p4 }
 0x8a4   : > { %p6745_p0 = por %p6744_p9, %p6743_p10 }
 0x8a5   : > { %p6741_p6 = pneg %p6740_p3 }
 0x8a7   : > { %p6746_p5 = pnand %p6745_p0, %p6741_p6 }
 0x8a9   : > { %6749 = shalt.err (!%p6746_p5)
}
 0x8aa   : > { %5642 = dma.vmem_to_hbm [thread:$0]  (%p8412_p4), %s4364_s20, 256, %s4361_s26, %s4344_s29  }
 0x8ab   : > { %s6891_s3 = smov [#allocation25]   ;;  %s6892_s21 = smov [#allocation26]  }
 0x8ac   : > { %s4387_s22 = sshll.u32 %s6891_s3, 4  ;;  %s4398_s19 = sshll.u32 %s6892_s21, 4  ;;  %s4388_s22 = int_to_ptr.vmem [resolvable:$true] %s4387_s22  ;;  %s4399_s19 = int_to_ptr.vmem [resolvable:$true] %s4398_s19 }
 0x8ad   : > { %s6750_s24 = scalar_lea.vmem %s4388_s22, 128  ;;  %p8413_p13 = scmp.eq.s32.totalorder %s7004_s28, 3 }
 0x8ae   : > { %p6751_p2 = scmp.ne.s32.totalorder %s4388_s22, %s6750_s24  ;;  %p6757_p12 = scmp.lt.s32.totalorder %s4388_s22, %s4388_s22 }
 0x8af   : > { %p6758_p1 = scmp.lt.s32.totalorder %s6750_s24, %s6750_s24 }
 0x8b0   : > { %p6752_p11 = pnand %p6751_p2, %p8413_p13 }
 0x8b1   : > { %p6759_p7 = por %p6758_p1, %p6757_p12 }
 0x8b2   : > { %p6753_p8 = pneg %p6752_p11 }
 0x8b4   : > { %p6760_p3 = pnand %p6759_p7, %p6753_p8 }
 0x8b6   : > { %6763 = shalt.err (!%p6760_p3)
}
 0x8b7   : > { %p8414_p6 = pmov %p8413_p13  ;;  %s6774_s26 = scalar_lea.vmem %s4399_s19, 128 }
 0x8b8   : > { %p6775_p4 = scmp.ne.s32.totalorder %s4399_s19, %s6774_s26  ;;  %p6781_p5 = scmp.lt.s32.totalorder %s4399_s19, %s4399_s19 }
 0x8b9   : > { %5645 = dma.vmem_to_hbm [thread:$0]  (%p8414_p6), %s4388_s22, 128, %s8301_s16, [#allocation24]  }
 0x8ba   : > { %p8415_p10 = pmov %p8414_p6  ;;  %p6782_p2 = scmp.lt.s32.totalorder %s6774_s26, %s6774_s26 }
 0x8bc   : > { %p6776_p9 = pnand %p6775_p4, %p8415_p10  ;;  %p6783_p13 = por %p6782_p2, %p6781_p5 }
 0x8be   : > { %p6777_p0 = pneg %p6776_p9 }
 0x8c0   : > { %p6784_p11 = pnand %p6783_p13, %p6777_p0 }
 0x8c2   : > { %6787 = shalt.err (!%p6784_p11)
}
 0x8c3   : > { %p8416_p8 = pmov %p8414_p6  ;;  %s8417_s30 = sld [smem:[#allocation55_spill]] }
 0x8c4   : > { %p8418_p12 = pmov %p8414_p6 }
 0x8c9   : > { %5647 = dma.vmem_to_hbm [thread:$0]  (%p8416_p8), %s4399_s19, 128, %s8417_s30, [#allocation27]  }
 0x8ca   : > { %6839 = dma.done.wait (%p8418_p12), [#allocation24], 128   ;;  %p8419_p1 = pmov %p8414_p6 }
 0x8cc   : > { %6841 = vsyncadd (%p8419_p1), [#allocation24], 4294967168  ;;  %p8420_p7 = pmov %p8419_p1 }
 0x8cd   : > { %p8421_p3 = pmov %p8419_p1 }
 0x8ce   : > { %6843 = dma.done.wait (%p8420_p7), [#allocation27], 128  }
 0x8cf   : > { %6845 = vsyncadd (%p8421_p3), [#allocation27], 4294967168 }
 0x8d0 PF: > { %s8422_s0 = sld [smem:[#allocation40_spill]] }
 0x8d1   : > { %s8423_s18 = sld [smem:[#allocation38_spill]] }
 0x8d2   : > { %s8424_s27 = sld [smem:[#allocation43_spill]] }
 0x8d6   : > { %p5721_p6 = scmp.ge.s32.totalorder %s8422_s0, 2 }
 0x8d7   : > { %s4418_s23 = sand.u32 1, %s8423_s18  }
 0x8d8   : > { %p8425_p4 = scmp.ne.s32.totalorder %s8424_s27, 0  ;;  %s4419_s2 = scalar_lea.sflag [#allocation6], %s4418_s23 }
 0x8da   : > { %p5689_p10 = pnand %p5721_p6, %p8425_p4 }
 0x8dc   : > { %p5690_p9 = pneg %p5689_p10 }
 0x8de   : > { %6847 = dma.done.wait (%p5690_p9), %s4419_s2, 256  }
 0x8df   : > { %6849 = vsyncadd (%p5690_p9), %s4419_s2, 4294967040  ;;  %s8426_s3 = sadd.s32 4294967294, %s8422_s0  }
 0x8e0   : > { %s4427_s22 = sand.u32 1, %s8426_s3  }
 0x8e1   : > { %s4428_s21 = scalar_lea.sflag [#allocation24], %s4427_s22 }
 0x8e2   : > { %6851 = dma.done.wait (%p5690_p9), %s4428_s21, 128  }
 0x8e3   : > { %6853 = vsyncadd (%p5690_p9), %s4428_s21, 4294967168  ;;  %s8427_s27 = sld [smem:[#allocation41_spill]]  ;;  %s8430_s24 = smov %s6860_s25 }
 0x8e4   : > { %s8428_s28 = sld [smem:[#allocation39_spill]] }
 0x8e5   : > { %s8429_s26 = sld [smem:[#allocation42_spill]] }
 0x8e9   : > { %p38_p0 = scmp.ge.s32.totalorder %s8427_s27, 6  }
 0x8ea   : > { %s8431_s25 = smov %s8428_s28 }
 0x8eb   :  { %40 = sbr.rel (!%p38_p0) target bundleno = 18 (0x12), region = 197 }
 0x8f0   :  { %4433 = vsyncpa [#allocation5], 1 }
 0x8f1   :  { %4435 = vsyncpa [#allocation5 + $0x1], 1 }
 0x8f2   :  { %4436 = vsyncpa [#allocation8], 1 }
 0x8f3   :  { %4437 = vsyncpa [#allocation11], 1 }
 0x8f4   :  { %4438 = vsyncpa [#allocation14], 1 }
 0x8f5   :  { %4439 = vsyncpa [#allocation17], 1 }
 0x8f6   :  { %4440 = vsyncpa [#allocation20], 1 }
 0x8f7   :  { %4441 = vsyncpa [#allocation6], 1 }
 0x8f8   :  { %4443 = vsyncpa [#allocation6 + $0x1], 1 }
 0x8f9   :  { %4444 = vsyncpa [#allocation24], 1 }
 0x8fa   :  { %4446 = vsyncpa [#allocation24 + $0x1], 1 }
 0x8fb   :  { %4447 = vsyncpa [#allocation27], 1 }

</bundles_post_ra>
